<compile_context>
chip_gen: v6e
topology: v6e:2x2x1
jax: 0.10.0
libtpu: 0.0.40
codegen_flags: <defaults>
</compile_context>

<pallas_src>
import numpy as np
import jax
import jax.numpy as jnp
from jax import lax
from jax.experimental import pallas as pl
from jax.experimental.pallas import tpu as pltpu

# ---------------- model configuration ---------------------------------------------------
D_MODEL = 32            # d_model
D_EMB = 8               # d_embedding
NUM_VAR = 4             # number of continuous input variables
SEQ_LEN = 8             # length of conti_input
TAU = 4                 # target horizon (requires TAU <= SEQ_LEN)
NUM_TARGETS = 2
QUANTILES = (0.1, 0.5, 0.9)
NQ = len(QUANTILES)
TP = SEQ_LEN + TAU      # decoder time length used by TemporalFusionDecoder
NOUT = NUM_TARGETS * NQ
BATCH = 2
LANES = 128

assert TAU <= SEQ_LEN
assert NUM_VAR * D_MODEL <= LANES and NUM_VAR * D_EMB <= LANES


# ---------------- shared math helpers ----------------------------------------------------
def _mm(a, b):
    return jnp.dot(a, b, preferred_element_type=jnp.float32)


def _elu(x):
    # exp only evaluated on the non-positive branch (no spurious inf).
    return jnp.where(x > 0, x, jnp.exp(jnp.minimum(x, 0.0)) - 1.0)


def _layernorm(x, w, b, eps=1e-5):
    mu = jnp.mean(x, axis=-1, keepdims=True)
    var = jnp.mean(jnp.square(x - mu), axis=-1, keepdims=True)
    return (x - mu) * lax.rsqrt(var + eps) * w + b


def _gluln(x, y, p):
    # GLULN(x, y) = LayerNorm(sigmoid(lin1(x)) * lin2(x) + y)
    w1, b1, w2, b2, lnw, lnb = p
    return _layernorm(jax.nn.sigmoid(_mm(x, w1) + b1) * (_mm(x, w2) + b2) + y, lnw, lnb)


def _grn(x, p):
    # GatedResidualNetwork (dropout = identity in eval mode)
    w1, b1, w2, b2 = p[:4]
    eta2 = _mm(x, w1) + b1
    eta1 = _elu(_mm(eta2, w2) + b2)
    return _gluln(eta1, eta2, p[4:])


# ---------------- parameter slab packing -------------------------------------------------
class _Packer:
    """Packs parameter blocks into one [N, 128] f32 slab.

    Matrices (MXU operands) stay 8-row aligned; 1-row vectors (biases, LayerNorm
    scales) are packed densely at the end of the slab — one row each instead of
    eight — to cut the slab DMA size.
    """

    def __init__(self, width=LANES):
        self.width = width
        self.rows = []
        self.layout = {}
        self.vecs = []

    def _pad8(self):
        while len(self.rows) % 8:
            self.rows.append(np.zeros((self.width,), np.float32))

    def add(self, name, arr):
        a = np.asarray(arr, np.float32)
        if a.ndim == 1:
            a = a[None, :]
        r, c = a.shape
        assert c <= self.width, (name, a.shape)
        self._pad8()
        start = len(self.rows)
        for i in range(r):
            row = np.zeros((self.width,), np.float32)
            row[:c] = a[i]
            self.rows.append(row)
        self.layout[name] = (start, r, c)

    def add_vec(self, name, arr):
        a = np.asarray(arr, np.float32).reshape(1, -1)
        assert a.shape[1] <= self.width, (name, a.shape)
        self.vecs.append((name, a))

    def finalize(self):
        self._pad8()
        for name, a in self.vecs:                     # dense 1-row section
            row = np.zeros((self.width,), np.float32)
            row[:a.shape[1]] = a[0]
            self.layout[name] = (len(self.rows), 1, a.shape[1])
            self.rows.append(row)
        self._pad8()
        slab = np.stack(self.rows, axis=0)
        return jnp.asarray(slab), self.layout


def _blockdiag(mats):
    mats = [np.asarray(m, np.float32) for m in mats]
    R = sum(m.shape[0] for m in mats)
    C = sum(m.shape[1] for m in mats)
    out = np.zeros((R, C), np.float32)
    ro = co = 0
    for m in mats:
        out[ro:ro + m.shape[0], co:co + m.shape[1]] = m
        ro += m.shape[0]
        co += m.shape[1]
    return out


def pack_params(P, batch):
    pk = _Packer(LANES)

    def add_gluln(prefix, params6):
        W1, b1, W2, b2, lnw, lnb = [np.asarray(a) for a in params6]
        pk.add(prefix + "_w", np.concatenate([W1, W2], axis=1))     # [in, 2*D]
        pk.add_vec(prefix + "_b", np.concatenate([b1, b2], axis=1))
        pk.add_vec(prefix + "_lnw", lnw)
        pk.add_vec(prefix + "_lnb", lnb)

    # ContiFeatureEmbedding as a block-diag [NUM_VAR, NUM_VAR*D_EMB] matmul
    embW = np.asarray(P["emb_W"])
    pk.add("emb_w", _blockdiag([embW[i:i + 1, :] for i in range(NUM_VAR)]))
    pk.add_vec("emb_b", np.asarray(P["emb_b"]).reshape(1, NUM_VAR * D_EMB))

    # variable-selection GRN (d_model = NUM_VAR)
    W1, b1, W2, b2, gW1, gb1, gW2, gb2, lnw, lnb = [np.asarray(a) for a in P["vsn_vgrn"]]
    pk.add("vg_w1", W1); pk.add_vec("vg_b1", b1)
    pk.add("vg_w2", W2); pk.add_vec("vg_b2", b2)
    pk.add("vg_glw", np.concatenate([gW1, gW2], axis=1))
    pk.add_vec("vg_glb", np.concatenate([gb1, gb2], axis=1))
    pk.add_vec("vg_lnw", lnw); pk.add_vec("vg_lnb", lnb)

    # per-variable GRNs, block-diagonal packed (4x -> one 128-lane matmul chain)
    xg = [[np.asarray(a) for a in P["vsn_xgrn"][i]] for i in range(NUM_VAR)]
    pk.add("xg_w1", _blockdiag([g[0] for g in xg]))                 # [32, 128]
    pk.add_vec("xg_b1", np.concatenate([g[1] for g in xg], axis=1))
    pk.add("xg_w2", _blockdiag([g[2] for g in xg]))                 # [128, 128]
    pk.add_vec("xg_b2", np.concatenate([g[3] for g in xg], axis=1))
    pk.add("xg_glw1", _blockdiag([g[4] for g in xg]))
    pk.add_vec("xg_glb1", np.concatenate([g[5] for g in xg], axis=1))
    pk.add("xg_glw2", _blockdiag([g[6] for g in xg]))
    pk.add_vec("xg_glb2", np.concatenate([g[7] for g in xg], axis=1))
    pk.add_vec("xg_lnw", np.concatenate([g[8] for g in xg], axis=1))
    pk.add_vec("xg_lnb", np.concatenate([g[9] for g in xg], axis=1))
    # helpers for per-block layernorm + softmax mix as matmuls
    pk.add("blk_avg", _blockdiag([np.full((D_MODEL, D_MODEL), 1.0 / D_MODEL,
                                          np.float32)] * NUM_VAR))  # [128, 128]
    pk.add("w_expand", _blockdiag([np.ones((1, D_MODEL), np.float32)] * NUM_VAR))  # [4,128]
    pk.add("blk_sum", np.tile(np.eye(D_MODEL, dtype=np.float32), (NUM_VAR, 1)))    # [128,32]

    # LSTM (gate order i, f, g, o; b = b_ih + b_hh)
    pk.add("lstm_wih", P["lstm_wih"])
    pk.add("lstm_whh", P["lstm_whh"])
    pk.add_vec("lstm_b", P["lstm_b"])

    # TemporalFusionDecoder: GLULNs + fused-QKV MHA
    add_gluln("g1", P["tfd_gluln1"])
    Wq, bq, Wk, bk, Wv, bv, Wo, bo = [np.asarray(a) for a in P["mha"]]
    pk.add("qkv_w", np.concatenate([Wq, Wk, Wv], axis=1))           # [32, 96]
    pk.add_vec("qkv_b", np.concatenate([bq, bk, bv], axis=1))
    pk.add("att_wo", Wo); pk.add_vec("att_bo", bo)
    add_gluln("g2", P["tfd_gluln2"])

    # Constant additive attention mask for the batch-folded, permuted row layout:
    # rows 0..B*T-1 are x1 rows (batch b, time t), rows B*T.. are LSTM rows
    # (batch b, time T+t). Allowed iff same batch element and key_time <= query_time.
    n_x = batch * SEQ_LEN
    n = n_x + batch * TAU
    bt = np.zeros((n, 2), np.int64)
    for r in range(n):
        if r < n_x:
            bt[r] = (r // SEQ_LEN, r % SEQ_LEN)
        else:
            rr = r - n_x
            bt[r] = (rr // TAU, SEQ_LEN + rr % TAU)
    allowed = (bt[:, None, 0] == bt[None, :, 0]) & (bt[None, :, 1] <= bt[:, None, 1])
    pk.add("att_mask", np.where(allowed, 0.0, -1e9).astype(np.float32))

    # PointWiseFeedForward
    pW1, pb1, pW2, pb2 = [np.asarray(a) for a in P["pwff_grn"][:4]]
    pk.add("pw_w1", pW1); pk.add_vec("pw_b1", pb1)
    pk.add("pw_w2", pW2); pk.add_vec("pw_b2", pb2)
    add_gluln("pw_gl", P["pwff_grn"][4:])
    add_gluln("pf", P["pwff_gluln"])

    # TargetFeatureLayer + QuantileOutput packed into two matmuls
    pk.add("tfl_w", np.concatenate([np.asarray(w) for w, _ in P["tfl"]], axis=1))  # [32, 64]
    pk.add_vec("tfl_b", np.concatenate([np.asarray(b) for _, b in P["tfl"]], axis=1))
    qo_w = np.zeros((NUM_TARGETS * D_MODEL, NOUT), np.float32)
    qo_b = np.zeros((1, NOUT), np.float32)
    for nt in range(NUM_TARGETS):
        for qi in range(NQ):
            qo_w[nt * D_MODEL:(nt + 1) * D_MODEL, nt * NQ + qi] = np.asarray(P["qo"][qi][0])[:, 0]
            qo_b[0, nt * NQ + qi] = np.asarray(P["qo"][qi][1])[0, 0]
    pk.add("qo_w", qo_w)
    pk.add_vec("qo_b", qo_b)

    return pk.finalize()


# ---------------- the fused Pallas kernel ------------------------------------------------
def make_fused_kernel(layout, B):
    H = D_MODEL
    T = SEQ_LEN
    NX = B * T            # number of x1 (VSN) rows
    ND = NX + B * TAU     # total decoder rows

    def kernel(x_ref, p_ref, out_ref, dec_ref):
        def W(name):
            r0, nr, nc = layout[name]          # static offsets -> cheap ref slices
            return p_ref[r0:r0 + nr, 0:nc]

        def gluln(xv, yv, prefix):
            z = _mm(xv, W(prefix + "_w")) + W(prefix + "_b")        # fused lin1|lin2
            g = jax.nn.sigmoid(z[:, :H]) * z[:, H:2 * H] + yv
            return _layernorm(g, W(prefix + "_lnw"), W(prefix + "_lnb"))

        x = x_ref[...]                                              # [B*T, NUM_VAR]

        # ---- ContiFeatureEmbedding (block-diag 1->D_EMB linears) ------------------------
        xi = _mm(x, W("emb_w")) + W("emb_b")                        # [B*T, NUM_VAR*D_EMB]

        # ---- variable-selection weights: v_grn -> softmax -------------------------------
        v2 = _mm(xi, W("vg_w1")) + W("vg_b1")                       # [B*T, NUM_VAR]
        v1 = _elu(_mm(v2, W("vg_w2")) + W("vg_b2"))
        vz = _mm(v1, W("vg_glw")) + W("vg_glb")                     # [B*T, 2*NUM_VAR]
        vg = jax.nn.sigmoid(vz[:, :NUM_VAR]) * vz[:, NUM_VAR:] + v2
        logits = _layernorm(vg, W("vg_lnw"), W("vg_lnb"))
        m = jnp.max(logits, axis=-1, keepdims=True)
        e = jnp.exp(logits - m)
        wts = e / jnp.sum(e, axis=-1, keepdims=True)                # [B*T, NUM_VAR]

        # ---- per-variable GRNs, block-diagonal packed to 128 lanes -----------------------
        e2 = _mm(xi, W("xg_w1")) + W("xg_b1")                       # [B*T, NUM_VAR*D_MODEL]
        e1 = _elu(_mm(e2, W("xg_w2")) + W("xg_b2"))
        zz = (jax.nn.sigmoid(_mm(e1, W("xg_glw1")) + W("xg_glb1"))
              * (_mm(e1, W("xg_glw2")) + W("xg_glb2")) + e2)
        avg = W("blk_avg")                                          # per-block mean matrix
        mu = _mm(zz, avg)
        var = _mm(jnp.square(zz - mu), avg)
        gall = (zz - mu) * lax.rsqrt(var + 1e-5) * W("xg_lnw") + W("xg_lnb")
        wexp = _mm(wts, W("w_expand"))                              # broadcast softmax wts
        x1 = _mm(wexp * gall, W("blk_sum"))                         # [B*T, D_MODEL]

        dec_ref[0:NX, :] = x1                                       # decoder rows: all x1 first

        # ---- LSTM: input projection hoisted; batch in lockstep; only TAU used steps -----
        xp = _mm(x1, W("lstm_wih")) + W("lstm_b")                   # [B*T, 4*D_MODEL]
        whh = W("lstm_whh")
        h = jnp.zeros((B, H), jnp.float32)
        c = jnp.zeros((B, H), jnp.float32)
        for t in range(TAU):                                        # static unroll
            xp_t = jnp.concatenate(
                [xp[b * T + t:b * T + t + 1, :] for b in range(B)], axis=0)  # [B, 4H]
            gates = xp_t + _mm(h, whh)                              # gate order i, f, g, o
            i_g = jax.nn.sigmoid(gates[:, 0:H])
            f_g = jax.nn.sigmoid(gates[:, H:2 * H])
            g_g = jnp.tanh(gates[:, 2 * H:3 * H])
            o_g = jax.nn.sigmoid(gates[:, 3 * H:4 * H])
            c = f_g * c + i_g * g_g
            h = o_g * jnp.tanh(c)
            for b in range(B):
                dec_ref[NX + b * TAU + t:NX + b * TAU + t + 1, :] = h[b:b + 1, :]

        dec = dec_ref[...]                                          # [B*TP, D_MODEL]

        # ---- TemporalFusionDecoder (batched; mask handles batch + causal structure) -----
        glu_phi = gluln(dec, dec, "g1")
        qkv = _mm(glu_phi, W("qkv_w")) + W("qkv_b")                 # fused Q|K|V
        q = qkv[:, 0:H]
        k = qkv[:, H:2 * H]
        v = qkv[:, 2 * H:3 * H]
        scores = lax.dot_general(q, k, (((1,), (1,)), ((), ())),
                                 preferred_element_type=jnp.float32) * (1.0 / np.sqrt(H))
        scores = scores + W("att_mask")                             # 0 / -1e9 additive mask
        sm = jnp.max(scores, axis=-1, keepdims=True)
        se = jnp.exp(scores - sm)
        attn = se / jnp.sum(se, axis=-1, keepdims=True)
        b_att = _mm(_mm(attn, v), W("att_wo")) + W("att_bo")
        delta = gluln(b_att, glu_phi, "g2")

        # ---- PointWiseFeedForward --------------------------------------------------------
        p2 = _mm(delta, W("pw_w1")) + W("pw_b1")
        p1 = _elu(_mm(p2, W("pw_w2")) + W("pw_b2"))
        grn_out = gluln(p1, p2, "pw_gl")
        varphi = gluln(grn_out, glu_phi, "pf")

        # ---- TargetFeatureLayer + QuantileOutput (packed, single aligned store) ----------
        v_last = varphi[NX:ND, :]                                   # last TAU steps per batch
        feat = _mm(v_last, W("tfl_w")) + W("tfl_b")                 # [B*TAU, NT*D_MODEL]
        out_ref[...] = _mm(feat, W("qo_w")) + W("qo_b")             # [B*TAU, NT*NQ]

    return kernel


def build_tft_forward(layout, slab_rows, batch):
    kernel = make_fused_kernel(layout, batch)
    BT = batch * SEQ_LEN

    def fwd(x, slab):
        x2 = x.reshape(BT, NUM_VAR)                                 # batch folded into rows
        out = pl.pallas_call(
            kernel,
            grid=(1,),                                              # whole batch in one step
            in_specs=[
                pl.BlockSpec((BT, NUM_VAR), lambda i: (0, 0)),
                pl.BlockSpec((slab_rows, LANES), lambda i: (0, 0)),  # one slab DMA total
            ],
            out_specs=pl.BlockSpec((batch * TAU, NOUT), lambda i: (0, 0)),
            out_shape=jax.ShapeDtypeStruct((batch * TAU, NOUT), jnp.float32),
            scratch_shapes=[
                pltpu.VMEM((batch * TP, D_MODEL), jnp.float32),      # decoder input (x1 ++ h)
            ],
            compiler_params=pltpu.CompilerParams(dimension_semantics=("arbitrary",)),
        )(x2, slab)
        return out.reshape(batch, TAU, NUM_TARGETS, NQ)

    return fwd


# ---------------- deterministic parameter initialization --------------------------------
def _linear(key, d_in, d_out):
    kw, kb = jax.random.split(key)
    bound = 1.0 / np.sqrt(d_in)
    W = jax.random.uniform(kw, (d_in, d_out), jnp.float32, -bound, bound)
    b = jax.random.uniform(kb, (1, d_out), jnp.float32, -bound, bound)
    return W, b


def _gluln_params(key, d_in, d_model):
    k1, k2 = jax.random.split(key)
    W1, b1 = _linear(k1, d_in, d_model)
    W2, b2 = _linear(k2, d_in, d_model)
    return [W1, b1, W2, b2,
            jnp.ones((1, d_model), jnp.float32), jnp.zeros((1, d_model), jnp.float32)]


def _grn_params(key, d_in, d_model):
    k1, k2, k3 = jax.random.split(key, 3)
    W1, b1 = _linear(k1, d_in, d_model)
    W2, b2 = _linear(k2, d_model, d_model)
    return [W1, b1, W2, b2] + _gluln_params(k3, d_model, d_model)


def init_params(key):
    keys = jax.random.split(key, 12)
    P = {}
    # ContiFeatureEmbedding: NUM_VAR linears (1 -> D_EMB)
    P["emb_W"] = jax.random.uniform(keys[0], (NUM_VAR, D_EMB), jnp.float32, -1.0, 1.0)
    P["emb_b"] = jax.random.uniform(keys[1], (NUM_VAR, D_EMB), jnp.float32, -1.0, 1.0)
    # VariableSelectionNetwork
    P["vsn_vgrn"] = _grn_params(keys[2], NUM_VAR * D_EMB, NUM_VAR)
    P["vsn_xgrn"] = [_grn_params(k, D_EMB, D_MODEL) for k in jax.random.split(keys[3], NUM_VAR)]
    # LSTM (gate order i, f, g, o; b = b_ih + b_hh)
    kl = jax.random.split(keys[4], 4)
    bd = 1.0 / np.sqrt(D_MODEL)
    P["lstm_wih"] = jax.random.uniform(kl[0], (D_MODEL, 4 * D_MODEL), jnp.float32, -bd, bd)
    P["lstm_whh"] = jax.random.uniform(kl[1], (D_MODEL, 4 * D_MODEL), jnp.float32, -bd, bd)
    P["lstm_b"] = (jax.random.uniform(kl[2], (1, 4 * D_MODEL), jnp.float32, -bd, bd)
                   + jax.random.uniform(kl[3], (1, 4 * D_MODEL), jnp.float32, -bd, bd))
    # TemporalFusionDecoder glulns + single-head MHA
    P["tfd_gluln1"] = _gluln_params(keys[5], D_MODEL, D_MODEL)
    P["tfd_gluln2"] = _gluln_params(keys[6], D_MODEL, D_MODEL)
    P["mha"] = []
    for kk in jax.random.split(keys[7], 4):
        Wx, bx = _linear(kk, D_MODEL, D_MODEL)
        P["mha"] += [Wx, bx]
    # PointWiseFeedForward
    P["pwff_grn"] = _grn_params(keys[8], D_MODEL, D_MODEL)
    P["pwff_gluln"] = _gluln_params(keys[9], D_MODEL, D_MODEL)
    # TargetFeatureLayer / QuantileOutput
    P["tfl"] = [_linear(k, D_MODEL, D_MODEL) for k in jax.random.split(keys[10], NUM_TARGETS)]
    P["qo"] = [_linear(k, D_MODEL, 1) for k in jax.random.split(keys[11], NQ)]
    return P


# ---------------- pure-JAX reference (unpacked params, same math) ------------------------
def ref_forward(x, P):
    B, T, NV = x.shape
    embs = [x[..., i:i + 1] * P["emb_W"][i][None, None, :] + P["emb_b"][i][None, None, :]
            for i in range(NV)]
    Xi = jnp.concatenate(embs, axis=-1)
    w = jax.nn.softmax(_grn(Xi, P["vsn_vgrn"]), axis=-1)
    combined = jnp.zeros((B, T, D_MODEL), jnp.float32)
    for i in range(NV):
        combined = combined + w[..., i:i + 1] * _grn(embs[i], P["vsn_xgrn"][i])

    Wih, Whh, bias = P["lstm_wih"], P["lstm_whh"], P["lstm_b"]

    def step(carry, xt):
        h, c = carry
        gates = xt @ Wih + h @ Whh + bias
        H = D_MODEL
        i_g = jax.nn.sigmoid(gates[:, :H]); f_g = jax.nn.sigmoid(gates[:, H:2 * H])
        g_g = jnp.tanh(gates[:, 2 * H:3 * H]); o_g = jax.nn.sigmoid(gates[:, 3 * H:])
        c = f_g * c + i_g * g_g
        h = o_g * jnp.tanh(c)
        return (h, c), h

    init = (jnp.zeros((B, D_MODEL), jnp.float32), jnp.zeros((B, D_MODEL), jnp.float32))
    _, hs = lax.scan(step, init, jnp.swapaxes(combined, 0, 1))
    lstm_out = jnp.swapaxes(hs, 0, 1)
    lstm_hidden = jnp.concatenate([combined, lstm_out], axis=1)[:, :TP, :]

    glu_phi = _gluln(lstm_hidden, lstm_hidden, P["tfd_gluln1"])
    Wq, bq, Wk, bk, Wv, bv, Wo, bo = P["mha"]
    q = glu_phi @ Wq + bq; k = glu_phi @ Wk + bk; v = glu_phi @ Wv + bv
    scores = jnp.einsum("btd,bsd->bts", q, k) / np.sqrt(D_MODEL)
    row = np.arange(TP)[:, None]; col = np.arange(TP)[None, :]
    scores = jnp.where((col > row)[None], -1e30, scores)
    attn = jax.nn.softmax(scores, axis=-1)
    b_att = jnp.einsum("bts,bsd->btd", attn, v) @ Wo + bo
    delta = _gluln(b_att, glu_phi, P["tfd_gluln2"])
    varphi = _gluln(_grn(delta, P["pwff_grn"]), glu_phi, P["pwff_gluln"])

    v_last = varphi[:, TP - TAU:, :]
    outs = []
    for nt in range(NUM_TARGETS):
        feat = v_last @ P["tfl"][nt][0] + P["tfl"][nt][1]
        qcols = [feat @ P["qo"][qi][0] + P["qo"][qi][1] for qi in range(NQ)]
        outs.append(jnp.concatenate(qcols, axis=-1)[:, :, None, :])
    return jnp.concatenate(outs, axis=2)                            # [B, TAU, NT, NQ]


# ---------------- main -------------------------------------------------------------------
if __name__ == "__main__":
    key = jax.random.PRNGKey(0)
    kp, kx = jax.random.split(key)
    params = init_params(kp)
    slab, layout = pack_params(params, BATCH)
    conti_input = jax.random.normal(kx, (BATCH, SEQ_LEN, NUM_VAR), dtype=jnp.float32)

    fwd = jax.jit(build_tft_forward(layout, int(slab.shape[0]), BATCH))
    out = jax.block_until_ready(fwd(conti_input, slab))
    assert out.shape == (BATCH, TAU, NUM_TARGETS, NQ), out.shape

    with jax.default_matmul_precision("highest"):
        ref = jax.block_until_ready(ref_forward(conti_input, params))
    max_err = float(jnp.max(jnp.abs(out - ref)))
    assert max_err < 2e-3, f"kernel/reference mismatch: max abs err = {max_err}"

    print("KERNEL_OK")
</pallas_src>

<mosaic_0001>
module attributes {stable_mosaic.version = 11 : i64} {
  func.func @kernel(%arg0: i32, %arg1: memref<16x4xf32, #tpu.memory_space<vmem>>, %arg2: memref<1208x128xf32, #tpu.memory_space<vmem>>, %arg3: memref<8x6xf32, #tpu.memory_space<vmem>>, %arg4: memref<24x32xf32, #tpu.memory_space<vmem>>) attributes {dimension_semantics = [#tpu.dimension_semantics<arbitrary>], iteration_bounds = array<i64: 1>, scalar_prefetch = 0 : i64, scratch_operands = 1 : i64, tpu.core_type = #tpu.core_type<tc>, window_params = [{pipeline_mode = #tpu.pipeline_mode<synchronous>, transform_indices = @transform_0, window_bounds = array<i64: 16, 4>}, {pipeline_mode = #tpu.pipeline_mode<synchronous>, transform_indices = @transform_1, window_bounds = array<i64: 1208, 128>}, {pipeline_mode = #tpu.pipeline_mode<synchronous>, transform_indices = @transform_2, window_bounds = array<i64: 8, 6>}]} {
    %c0 = arith.constant 0 : index
    %c0_0 = arith.constant 0 : index
    %0 = vector.load %arg1[%c0, %c0_0] : memref<16x4xf32, #tpu.memory_space<vmem>>, vector<16x4xf32>
    %c0_1 = arith.constant 0 : index
    %c0_2 = arith.constant 0 : index
    %1 = vector.load %arg2[%c0_1, %c0_2] : memref<1208x128xf32, #tpu.memory_space<vmem>>, vector<4x32xf32>
    %cst = arith.constant dense<0.000000e+00> : vector<16x32xf32>
    %2 = tpu.matmul %0, %1, %cst {dimension_numbers = #tpu.dot_dimension_numbers<[1], [0], [0], [1], [0, 0, 1, 1], [], []>} : vector<16x4xf32>, vector<4x32xf32>, vector<16x32xf32> -> vector<16x32xf32>
    %c1176 = arith.constant 1176 : index
    %c0_3 = arith.constant 0 : index
    %3 = vector.load %arg2[%c1176, %c0_3] : memref<1208x128xf32, #tpu.memory_space<vmem>>, vector<1x32xf32>
    %4 = vector.broadcast %3 : vector<1x32xf32> to vector<16x32xf32>
    %5 = arith.addf %2, %4 : vector<16x32xf32>
    %c8 = arith.constant 8 : index
    %c0_4 = arith.constant 0 : index
    %6 = vector.load %arg2[%c8, %c0_4] : memref<1208x128xf32, #tpu.memory_space<vmem>>, vector<32x4xf32>
    %cst_5 = arith.constant dense<0.000000e+00> : vector<16x4xf32>
    %7 = tpu.matmul %5, %6, %cst_5 {dimension_numbers = #tpu.dot_dimension_numbers<[1], [0], [0], [1], [0, 0, 1, 1], [], []>} : vector<16x32xf32>, vector<32x4xf32>, vector<16x4xf32> -> vector<16x4xf32>
    %c1177 = arith.constant 1177 : index
    %c0_6 = arith.constant 0 : index
    %8 = vector.load %arg2[%c1177, %c0_6] : memref<1208x128xf32, #tpu.memory_space<vmem>>, vector<1x4xf32>
    %9 = vector.broadcast %8 : vector<1x4xf32> to vector<16x4xf32>
    %10 = arith.addf %7, %9 : vector<16x4xf32>
    %c40 = arith.constant 40 : index
    %c0_7 = arith.constant 0 : index
    %11 = vector.load %arg2[%c40, %c0_7] : memref<1208x128xf32, #tpu.memory_space<vmem>>, vector<4x4xf32>
    %cst_8 = arith.constant dense<0.000000e+00> : vector<16x4xf32>
    %12 = tpu.matmul %10, %11, %cst_8 {dimension_numbers = #tpu.dot_dimension_numbers<[1], [0], [0], [1], [0, 0, 1, 1], [], []>} : vector<16x4xf32>, vector<4x4xf32>, vector<16x4xf32> -> vector<16x4xf32>
    %c1178 = arith.constant 1178 : index
    %c0_9 = arith.constant 0 : index
    %13 = vector.load %arg2[%c1178, %c0_9] : memref<1208x128xf32, #tpu.memory_space<vmem>>, vector<1x4xf32>
    %14 = vector.broadcast %13 : vector<1x4xf32> to vector<16x4xf32>
    %15 = arith.addf %12, %14 : vector<16x4xf32>
    %cst_10 = arith.constant 0.000000e+00 : f32
    %16 = vector.broadcast %cst_10 : f32 to vector<16x4xf32>
    %17 = arith.cmpf ogt, %15, %16 : vector<16x4xf32>
    %cst_11 = arith.constant 0.000000e+00 : f32
    %18 = vector.broadcast %cst_11 : f32 to vector<16x4xf32>
    %19 = arith.minimumf %15, %18 : vector<16x4xf32>
    %20 = math.exp %19 : vector<16x4xf32>
    %cst_12 = arith.constant 1.000000e+00 : f32
    %21 = vector.broadcast %cst_12 : f32 to vector<16x4xf32>
    %22 = arith.subf %20, %21 : vector<16x4xf32>
    %23 = arith.select %17, %15, %22 : vector<16x4xi1>, vector<16x4xf32>
    %c48 = arith.constant 48 : index
    %c0_13 = arith.constant 0 : index
    %24 = vector.load %arg2[%c48, %c0_13] : memref<1208x128xf32, #tpu.memory_space<vmem>>, vector<4x8xf32>
    %cst_14 = arith.constant dense<0.000000e+00> : vector<16x8xf32>
    %25 = tpu.matmul %23, %24, %cst_14 {dimension_numbers = #tpu.dot_dimension_numbers<[1], [0], [0], [1], [0, 0, 1, 1], [], []>} : vector<16x4xf32>, vector<4x8xf32>, vector<16x8xf32> -> vector<16x8xf32>
    %c1179 = arith.constant 1179 : index
    %c0_15 = arith.constant 0 : index
    %26 = vector.load %arg2[%c1179, %c0_15] : memref<1208x128xf32, #tpu.memory_space<vmem>>, vector<1x8xf32>
    %27 = vector.broadcast %26 : vector<1x8xf32> to vector<16x8xf32>
    %28 = arith.addf %25, %27 : vector<16x8xf32>
    %29 = vector.extract_strided_slice %28 {offsets = [0, 0], sizes = [16, 4], strides = [1, 1]} : vector<16x8xf32> to vector<16x4xf32>
    %30 = arith.negf %29 : vector<16x4xf32>
    %31 = math.exp %30 : vector<16x4xf32>
    %cst_16 = arith.constant 1.000000e+00 : f32
    %32 = vector.broadcast %cst_16 : f32 to vector<16x4xf32>
    %33 = arith.addf %32, %31 : vector<16x4xf32>
    %34 = arith.divf %32, %33 : vector<16x4xf32>
    %35 = vector.extract_strided_slice %28 {offsets = [0, 4], sizes = [16, 4], strides = [1, 1]} : vector<16x8xf32> to vector<16x4xf32>
    %36 = arith.mulf %34, %35 : vector<16x4xf32>
    %37 = arith.addf %36, %10 : vector<16x4xf32>
    %c1180 = arith.constant 1180 : index
    %c0_17 = arith.constant 0 : index
    %38 = vector.load %arg2[%c1180, %c0_17] : memref<1208x128xf32, #tpu.memory_space<vmem>>, vector<1x4xf32>
    %c1181 = arith.constant 1181 : index
    %c0_18 = arith.constant 0 : index
    %39 = vector.load %arg2[%c1181, %c0_18] : memref<1208x128xf32, #tpu.memory_space<vmem>>, vector<1x4xf32>
    %cst_19 = arith.constant dense<0.000000e+00> : vector<16xf32>
    %40 = vector.multi_reduction <add>, %37, %cst_19 [1] : vector<16x4xf32> to vector<16xf32>
    %41 = vector.shape_cast %40 : vector<16xf32> to vector<16x1xf32>
    %cst_20 = arith.constant 4.000000e+00 : f32
    %42 = vector.broadcast %cst_20 : f32 to vector<16x1xf32>
    %43 = arith.divf %41, %42 : vector<16x1xf32>
    %44 = vector.broadcast %43 : vector<16x1xf32> to vector<16x4xf32>
    %45 = arith.subf %37, %44 : vector<16x4xf32>
    %46 = arith.mulf %45, %45 : vector<16x4xf32>
    %cst_21 = arith.constant dense<0.000000e+00> : vector<16xf32>
    %47 = vector.multi_reduction <add>, %46, %cst_21 [1] : vector<16x4xf32> to vector<16xf32>
    %48 = vector.shape_cast %47 : vector<16xf32> to vector<16x1xf32>
    %cst_22 = arith.constant 4.000000e+00 : f32
    %49 = vector.broadcast %cst_22 : f32 to vector<16x1xf32>
    %50 = arith.divf %48, %49 : vector<16x1xf32>
    %51 = vector.broadcast %43 : vector<16x1xf32> to vector<16x4xf32>
    %52 = arith.subf %37, %51 : vector<16x4xf32>
    %cst_23 = arith.constant 9.99999974E-6 : f32
    %53 = vector.broadcast %cst_23 : f32 to vector<16x1xf32>
    %54 = arith.addf %50, %53 : vector<16x1xf32>
    %55 = math.rsqrt %54 : vector<16x1xf32>
    %56 = vector.broadcast %55 : vector<16x1xf32> to vector<16x4xf32>
    %57 = arith.mulf %52, %56 : vector<16x4xf32>
    %58 = vector.broadcast %38 : vector<1x4xf32> to vector<16x4xf32>
    %59 = arith.mulf %57, %58 : vector<16x4xf32>
    %60 = vector.broadcast %39 : vector<1x4xf32> to vector<16x4xf32>
    %61 = arith.addf %59, %60 : vector<16x4xf32>
    %cst_24 = arith.constant dense<0xFF800000> : vector<16xf32>
    %62 = vector.multi_reduction <maximumf>, %61, %cst_24 [1] : vector<16x4xf32> to vector<16xf32>
    %63 = vector.shape_cast %62 : vector<16xf32> to vector<16x1xf32>
    %64 = vector.broadcast %63 : vector<16x1xf32> to vector<16x4xf32>
    %65 = arith.subf %61, %64 : vector<16x4xf32>
    %66 = math.exp %65 : vector<16x4xf32>
    %cst_25 = arith.constant dense<0.000000e+00> : vector<16xf32>
    %67 = vector.multi_reduction <add>, %66, %cst_25 [1] : vector<16x4xf32> to vector<16xf32>
    %68 = vector.shape_cast %67 : vector<16xf32> to vector<16x1xf32>
    %69 = vector.broadcast %68 : vector<16x1xf32> to vector<16x4xf32>
    %70 = arith.divf %66, %69 : vector<16x4xf32>
    %c56 = arith.constant 56 : index
    %c0_26 = arith.constant 0 : index
    %71 = vector.load %arg2[%c56, %c0_26] : memref<1208x128xf32, #tpu.memory_space<vmem>>, vector<32x128xf32>
    %cst_27 = arith.constant dense<0.000000e+00> : vector<16x128xf32>
    %72 = tpu.matmul %5, %71, %cst_27 {dimension_numbers = #tpu.dot_dimension_numbers<[1], [0], [0], [1], [0, 0, 1, 1], [], []>} : vector<16x32xf32>, vector<32x128xf32>, vector<16x128xf32> -> vector<16x128xf32>
    %c1182 = arith.constant 1182 : index
    %c0_28 = arith.constant 0 : index
    %73 = vector.load %arg2[%c1182, %c0_28] : memref<1208x128xf32, #tpu.memory_space<vmem>>, vector<1x128xf32>
    %74 = vector.broadcast %73 : vector<1x128xf32> to vector<16x128xf32>
    %75 = arith.addf %72, %74 : vector<16x128xf32>
    %c88 = arith.constant 88 : index
    %c0_29 = arith.constant 0 : index
    %76 = vector.load %arg2[%c88, %c0_29] : memref<1208x128xf32, #tpu.memory_space<vmem>>, vector<128x128xf32>
    %cst_30 = arith.constant dense<0.000000e+00> : vector<16x128xf32>
    %77 = tpu.matmul %75, %76, %cst_30 {dimension_numbers = #tpu.dot_dimension_numbers<[1], [0], [0], [1], [0, 0, 1, 1], [], []>} : vector<16x128xf32>, vector<128x128xf32>, vector<16x128xf32> -> vector<16x128xf32>
    %c1183 = arith.constant 1183 : index
    %c0_31 = arith.constant 0 : index
    %78 = vector.load %arg2[%c1183, %c0_31] : memref<1208x128xf32, #tpu.memory_space<vmem>>, vector<1x128xf32>
    %79 = vector.broadcast %78 : vector<1x128xf32> to vector<16x128xf32>
    %80 = arith.addf %77, %79 : vector<16x128xf32>
    %cst_32 = arith.constant 0.000000e+00 : f32
    %81 = vector.broadcast %cst_32 : f32 to vector<16x128xf32>
    %82 = arith.cmpf ogt, %80, %81 : vector<16x128xf32>
    %cst_33 = arith.constant 0.000000e+00 : f32
    %83 = vector.broadcast %cst_33 : f32 to vector<16x128xf32>
    %84 = arith.minimumf %80, %83 : vector<16x128xf32>
    %85 = math.exp %84 : vector<16x128xf32>
    %cst_34 = arith.constant 1.000000e+00 : f32
    %86 = vector.broadcast %cst_34 : f32 to vector<16x128xf32>
    %87 = arith.subf %85, %86 : vector<16x128xf32>
    %88 = arith.select %82, %80, %87 : vector<16x128xi1>, vector<16x128xf32>
    %c216 = arith.constant 216 : index
    %c0_35 = arith.constant 0 : index
    %89 = vector.load %arg2[%c216, %c0_35] : memref<1208x128xf32, #tpu.memory_space<vmem>>, vector<128x128xf32>
    %cst_36 = arith.constant dense<0.000000e+00> : vector<16x128xf32>
    %90 = tpu.matmul %88, %89, %cst_36 {dimension_numbers = #tpu.dot_dimension_numbers<[1], [0], [0], [1], [0, 0, 1, 1], [], []>} : vector<16x128xf32>, vector<128x128xf32>, vector<16x128xf32> -> vector<16x128xf32>
    %c1184 = arith.constant 1184 : index
    %c0_37 = arith.constant 0 : index
    %91 = vector.load %arg2[%c1184, %c0_37] : memref<1208x128xf32, #tpu.memory_space<vmem>>, vector<1x128xf32>
    %92 = vector.broadcast %91 : vector<1x128xf32> to vector<16x128xf32>
    %93 = arith.addf %90, %92 : vector<16x128xf32>
    %94 = arith.negf %93 : vector<16x128xf32>
    %95 = math.exp %94 : vector<16x128xf32>
    %cst_38 = arith.constant 1.000000e+00 : f32
    %96 = vector.broadcast %cst_38 : f32 to vector<16x128xf32>
    %97 = arith.addf %96, %95 : vector<16x128xf32>
    %98 = arith.divf %96, %97 : vector<16x128xf32>
    %c344 = arith.constant 344 : index
    %c0_39 = arith.constant 0 : index
    %99 = vector.load %arg2[%c344, %c0_39] : memref<1208x128xf32, #tpu.memory_space<vmem>>, vector<128x128xf32>
    %cst_40 = arith.constant dense<0.000000e+00> : vector<16x128xf32>
    %100 = tpu.matmul %88, %99, %cst_40 {dimension_numbers = #tpu.dot_dimension_numbers<[1], [0], [0], [1], [0, 0, 1, 1], [], []>} : vector<16x128xf32>, vector<128x128xf32>, vector<16x128xf32> -> vector<16x128xf32>
    %c1185 = arith.constant 1185 : index
    %c0_41 = arith.constant 0 : index
    %101 = vector.load %arg2[%c1185, %c0_41] : memref<1208x128xf32, #tpu.memory_space<vmem>>, vector<1x128xf32>
    %102 = vector.broadcast %101 : vector<1x128xf32> to vector<16x128xf32>
    %103 = arith.addf %100, %102 : vector<16x128xf32>
    %104 = arith.mulf %98, %103 : vector<16x128xf32>
    %105 = arith.addf %104, %75 : vector<16x128xf32>
    %c472 = arith.constant 472 : index
    %c0_42 = arith.constant 0 : index
    %106 = vector.load %arg2[%c472, %c0_42] : memref<1208x128xf32, #tpu.memory_space<vmem>>, vector<128x128xf32>
    %cst_43 = arith.constant dense<0.000000e+00> : vector<16x128xf32>
    %107 = tpu.matmul %105, %106, %cst_43 {dimension_numbers = #tpu.dot_dimension_numbers<[1], [0], [0], [1], [0, 0, 1, 1], [], []>} : vector<16x128xf32>, vector<128x128xf32>, vector<16x128xf32> -> vector<16x128xf32>
    %108 = arith.subf %105, %107 : vector<16x128xf32>
    %109 = arith.mulf %108, %108 : vector<16x128xf32>
    %cst_44 = arith.constant dense<0.000000e+00> : vector<16x128xf32>
    %110 = tpu.matmul %109, %106, %cst_44 {dimension_numbers = #tpu.dot_dimension_numbers<[1], [0], [0], [1], [0, 0, 1, 1], [], []>} : vector<16x128xf32>, vector<128x128xf32>, vector<16x128xf32> -> vector<16x128xf32>
    %111 = arith.subf %105, %107 : vector<16x128xf32>
    %cst_45 = arith.constant 9.99999974E-6 : f32
    %112 = vector.broadcast %cst_45 : f32 to vector<16x128xf32>
    %113 = arith.addf %110, %112 : vector<16x128xf32>
    %114 = math.rsqrt %113 : vector<16x128xf32>
    %115 = arith.mulf %111, %114 : vector<16x128xf32>
    %c1186 = arith.constant 1186 : index
    %c0_46 = arith.constant 0 : index
    %116 = vector.load %arg2[%c1186, %c0_46] : memref<1208x128xf32, #tpu.memory_space<vmem>>, vector<1x128xf32>
    %117 = vector.broadcast %116 : vector<1x128xf32> to vector<16x128xf32>
    %118 = arith.mulf %115, %117 : vector<16x128xf32>
    %c1187 = arith.constant 1187 : index
    %c0_47 = arith.constant 0 : index
    %119 = vector.load %arg2[%c1187, %c0_47] : memref<1208x128xf32, #tpu.memory_space<vmem>>, vector<1x128xf32>
    %120 = vector.broadcast %119 : vector<1x128xf32> to vector<16x128xf32>
    %121 = arith.addf %118, %120 : vector<16x128xf32>
    %c600 = arith.constant 600 : index
    %c0_48 = arith.constant 0 : index
    %122 = vector.load %arg2[%c600, %c0_48] : memref<1208x128xf32, #tpu.memory_space<vmem>>, vector<4x128xf32>
    %cst_49 = arith.constant dense<0.000000e+00> : vector<16x128xf32>
    %123 = tpu.matmul %70, %122, %cst_49 {dimension_numbers = #tpu.dot_dimension_numbers<[1], [0], [0], [1], [0, 0, 1, 1], [], []>} : vector<16x4xf32>, vector<4x128xf32>, vector<16x128xf32> -> vector<16x128xf32>
    %124 = arith.mulf %123, %121 : vector<16x128xf32>
    %c608 = arith.constant 608 : index
    %c0_50 = arith.constant 0 : index
    %125 = vector.load %arg2[%c608, %c0_50] : memref<1208x128xf32, #tpu.memory_space<vmem>>, vector<128x32xf32>
    %cst_51 = arith.constant dense<0.000000e+00> : vector<16x32xf32>
    %126 = tpu.matmul %124, %125, %cst_51 {dimension_numbers = #tpu.dot_dimension_numbers<[1], [0], [0], [1], [0, 0, 1, 1], [], []>} : vector<16x128xf32>, vector<128x32xf32>, vector<16x32xf32> -> vector<16x32xf32>
    %c0_52 = arith.constant 0 : index
    %c0_53 = arith.constant 0 : index
    %127 = vector.load %arg4[%c0_52, %c0_53] : memref<24x32xf32, #tpu.memory_space<vmem>>, vector<16x32xf32>
    tpu.vector_store %arg4[%c0_52, %c0_53], %126 {strides = array<i32>} : memref<24x32xf32, #tpu.memory_space<vmem>>, vector<16x32xf32>,
    %c736 = arith.constant 736 : index
    %c0_54 = arith.constant 0 : index
    %128 = vector.load %arg2[%c736, %c0_54] : memref<1208x128xf32, #tpu.memory_space<vmem>>, vector<32x128xf32>
    %cst_55 = arith.constant dense<0.000000e+00> : vector<16x128xf32>
    %129 = tpu.matmul %126, %128, %cst_55 {dimension_numbers = #tpu.dot_dimension_numbers<[1], [0], [0], [1], [0, 0, 1, 1], [], []>} : vector<16x32xf32>, vector<32x128xf32>, vector<16x128xf32> -> vector<16x128xf32>
    %c1188 = arith.constant 1188 : index
    %c0_56 = arith.constant 0 : index
    %130 = vector.load %arg2[%c1188, %c0_56] : memref<1208x128xf32, #tpu.memory_space<vmem>>, vector<1x128xf32>
    %131 = vector.broadcast %130 : vector<1x128xf32> to vector<16x128xf32>
    %132 = arith.addf %129, %131 : vector<16x128xf32>
    %c768 = arith.constant 768 : index
    %c0_57 = arith.constant 0 : index
    %133 = vector.load %arg2[%c768, %c0_57] : memref<1208x128xf32, #tpu.memory_space<vmem>>, vector<32x128xf32>
    %cst_58 = arith.constant 0.000000e+00 : f32
    %134 = vector.broadcast %cst_58 : f32 to vector<2x32xf32>
    %cst_59 = arith.constant 0.000000e+00 : f32
    %135 = vector.broadcast %cst_59 : f32 to vector<2x32xf32>
    %136 = vector.extract_strided_slice %132 {offsets = [0, 0], sizes = [1, 128], strides = [1, 1]} : vector<16x128xf32> to vector<1x128xf32>
    %137 = vector.extract_strided_slice %132 {offsets = [8, 0], sizes = [1, 128], strides = [1, 1]} : vector<16x128xf32> to vector<1x128xf32>
    %138 = tpu.concatenate %136, %137 in 0 : vector<1x128xf32>, vector<1x128xf32> -> vector<2x128xf32>
    %cst_60 = arith.constant dense<0.000000e+00> : vector<2x128xf32>
    %139 = tpu.matmul %134, %133, %cst_60 {dimension_numbers = #tpu.dot_dimension_numbers<[1], [0], [0], [1], [0, 0, 1, 1], [], []>} : vector<2x32xf32>, vector<32x128xf32>, vector<2x128xf32> -> vector<2x128xf32>
    %140 = arith.addf %138, %139 : vector<2x128xf32>
    %141 = vector.extract_strided_slice %140 {offsets = [0, 0], sizes = [2, 32], strides = [1, 1]} : vector<2x128xf32> to vector<2x32xf32>
    %142 = arith.negf %141 : vector<2x32xf32>
    %143 = math.exp %142 : vector<2x32xf32>
    %cst_61 = arith.constant 1.000000e+00 : f32
    %144 = vector.broadcast %cst_61 : f32 to vector<2x32xf32>
    %145 = arith.addf %144, %143 : vector<2x32xf32>
    %146 = arith.divf %144, %145 : vector<2x32xf32>
    %147 = vector.extract_strided_slice %140 {offsets = [0, 32], sizes = [2, 32], strides = [1, 1]} : vector<2x128xf32> to vector<2x32xf32>
    %148 = arith.negf %147 : vector<2x32xf32>
    %149 = math.exp %148 : vector<2x32xf32>
    %cst_62 = arith.constant 1.000000e+00 : f32
    %150 = vector.broadcast %cst_62 : f32 to vector<2x32xf32>
    %151 = arith.addf %150, %149 : vector<2x32xf32>
    %152 = arith.divf %150, %151 : vector<2x32xf32>
    %153 = vector.extract_strided_slice %140 {offsets = [0, 64], sizes = [2, 32], strides = [1, 1]} : vector<2x128xf32> to vector<2x32xf32>
    %154 = math.tanh %153 : vector<2x32xf32>
    %155 = vector.extract_strided_slice %140 {offsets = [0, 96], sizes = [2, 32], strides = [1, 1]} : vector<2x128xf32> to vector<2x32xf32>
    %156 = arith.negf %155 : vector<2x32xf32>
    %157 = math.exp %156 : vector<2x32xf32>
    %cst_63 = arith.constant 1.000000e+00 : f32
    %158 = vector.broadcast %cst_63 : f32 to vector<2x32xf32>
    %159 = arith.addf %158, %157 : vector<2x32xf32>
    %160 = arith.divf %158, %159 : vector<2x32xf32>
    %161 = arith.mulf %152, %135 : vector<2x32xf32>
    %162 = arith.mulf %146, %154 : vector<2x32xf32>
    %163 = arith.addf %161, %162 : vector<2x32xf32>
    %164 = math.tanh %163 : vector<2x32xf32>
    %165 = arith.mulf %160, %164 : vector<2x32xf32>
    %166 = vector.extract_strided_slice %165 {offsets = [0, 0], sizes = [1, 32], strides = [1, 1]} : vector<2x32xf32> to vector<1x32xf32>
    %c16 = arith.constant 16 : index
    %c0_64 = arith.constant 0 : index
    %167 = vector.load %arg4[%c16, %c0_64] : memref<24x32xf32, #tpu.memory_space<vmem>>, vector<1x32xf32>
    tpu.vector_store %arg4[%c16, %c0_64], %166 {strides = array<i32>} : memref<24x32xf32, #tpu.memory_space<vmem>>, vector<1x32xf32>,
    %168 = vector.extract_strided_slice %165 {offsets = [1, 0], sizes = [1, 32], strides = [1, 1]} : vector<2x32xf32> to vector<1x32xf32>
    %c20 = arith.constant 20 : index
    %c0_65 = arith.constant 0 : index
    %169 = vector.load %arg4[%c20, %c0_65] : memref<24x32xf32, #tpu.memory_space<vmem>>, vector<1x32xf32>
    tpu.vector_store %arg4[%c20, %c0_65], %168 {strides = array<i32>} : memref<24x32xf32, #tpu.memory_space<vmem>>, vector<1x32xf32>,
    %170 = vector.extract_strided_slice %132 {offsets = [1, 0], sizes = [1, 128], strides = [1, 1]} : vector<16x128xf32> to vector<1x128xf32>
    %171 = vector.extract_strided_slice %132 {offsets = [9, 0], sizes = [1, 128], strides = [1, 1]} : vector<16x128xf32> to vector<1x128xf32>
    %172 = tpu.concatenate %170, %171 in 0 : vector<1x128xf32>, vector<1x128xf32> -> vector<2x128xf32>
    %cst_66 = arith.constant dense<0.000000e+00> : vector<2x128xf32>
    %173 = tpu.matmul %165, %133, %cst_66 {dimension_numbers = #tpu.dot_dimension_numbers<[1], [0], [0], [1], [0, 0, 1, 1], [], []>} : vector<2x32xf32>, vector<32x128xf32>, vector<2x128xf32> -> vector<2x128xf32>
    %174 = arith.addf %172, %173 : vector<2x128xf32>
    %175 = vector.extract_strided_slice %174 {offsets = [0, 0], sizes = [2, 32], strides = [1, 1]} : vector<2x128xf32> to vector<2x32xf32>
    %176 = arith.negf %175 : vector<2x32xf32>
    %177 = math.exp %176 : vector<2x32xf32>
    %cst_67 = arith.constant 1.000000e+00 : f32
    %178 = vector.broadcast %cst_67 : f32 to vector<2x32xf32>
    %179 = arith.addf %178, %177 : vector<2x32xf32>
    %180 = arith.divf %178, %179 : vector<2x32xf32>
    %181 = vector.extract_strided_slice %174 {offsets = [0, 32], sizes = [2, 32], strides = [1, 1]} : vector<2x128xf32> to vector<2x32xf32>
    %182 = arith.negf %181 : vector<2x32xf32>
    %183 = math.exp %182 : vector<2x32xf32>
    %cst_68 = arith.constant 1.000000e+00 : f32
    %184 = vector.broadcast %cst_68 : f32 to vector<2x32xf32>
    %185 = arith.addf %184, %183 : vector<2x32xf32>
    %186 = arith.divf %184, %185 : vector<2x32xf32>
    %187 = vector.extract_strided_slice %174 {offsets = [0, 64], sizes = [2, 32], strides = [1, 1]} : vector<2x128xf32> to vector<2x32xf32>
    %188 = math.tanh %187 : vector<2x32xf32>
    %189 = vector.extract_strided_slice %174 {offsets = [0, 96], sizes = [2, 32], strides = [1, 1]} : vector<2x128xf32> to vector<2x32xf32>
    %190 = arith.negf %189 : vector<2x32xf32>
    %191 = math.exp %190 : vector<2x32xf32>
    %cst_69 = arith.constant 1.000000e+00 : f32
    %192 = vector.broadcast %cst_69 : f32 to vector<2x32xf32>
    %193 = arith.addf %192, %191 : vector<2x32xf32>
    %194 = arith.divf %192, %193 : vector<2x32xf32>
    %195 = arith.mulf %186, %163 : vector<2x32xf32>
    %196 = arith.mulf %180, %188 : vector<2x32xf32>
    %197 = arith.addf %195, %196 : vector<2x32xf32>
    %198 = math.tanh %197 : vector<2x32xf32>
    %199 = arith.mulf %194, %198 : vector<2x32xf32>
    %200 = vector.extract_strided_slice %199 {offsets = [0, 0], sizes = [1, 32], strides = [1, 1]} : vector<2x32xf32> to vector<1x32xf32>
    %c17 = arith.constant 17 : index
    %c0_70 = arith.constant 0 : index
    %201 = vector.load %arg4[%c17, %c0_70] : memref<24x32xf32, #tpu.memory_space<vmem>>, vector<1x32xf32>
    tpu.vector_store %arg4[%c17, %c0_70], %200 {strides = array<i32>} : memref<24x32xf32, #tpu.memory_space<vmem>>, vector<1x32xf32>,
    %202 = vector.extract_strided_slice %199 {offsets = [1, 0], sizes = [1, 32], strides = [1, 1]} : vector<2x32xf32> to vector<1x32xf32>
    %c21 = arith.constant 21 : index
    %c0_71 = arith.constant 0 : index
    %203 = vector.load %arg4[%c21, %c0_71] : memref<24x32xf32, #tpu.memory_space<vmem>>, vector<1x32xf32>
    tpu.vector_store %arg4[%c21, %c0_71], %202 {strides = array<i32>} : memref<24x32xf32, #tpu.memory_space<vmem>>, vector<1x32xf32>,
    %204 = vector.extract_strided_slice %132 {offsets = [2, 0], sizes = [1, 128], strides = [1, 1]} : vector<16x128xf32> to vector<1x128xf32>
    %205 = vector.extract_strided_slice %132 {offsets = [10, 0], sizes = [1, 128], strides = [1, 1]} : vector<16x128xf32> to vector<1x128xf32>
    %206 = tpu.concatenate %204, %205 in 0 : vector<1x128xf32>, vector<1x128xf32> -> vector<2x128xf32>
    %cst_72 = arith.constant dense<0.000000e+00> : vector<2x128xf32>
    %207 = tpu.matmul %199, %133, %cst_72 {dimension_numbers = #tpu.dot_dimension_numbers<[1], [0], [0], [1], [0, 0, 1, 1], [], []>} : vector<2x32xf32>, vector<32x128xf32>, vector<2x128xf32> -> vector<2x128xf32>
    %208 = arith.addf %206, %207 : vector<2x128xf32>
    %209 = vector.extract_strided_slice %208 {offsets = [0, 0], sizes = [2, 32], strides = [1, 1]} : vector<2x128xf32> to vector<2x32xf32>
    %210 = arith.negf %209 : vector<2x32xf32>
    %211 = math.exp %210 : vector<2x32xf32>
    %cst_73 = arith.constant 1.000000e+00 : f32
    %212 = vector.broadcast %cst_73 : f32 to vector<2x32xf32>
    %213 = arith.addf %212, %211 : vector<2x32xf32>
    %214 = arith.divf %212, %213 : vector<2x32xf32>
    %215 = vector.extract_strided_slice %208 {offsets = [0, 32], sizes = [2, 32], strides = [1, 1]} : vector<2x128xf32> to vector<2x32xf32>
    %216 = arith.negf %215 : vector<2x32xf32>
    %217 = math.exp %216 : vector<2x32xf32>
    %cst_74 = arith.constant 1.000000e+00 : f32
    %218 = vector.broadcast %cst_74 : f32 to vector<2x32xf32>
    %219 = arith.addf %218, %217 : vector<2x32xf32>
    %220 = arith.divf %218, %219 : vector<2x32xf32>
    %221 = vector.extract_strided_slice %208 {offsets = [0, 64], sizes = [2, 32], strides = [1, 1]} : vector<2x128xf32> to vector<2x32xf32>
    %222 = math.tanh %221 : vector<2x32xf32>
    %223 = vector.extract_strided_slice %208 {offsets = [0, 96], sizes = [2, 32], strides = [1, 1]} : vector<2x128xf32> to vector<2x32xf32>
    %224 = arith.negf %223 : vector<2x32xf32>
    %225 = math.exp %224 : vector<2x32xf32>
    %cst_75 = arith.constant 1.000000e+00 : f32
    %226 = vector.broadcast %cst_75 : f32 to vector<2x32xf32>
    %227 = arith.addf %226, %225 : vector<2x32xf32>
    %228 = arith.divf %226, %227 : vector<2x32xf32>
    %229 = arith.mulf %220, %197 : vector<2x32xf32>
    %230 = arith.mulf %214, %222 : vector<2x32xf32>
    %231 = arith.addf %229, %230 : vector<2x32xf32>
    %232 = math.tanh %231 : vector<2x32xf32>
    %233 = arith.mulf %228, %232 : vector<2x32xf32>
    %234 = vector.extract_strided_slice %233 {offsets = [0, 0], sizes = [1, 32], strides = [1, 1]} : vector<2x32xf32> to vector<1x32xf32>
    %c18 = arith.constant 18 : index
    %c0_76 = arith.constant 0 : index
    %235 = vector.load %arg4[%c18, %c0_76] : memref<24x32xf32, #tpu.memory_space<vmem>>, vector<1x32xf32>
    tpu.vector_store %arg4[%c18, %c0_76], %234 {strides = array<i32>} : memref<24x32xf32, #tpu.memory_space<vmem>>, vector<1x32xf32>,
    %236 = vector.extract_strided_slice %233 {offsets = [1, 0], sizes = [1, 32], strides = [1, 1]} : vector<2x32xf32> to vector<1x32xf32>
    %c22 = arith.constant 22 : index
    %c0_77 = arith.constant 0 : index
    %237 = vector.load %arg4[%c22, %c0_77] : memref<24x32xf32, #tpu.memory_space<vmem>>, vector<1x32xf32>
    tpu.vector_store %arg4[%c22, %c0_77], %236 {strides = array<i32>} : memref<24x32xf32, #tpu.memory_space<vmem>>, vector<1x32xf32>,
    %238 = vector.extract_strided_slice %132 {offsets = [3, 0], sizes = [1, 128], strides = [1, 1]} : vector<16x128xf32> to vector<1x128xf32>
    %239 = vector.extract_strided_slice %132 {offsets = [11, 0], sizes = [1, 128], strides = [1, 1]} : vector<16x128xf32> to vector<1x128xf32>
    %240 = tpu.concatenate %238, %239 in 0 : vector<1x128xf32>, vector<1x128xf32> -> vector<2x128xf32>
    %cst_78 = arith.constant dense<0.000000e+00> : vector<2x128xf32>
    %241 = tpu.matmul %233, %133, %cst_78 {dimension_numbers = #tpu.dot_dimension_numbers<[1], [0], [0], [1], [0, 0, 1, 1], [], []>} : vector<2x32xf32>, vector<32x128xf32>, vector<2x128xf32> -> vector<2x128xf32>
    %242 = arith.addf %240, %241 : vector<2x128xf32>
    %243 = vector.extract_strided_slice %242 {offsets = [0, 0], sizes = [2, 32], strides = [1, 1]} : vector<2x128xf32> to vector<2x32xf32>
    %244 = arith.negf %243 : vector<2x32xf32>
    %245 = math.exp %244 : vector<2x32xf32>
    %cst_79 = arith.constant 1.000000e+00 : f32
    %246 = vector.broadcast %cst_79 : f32 to vector<2x32xf32>
    %247 = arith.addf %246, %245 : vector<2x32xf32>
    %248 = arith.divf %246, %247 : vector<2x32xf32>
    %249 = vector.extract_strided_slice %242 {offsets = [0, 32], sizes = [2, 32], strides = [1, 1]} : vector<2x128xf32> to vector<2x32xf32>
    %250 = arith.negf %249 : vector<2x32xf32>
    %251 = math.exp %250 : vector<2x32xf32>
    %cst_80 = arith.constant 1.000000e+00 : f32
    %252 = vector.broadcast %cst_80 : f32 to vector<2x32xf32>
    %253 = arith.addf %252, %251 : vector<2x32xf32>
    %254 = arith.divf %252, %253 : vector<2x32xf32>
    %255 = vector.extract_strided_slice %242 {offsets = [0, 64], sizes = [2, 32], strides = [1, 1]} : vector<2x128xf32> to vector<2x32xf32>
    %256 = math.tanh %255 : vector<2x32xf32>
    %257 = vector.extract_strided_slice %242 {offsets = [0, 96], sizes = [2, 32], strides = [1, 1]} : vector<2x128xf32> to vector<2x32xf32>
    %258 = arith.negf %257 : vector<2x32xf32>
    %259 = math.exp %258 : vector<2x32xf32>
    %cst_81 = arith.constant 1.000000e+00 : f32
    %260 = vector.broadcast %cst_81 : f32 to vector<2x32xf32>
    %261 = arith.addf %260, %259 : vector<2x32xf32>
    %262 = arith.divf %260, %261 : vector<2x32xf32>
    %263 = arith.mulf %254, %231 : vector<2x32xf32>
    %264 = arith.mulf %248, %256 : vector<2x32xf32>
    %265 = arith.addf %263, %264 : vector<2x32xf32>
    %266 = math.tanh %265 : vector<2x32xf32>
    %267 = arith.mulf %262, %266 : vector<2x32xf32>
    %268 = vector.extract_strided_slice %267 {offsets = [0, 0], sizes = [1, 32], strides = [1, 1]} : vector<2x32xf32> to vector<1x32xf32>
    %c19 = arith.constant 19 : index
    %c0_82 = arith.constant 0 : index
    %269 = vector.load %arg4[%c19, %c0_82] : memref<24x32xf32, #tpu.memory_space<vmem>>, vector<1x32xf32>
    tpu.vector_store %arg4[%c19, %c0_82], %268 {strides = array<i32>} : memref<24x32xf32, #tpu.memory_space<vmem>>, vector<1x32xf32>,
    %270 = vector.extract_strided_slice %267 {offsets = [1, 0], sizes = [1, 32], strides = [1, 1]} : vector<2x32xf32> to vector<1x32xf32>
    %c23 = arith.constant 23 : index
    %c0_83 = arith.constant 0 : index
    %271 = vector.load %arg4[%c23, %c0_83] : memref<24x32xf32, #tpu.memory_space<vmem>>, vector<1x32xf32>
    tpu.vector_store %arg4[%c23, %c0_83], %270 {strides = array<i32>} : memref<24x32xf32, #tpu.memory_space<vmem>>, vector<1x32xf32>,
    %c0_84 = arith.constant 0 : index
    %c0_85 = arith.constant 0 : index
    %272 = vector.load %arg4[%c0_84, %c0_85] : memref<24x32xf32, #tpu.memory_space<vmem>>, vector<24x32xf32>
    %c800 = arith.constant 800 : index
    %c0_86 = arith.constant 0 : index
    %273 = vector.load %arg2[%c800, %c0_86] : memref<1208x128xf32, #tpu.memory_space<vmem>>, vector<32x64xf32>
    %cst_87 = arith.constant dense<0.000000e+00> : vector<24x64xf32>
    %274 = tpu.matmul %272, %273, %cst_87 {dimension_numbers = #tpu.dot_dimension_numbers<[1], [0], [0], [1], [0, 0, 1, 1], [], []>} : vector<24x32xf32>, vector<32x64xf32>, vector<24x64xf32> -> vector<24x64xf32>
    %c1189 = arith.constant 1189 : index
    %c0_88 = arith.constant 0 : index
    %275 = vector.load %arg2[%c1189, %c0_88] : memref<1208x128xf32, #tpu.memory_space<vmem>>, vector<1x64xf32>
    %276 = vector.broadcast %275 : vector<1x64xf32> to vector<24x64xf32>
    %277 = arith.addf %274, %276 : vector<24x64xf32>
    %278 = vector.extract_strided_slice %277 {offsets = [0, 0], sizes = [24, 32], strides = [1, 1]} : vector<24x64xf32> to vector<24x32xf32>
    %279 = arith.negf %278 : vector<24x32xf32>
    %280 = math.exp %279 : vector<24x32xf32>
    %cst_89 = arith.constant 1.000000e+00 : f32
    %281 = vector.broadcast %cst_89 : f32 to vector<24x32xf32>
    %282 = arith.addf %281, %280 : vector<24x32xf32>
    %283 = arith.divf %281, %282 : vector<24x32xf32>
    %284 = vector.extract_strided_slice %277 {offsets = [0, 32], sizes = [24, 32], strides = [1, 1]} : vector<24x64xf32> to vector<24x32xf32>
    %285 = arith.mulf %283, %284 : vector<24x32xf32>
    %286 = arith.addf %285, %272 : vector<24x32xf32>
    %c1190 = arith.constant 1190 : index
    %c0_90 = arith.constant 0 : index
    %287 = vector.load %arg2[%c1190, %c0_90] : memref<1208x128xf32, #tpu.memory_space<vmem>>, vector<1x32xf32>
    %c1191 = arith.constant 1191 : index
    %c0_91 = arith.constant 0 : index
    %288 = vector.load %arg2[%c1191, %c0_91] : memref<1208x128xf32, #tpu.memory_space<vmem>>, vector<1x32xf32>
    %cst_92 = arith.constant dense<0.000000e+00> : vector<24xf32>
    %289 = vector.multi_reduction <add>, %286, %cst_92 [1] : vector<24x32xf32> to vector<24xf32>
    %290 = vector.shape_cast %289 : vector<24xf32> to vector<24x1xf32>
    %cst_93 = arith.constant 3.200000e+01 : f32
    %291 = vector.broadcast %cst_93 : f32 to vector<24x1xf32>
    %292 = arith.divf %290, %291 : vector<24x1xf32>
    %293 = vector.broadcast %292 : vector<24x1xf32> to vector<24x32xf32>
    %294 = arith.subf %286, %293 : vector<24x32xf32>
    %295 = arith.mulf %294, %294 : vector<24x32xf32>
    %cst_94 = arith.constant dense<0.000000e+00> : vector<24xf32>
    %296 = vector.multi_reduction <add>, %295, %cst_94 [1] : vector<24x32xf32> to vector<24xf32>
    %297 = vector.shape_cast %296 : vector<24xf32> to vector<24x1xf32>
    %cst_95 = arith.constant 3.200000e+01 : f32
    %298 = vector.broadcast %cst_95 : f32 to vector<24x1xf32>
    %299 = arith.divf %297, %298 : vector<24x1xf32>
    %300 = vector.broadcast %292 : vector<24x1xf32> to vector<24x32xf32>
    %301 = arith.subf %286, %300 : vector<24x32xf32>
    %cst_96 = arith.constant 9.99999974E-6 : f32
    %302 = vector.broadcast %cst_96 : f32 to vector<24x1xf32>
    %303 = arith.addf %299, %302 : vector<24x1xf32>
    %304 = math.rsqrt %303 : vector<24x1xf32>
    %305 = vector.broadcast %304 : vector<24x1xf32> to vector<24x32xf32>
    %306 = arith.mulf %301, %305 : vector<24x32xf32>
    %307 = vector.broadcast %287 : vector<1x32xf32> to vector<24x32xf32>
    %308 = arith.mulf %306, %307 : vector<24x32xf32>
    %309 = vector.broadcast %288 : vector<1x32xf32> to vector<24x32xf32>
    %310 = arith.addf %308, %309 : vector<24x32xf32>
    %c832 = arith.constant 832 : index
    %c0_97 = arith.constant 0 : index
    %311 = vector.load %arg2[%c832, %c0_97] : memref<1208x128xf32, #tpu.memory_space<vmem>>, vector<32x96xf32>
    %cst_98 = arith.constant dense<0.000000e+00> : vector<24x96xf32>
    %312 = tpu.matmul %310, %311, %cst_98 {dimension_numbers = #tpu.dot_dimension_numbers<[1], [0], [0], [1], [0, 0, 1, 1], [], []>} : vector<24x32xf32>, vector<32x96xf32>, vector<24x96xf32> -> vector<24x96xf32>
    %c1192 = arith.constant 1192 : index
    %c0_99 = arith.constant 0 : index
    %313 = vector.load %arg2[%c1192, %c0_99] : memref<1208x128xf32, #tpu.memory_space<vmem>>, vector<1x96xf32>
    %314 = vector.broadcast %313 : vector<1x96xf32> to vector<24x96xf32>
    %315 = arith.addf %312, %314 : vector<24x96xf32>
    %316 = vector.extract_strided_slice %315 {offsets = [0, 0], sizes = [24, 32], strides = [1, 1]} : vector<24x96xf32> to vector<24x32xf32>
    %317 = vector.extract_strided_slice %315 {offsets = [0, 32], sizes = [24, 32], strides = [1, 1]} : vector<24x96xf32> to vector<24x32xf32>
    %318 = vector.extract_strided_slice %315 {offsets = [0, 64], sizes = [24, 32], strides = [1, 1]} : vector<24x96xf32> to vector<24x32xf32>
    %cst_100 = arith.constant dense<0.000000e+00> : vector<24x24xf32>
    %319 = tpu.matmul %316, %317, %cst_100 {dimension_numbers = #tpu.dot_dimension_numbers<[1], [1], [0], [0], [0, 0, 1, 0], [], []>} : vector<24x32xf32>, vector<24x32xf32>, vector<24x24xf32> -> vector<24x24xf32>
    %cst_101 = arith.constant 0.176776692 : f32
    %320 = vector.broadcast %cst_101 : f32 to vector<24x24xf32>
    %321 = arith.mulf %319, %320 : vector<24x24xf32>
    %c928 = arith.constant 928 : index
    %c0_102 = arith.constant 0 : index
    %322 = vector.load %arg2[%c928, %c0_102] : memref<1208x128xf32, #tpu.memory_space<vmem>>, vector<24x24xf32>
    %323 = arith.addf %321, %322 : vector<24x24xf32>
    %cst_103 = arith.constant dense<0xFF800000> : vector<24xf32>
    %324 = vector.multi_reduction <maximumf>, %323, %cst_103 [1] : vector<24x24xf32> to vector<24xf32>
    %325 = vector.shape_cast %324 : vector<24xf32> to vector<24x1xf32>
    %326 = vector.broadcast %325 : vector<24x1xf32> to vector<24x24xf32>
    %327 = arith.subf %323, %326 : vector<24x24xf32>
    %328 = math.exp %327 : vector<24x24xf32>
    %cst_104 = arith.constant dense<0.000000e+00> : vector<24xf32>
    %329 = vector.multi_reduction <add>, %328, %cst_104 [1] : vector<24x24xf32> to vector<24xf32>
    %330 = vector.shape_cast %329 : vector<24xf32> to vector<24x1xf32>
    %331 = vector.broadcast %330 : vector<24x1xf32> to vector<24x24xf32>
    %332 = arith.divf %328, %331 : vector<24x24xf32>
    %cst_105 = arith.constant dense<0.000000e+00> : vector<24x32xf32>
    %333 = tpu.matmul %332, %318, %cst_105 {dimension_numbers = #tpu.dot_dimension_numbers<[1], [0], [0], [1], [0, 0, 1, 1], [], []>} : vector<24x24xf32>, vector<24x32xf32>, vector<24x32xf32> -> vector<24x32xf32>
    %c864 = arith.constant 864 : index
    %c0_106 = arith.constant 0 : index
    %334 = vector.load %arg2[%c864, %c0_106] : memref<1208x128xf32, #tpu.memory_space<vmem>>, vector<32x32xf32>
    %cst_107 = arith.constant dense<0.000000e+00> : vector<24x32xf32>
    %335 = tpu.matmul %333, %334, %cst_107 {dimension_numbers = #tpu.dot_dimension_numbers<[1], [0], [0], [1], [0, 0, 1, 1], [], []>} : vector<24x32xf32>, vector<32x32xf32>, vector<24x32xf32> -> vector<24x32xf32>
    %c1193 = arith.constant 1193 : index
    %c0_108 = arith.constant 0 : index
    %336 = vector.load %arg2[%c1193, %c0_108] : memref<1208x128xf32, #tpu.memory_space<vmem>>, vector<1x32xf32>
    %337 = vector.broadcast %336 : vector<1x32xf32> to vector<24x32xf32>
    %338 = arith.addf %335, %337 : vector<24x32xf32>
    %c896 = arith.constant 896 : index
    %c0_109 = arith.constant 0 : index
    %339 = vector.load %arg2[%c896, %c0_109] : memref<1208x128xf32, #tpu.memory_space<vmem>>, vector<32x64xf32>
    %cst_110 = arith.constant dense<0.000000e+00> : vector<24x64xf32>
    %340 = tpu.matmul %338, %339, %cst_110 {dimension_numbers = #tpu.dot_dimension_numbers<[1], [0], [0], [1], [0, 0, 1, 1], [], []>} : vector<24x32xf32>, vector<32x64xf32>, vector<24x64xf32> -> vector<24x64xf32>
    %c1194 = arith.constant 1194 : index
    %c0_111 = arith.constant 0 : index
    %341 = vector.load %arg2[%c1194, %c0_111] : memref<1208x128xf32, #tpu.memory_space<vmem>>, vector<1x64xf32>
    %342 = vector.broadcast %341 : vector<1x64xf32> to vector<24x64xf32>
    %343 = arith.addf %340, %342 : vector<24x64xf32>
    %344 = vector.extract_strided_slice %343 {offsets = [0, 0], sizes = [24, 32], strides = [1, 1]} : vector<24x64xf32> to vector<24x32xf32>
    %345 = arith.negf %344 : vector<24x32xf32>
    %346 = math.exp %345 : vector<24x32xf32>
    %cst_112 = arith.constant 1.000000e+00 : f32
    %347 = vector.broadcast %cst_112 : f32 to vector<24x32xf32>
    %348 = arith.addf %347, %346 : vector<24x32xf32>
    %349 = arith.divf %347, %348 : vector<24x32xf32>
    %350 = vector.extract_strided_slice %343 {offsets = [0, 32], sizes = [24, 32], strides = [1, 1]} : vector<24x64xf32> to vector<24x32xf32>
    %351 = arith.mulf %349, %350 : vector<24x32xf32>
    %352 = arith.addf %351, %310 : vector<24x32xf32>
    %c1195 = arith.constant 1195 : index
    %c0_113 = arith.constant 0 : index
    %353 = vector.load %arg2[%c1195, %c0_113] : memref<1208x128xf32, #tpu.memory_space<vmem>>, vector<1x32xf32>
    %c1196 = arith.constant 1196 : index
    %c0_114 = arith.constant 0 : index
    %354 = vector.load %arg2[%c1196, %c0_114] : memref<1208x128xf32, #tpu.memory_space<vmem>>, vector<1x32xf32>
    %cst_115 = arith.constant dense<0.000000e+00> : vector<24xf32>
    %355 = vector.multi_reduction <add>, %352, %cst_115 [1] : vector<24x32xf32> to vector<24xf32>
    %356 = vector.shape_cast %355 : vector<24xf32> to vector<24x1xf32>
    %cst_116 = arith.constant 3.200000e+01 : f32
    %357 = vector.broadcast %cst_116 : f32 to vector<24x1xf32>
    %358 = arith.divf %356, %357 : vector<24x1xf32>
    %359 = vector.broadcast %358 : vector<24x1xf32> to vector<24x32xf32>
    %360 = arith.subf %352, %359 : vector<24x32xf32>
    %361 = arith.mulf %360, %360 : vector<24x32xf32>
    %cst_117 = arith.constant dense<0.000000e+00> : vector<24xf32>
    %362 = vector.multi_reduction <add>, %361, %cst_117 [1] : vector<24x32xf32> to vector<24xf32>
    %363 = vector.shape_cast %362 : vector<24xf32> to vector<24x1xf32>
    %cst_118 = arith.constant 3.200000e+01 : f32
    %364 = vector.broadcast %cst_118 : f32 to vector<24x1xf32>
    %365 = arith.divf %363, %364 : vector<24x1xf32>
    %366 = vector.broadcast %358 : vector<24x1xf32> to vector<24x32xf32>
    %367 = arith.subf %352, %366 : vector<24x32xf32>
    %cst_119 = arith.constant 9.99999974E-6 : f32
    %368 = vector.broadcast %cst_119 : f32 to vector<24x1xf32>
    %369 = arith.addf %365, %368 : vector<24x1xf32>
    %370 = math.rsqrt %369 : vector<24x1xf32>
    %371 = vector.broadcast %370 : vector<24x1xf32> to vector<24x32xf32>
    %372 = arith.mulf %367, %371 : vector<24x32xf32>
    %373 = vector.broadcast %353 : vector<1x32xf32> to vector<24x32xf32>
    %374 = arith.mulf %372, %373 : vector<24x32xf32>
    %375 = vector.broadcast %354 : vector<1x32xf32> to vector<24x32xf32>
    %376 = arith.addf %374, %375 : vector<24x32xf32>
    %c952 = arith.constant 952 : index
    %c0_120 = arith.constant 0 : index
    %377 = vector.load %arg2[%c952, %c0_120] : memref<1208x128xf32, #tpu.memory_space<vmem>>, vector<32x32xf32>
    %cst_121 = arith.constant dense<0.000000e+00> : vector<24x32xf32>
    %378 = tpu.matmul %376, %377, %cst_121 {dimension_numbers = #tpu.dot_dimension_numbers<[1], [0], [0], [1], [0, 0, 1, 1], [], []>} : vector<24x32xf32>, vector<32x32xf32>, vector<24x32xf32> -> vector<24x32xf32>
    %c1197 = arith.constant 1197 : index
    %c0_122 = arith.constant 0 : index
    %379 = vector.load %arg2[%c1197, %c0_122] : memref<1208x128xf32, #tpu.memory_space<vmem>>, vector<1x32xf32>
    %380 = vector.broadcast %379 : vector<1x32xf32> to vector<24x32xf32>
    %381 = arith.addf %378, %380 : vector<24x32xf32>
    %c984 = arith.constant 984 : index
    %c0_123 = arith.constant 0 : index
    %382 = vector.load %arg2[%c984, %c0_123] : memref<1208x128xf32, #tpu.memory_space<vmem>>, vector<32x32xf32>
    %cst_124 = arith.constant dense<0.000000e+00> : vector<24x32xf32>
    %383 = tpu.matmul %381, %382, %cst_124 {dimension_numbers = #tpu.dot_dimension_numbers<[1], [0], [0], [1], [0, 0, 1, 1], [], []>} : vector<24x32xf32>, vector<32x32xf32>, vector<24x32xf32> -> vector<24x32xf32>
    %c1198 = arith.constant 1198 : index
    %c0_125 = arith.constant 0 : index
    %384 = vector.load %arg2[%c1198, %c0_125] : memref<1208x128xf32, #tpu.memory_space<vmem>>, vector<1x32xf32>
    %385 = vector.broadcast %384 : vector<1x32xf32> to vector<24x32xf32>
    %386 = arith.addf %383, %385 : vector<24x32xf32>
    %cst_126 = arith.constant 0.000000e+00 : f32
    %387 = vector.broadcast %cst_126 : f32 to vector<24x32xf32>
    %388 = arith.cmpf ogt, %386, %387 : vector<24x32xf32>
    %cst_127 = arith.constant 0.000000e+00 : f32
    %389 = vector.broadcast %cst_127 : f32 to vector<24x32xf32>
    %390 = arith.minimumf %386, %389 : vector<24x32xf32>
    %391 = math.exp %390 : vector<24x32xf32>
    %cst_128 = arith.constant 1.000000e+00 : f32
    %392 = vector.broadcast %cst_128 : f32 to vector<24x32xf32>
    %393 = arith.subf %391, %392 : vector<24x32xf32>
    %394 = arith.select %388, %386, %393 : vector<24x32xi1>, vector<24x32xf32>
    %c1016 = arith.constant 1016 : index
    %c0_129 = arith.constant 0 : index
    %395 = vector.load %arg2[%c1016, %c0_129] : memref<1208x128xf32, #tpu.memory_space<vmem>>, vector<32x64xf32>
    %cst_130 = arith.constant dense<0.000000e+00> : vector<24x64xf32>
    %396 = tpu.matmul %394, %395, %cst_130 {dimension_numbers = #tpu.dot_dimension_numbers<[1], [0], [0], [1], [0, 0, 1, 1], [], []>} : vector<24x32xf32>, vector<32x64xf32>, vector<24x64xf32> -> vector<24x64xf32>
    %c1199 = arith.constant 1199 : index
    %c0_131 = arith.constant 0 : index
    %397 = vector.load %arg2[%c1199, %c0_131] : memref<1208x128xf32, #tpu.memory_space<vmem>>, vector<1x64xf32>
    %398 = vector.broadcast %397 : vector<1x64xf32> to vector<24x64xf32>
    %399 = arith.addf %396, %398 : vector<24x64xf32>
    %400 = vector.extract_strided_slice %399 {offsets = [0, 0], sizes = [24, 32], strides = [1, 1]} : vector<24x64xf32> to vector<24x32xf32>
    %401 = arith.negf %400 : vector<24x32xf32>
    %402 = math.exp %401 : vector<24x32xf32>
    %cst_132 = arith.constant 1.000000e+00 : f32
    %403 = vector.broadcast %cst_132 : f32 to vector<24x32xf32>
    %404 = arith.addf %403, %402 : vector<24x32xf32>
    %405 = arith.divf %403, %404 : vector<24x32xf32>
    %406 = vector.extract_strided_slice %399 {offsets = [0, 32], sizes = [24, 32], strides = [1, 1]} : vector<24x64xf32> to vector<24x32xf32>
    %407 = arith.mulf %405, %406 : vector<24x32xf32>
    %408 = arith.addf %407, %381 : vector<24x32xf32>
    %c1200 = arith.constant 1200 : index
    %c0_133 = arith.constant 0 : index
    %409 = vector.load %arg2[%c1200, %c0_133] : memref<1208x128xf32, #tpu.memory_space<vmem>>, vector<1x32xf32>
    %c1201 = arith.constant 1201 : index
    %c0_134 = arith.constant 0 : index
    %410 = vector.load %arg2[%c1201, %c0_134] : memref<1208x128xf32, #tpu.memory_space<vmem>>, vector<1x32xf32>
    %cst_135 = arith.constant dense<0.000000e+00> : vector<24xf32>
    %411 = vector.multi_reduction <add>, %408, %cst_135 [1] : vector<24x32xf32> to vector<24xf32>
    %412 = vector.shape_cast %411 : vector<24xf32> to vector<24x1xf32>
    %cst_136 = arith.constant 3.200000e+01 : f32
    %413 = vector.broadcast %cst_136 : f32 to vector<24x1xf32>
    %414 = arith.divf %412, %413 : vector<24x1xf32>
    %415 = vector.broadcast %414 : vector<24x1xf32> to vector<24x32xf32>
    %416 = arith.subf %408, %415 : vector<24x32xf32>
    %417 = arith.mulf %416, %416 : vector<24x32xf32>
    %cst_137 = arith.constant dense<0.000000e+00> : vector<24xf32>
    %418 = vector.multi_reduction <add>, %417, %cst_137 [1] : vector<24x32xf32> to vector<24xf32>
    %419 = vector.shape_cast %418 : vector<24xf32> to vector<24x1xf32>
    %cst_138 = arith.constant 3.200000e+01 : f32
    %420 = vector.broadcast %cst_138 : f32 to vector<24x1xf32>
    %421 = arith.divf %419, %420 : vector<24x1xf32>
    %422 = vector.broadcast %414 : vector<24x1xf32> to vector<24x32xf32>
    %423 = arith.subf %408, %422 : vector<24x32xf32>
    %cst_139 = arith.constant 9.99999974E-6 : f32
    %424 = vector.broadcast %cst_139 : f32 to vector<24x1xf32>
    %425 = arith.addf %421, %424 : vector<24x1xf32>
    %426 = math.rsqrt %425 : vector<24x1xf32>
    %427 = vector.broadcast %426 : vector<24x1xf32> to vector<24x32xf32>
    %428 = arith.mulf %423, %427 : vector<24x32xf32>
    %429 = vector.broadcast %409 : vector<1x32xf32> to vector<24x32xf32>
    %430 = arith.mulf %428, %429 : vector<24x32xf32>
    %431 = vector.broadcast %410 : vector<1x32xf32> to vector<24x32xf32>
    %432 = arith.addf %430, %431 : vector<24x32xf32>
    %c1048 = arith.constant 1048 : index
    %c0_140 = arith.constant 0 : index
    %433 = vector.load %arg2[%c1048, %c0_140] : memref<1208x128xf32, #tpu.memory_space<vmem>>, vector<32x64xf32>
    %cst_141 = arith.constant dense<0.000000e+00> : vector<24x64xf32>
    %434 = tpu.matmul %432, %433, %cst_141 {dimension_numbers = #tpu.dot_dimension_numbers<[1], [0], [0], [1], [0, 0, 1, 1], [], []>} : vector<24x32xf32>, vector<32x64xf32>, vector<24x64xf32> -> vector<24x64xf32>
    %c1202 = arith.constant 1202 : index
    %c0_142 = arith.constant 0 : index
    %435 = vector.load %arg2[%c1202, %c0_142] : memref<1208x128xf32, #tpu.memory_space<vmem>>, vector<1x64xf32>
    %436 = vector.broadcast %435 : vector<1x64xf32> to vector<24x64xf32>
    %437 = arith.addf %434, %436 : vector<24x64xf32>
    %438 = vector.extract_strided_slice %437 {offsets = [0, 0], sizes = [24, 32], strides = [1, 1]} : vector<24x64xf32> to vector<24x32xf32>
    %439 = arith.negf %438 : vector<24x32xf32>
    %440 = math.exp %439 : vector<24x32xf32>
    %cst_143 = arith.constant 1.000000e+00 : f32
    %441 = vector.broadcast %cst_143 : f32 to vector<24x32xf32>
    %442 = arith.addf %441, %440 : vector<24x32xf32>
    %443 = arith.divf %441, %442 : vector<24x32xf32>
    %444 = vector.extract_strided_slice %437 {offsets = [0, 32], sizes = [24, 32], strides = [1, 1]} : vector<24x64xf32> to vector<24x32xf32>
    %445 = arith.mulf %443, %444 : vector<24x32xf32>
    %446 = arith.addf %445, %310 : vector<24x32xf32>
    %c1203 = arith.constant 1203 : index
    %c0_144 = arith.constant 0 : index
    %447 = vector.load %arg2[%c1203, %c0_144] : memref<1208x128xf32, #tpu.memory_space<vmem>>, vector<1x32xf32>
    %c1204 = arith.constant 1204 : index
    %c0_145 = arith.constant 0 : index
    %448 = vector.load %arg2[%c1204, %c0_145] : memref<1208x128xf32, #tpu.memory_space<vmem>>, vector<1x32xf32>
    %cst_146 = arith.constant dense<0.000000e+00> : vector<24xf32>
    %449 = vector.multi_reduction <add>, %446, %cst_146 [1] : vector<24x32xf32> to vector<24xf32>
    %450 = vector.shape_cast %449 : vector<24xf32> to vector<24x1xf32>
    %cst_147 = arith.constant 3.200000e+01 : f32
    %451 = vector.broadcast %cst_147 : f32 to vector<24x1xf32>
    %452 = arith.divf %450, %451 : vector<24x1xf32>
    %453 = vector.broadcast %452 : vector<24x1xf32> to vector<24x32xf32>
    %454 = arith.subf %446, %453 : vector<24x32xf32>
    %455 = arith.mulf %454, %454 : vector<24x32xf32>
    %cst_148 = arith.constant dense<0.000000e+00> : vector<24xf32>
    %456 = vector.multi_reduction <add>, %455, %cst_148 [1] : vector<24x32xf32> to vector<24xf32>
    %457 = vector.shape_cast %456 : vector<24xf32> to vector<24x1xf32>
    %cst_149 = arith.constant 3.200000e+01 : f32
    %458 = vector.broadcast %cst_149 : f32 to vector<24x1xf32>
    %459 = arith.divf %457, %458 : vector<24x1xf32>
    %460 = vector.broadcast %452 : vector<24x1xf32> to vector<24x32xf32>
    %461 = arith.subf %446, %460 : vector<24x32xf32>
    %cst_150 = arith.constant 9.99999974E-6 : f32
    %462 = vector.broadcast %cst_150 : f32 to vector<24x1xf32>
    %463 = arith.addf %459, %462 : vector<24x1xf32>
    %464 = math.rsqrt %463 : vector<24x1xf32>
    %465 = vector.broadcast %464 : vector<24x1xf32> to vector<24x32xf32>
    %466 = arith.mulf %461, %465 : vector<24x32xf32>
    %467 = vector.broadcast %447 : vector<1x32xf32> to vector<24x32xf32>
    %468 = arith.mulf %466, %467 : vector<24x32xf32>
    %469 = vector.broadcast %448 : vector<1x32xf32> to vector<24x32xf32>
    %470 = arith.addf %468, %469 : vector<24x32xf32>
    %471 = vector.extract_strided_slice %470 {offsets = [16, 0], sizes = [8, 32], strides = [1, 1]} : vector<24x32xf32> to vector<8x32xf32>
    %c1080 = arith.constant 1080 : index
    %c0_151 = arith.constant 0 : index
    %472 = vector.load %arg2[%c1080, %c0_151] : memref<1208x128xf32, #tpu.memory_space<vmem>>, vector<32x64xf32>
    %cst_152 = arith.constant dense<0.000000e+00> : vector<8x64xf32>
    %473 = tpu.matmul %471, %472, %cst_152 {dimension_numbers = #tpu.dot_dimension_numbers<[1], [0], [0], [1], [0, 0, 1, 1], [], []>} : vector<8x32xf32>, vector<32x64xf32>, vector<8x64xf32> -> vector<8x64xf32>
    %c1205 = arith.constant 1205 : index
    %c0_153 = arith.constant 0 : index
    %474 = vector.load %arg2[%c1205, %c0_153] : memref<1208x128xf32, #tpu.memory_space<vmem>>, vector<1x64xf32>
    %475 = vector.broadcast %474 : vector<1x64xf32> to vector<8x64xf32>
    %476 = arith.addf %473, %475 : vector<8x64xf32>
    %c1112 = arith.constant 1112 : index
    %c0_154 = arith.constant 0 : index
    %477 = vector.load %arg2[%c1112, %c0_154] : memref<1208x128xf32, #tpu.memory_space<vmem>>, vector<64x6xf32>
    %cst_155 = arith.constant dense<0.000000e+00> : vector<8x6xf32>
    %478 = tpu.matmul %476, %477, %cst_155 {dimension_numbers = #tpu.dot_dimension_numbers<[1], [0], [0], [1], [0, 0, 1, 1], [], []>} : vector<8x64xf32>, vector<64x6xf32>, vector<8x6xf32> -> vector<8x6xf32>
    %c1206 = arith.constant 1206 : index
    %c0_156 = arith.constant 0 : index
    %479 = vector.load %arg2[%c1206, %c0_156] : memref<1208x128xf32, #tpu.memory_space<vmem>>, vector<1x6xf32>
    %480 = vector.broadcast %479 : vector<1x6xf32> to vector<8x6xf32>
    %481 = arith.addf %478, %480 : vector<8x6xf32>
    %c0_157 = arith.constant 0 : index
    %c0_158 = arith.constant 0 : index
    %482 = vector.load %arg3[%c0_157, %c0_158] : memref<8x6xf32, #tpu.memory_space<vmem>>, vector<8x6xf32>
    tpu.vector_store %arg3[%c0_157, %c0_158], %481 {strides = array<i32>} : memref<8x6xf32, #tpu.memory_space<vmem>>, vector<8x6xf32>,
    return
  }
  func.func @transform_0(%arg0: i32) -> (i32, i32) {
    %c0_i32 = arith.constant 0 : i32
    %c0_i32_0 = arith.constant 0 : i32
    %c0_i32_1 = arith.constant 0 : i32
    return %c0_i32, %c0_i32_0 : i32, i32
  }
  func.func @transform_1(%arg0: i32) -> (i32, i32) {
    %c0_i32 = arith.constant 0 : i32
    %c0_i32_0 = arith.constant 0 : i32
    %c0_i32_1 = arith.constant 0 : i32
    return %c0_i32, %c0_i32_0 : i32, i32
  }
  func.func @transform_2(%arg0: i32) -> (i32, i32) {
    %c0_i32 = arith.constant 0 : i32
    %c0_i32_0 = arith.constant 0 : i32
    %c0_i32_1 = arith.constant 0 : i32
    return %c0_i32, %c0_i32_0 : i32, i32
  }
}

</mosaic_0001>

<bundles_post_ra>
// kernel: fwd.1
= control target key start
LH: loop header
LB: loop body
LE: loop exit
PB: predicated region body
PF: predicated region fallthrough
CT: control target
= control target key end

     0   :  { %7 = vsyncpa [#allocation4], 0  ;;  %s4353_s9 = smov [#allocation3]   ;;  %s4770_s0 = inlined_call_operand.vmem [shape: f32[16,4], index: 0, kind: input, shape index: {}]   ;;  %s4771_s1 = inlined_call_operand.hbm [shape: f32[1208,128], index: 1, kind: input, shape index: {}]   ;;  %s4772_s2 = inlined_call_operand.vmem [shape: f32[8,6], index: 2, kind: output, shape index: {}]  }
   0x1   :  { %s15_s10 = sshll.u32 %s4353_s9, 4  ;;  %s16_s10 = int_to_ptr.vmem [resolvable:$true] %s15_s10 }
   0x2   :  { %s4339_s11 = scalar_lea.vmem %s16_s10, 19328  ;;  %p4344_p1 = scmp.lt.s32.totalorder %s16_s10, %s16_s10 }
   0x3   :  { %p4340_p0 = scmp.ne.s32.totalorder %s16_s10, %s4339_s11  ;;  %p4345_p2 = scmp.lt.s32.totalorder %s4339_s11, %s4339_s11 }
   0x5   :  { %p4346_p3 = por %p4345_p2, %p4344_p1 }
   0x7   :  { %p4347_p4 = pnand %p4346_p3, %p4340_p0 }
   0x9   :  { %4350 = shalt.err (!%p4347_p4)
}
   0xa   :  { %s4354_s12 = smov 128   ;;  %s4355_s13 = smov 8  }
   0xb   :  { %21 = dma.hbm_to_vmem [thread:$0]  %s4771_s1, 19328, %s16_s10, [#allocation4], %s4354_s12, %s4354_s12, %s4355_s13  }
   0xc   :  { %4351 = dma.done.wait [#allocation4], 19328  }
   0xd   :  { %4352 = vsyncadd [#allocation4], 4294947968  ;;  %vm40_vm0 = vcmask 1043456   ;;  %vm33_vm1 = vcmask 31744   ;;  %v27_v0 = vld [vmem:[#allocation3] sm:$0xf] }
   0xe   :  { %v25_v1 = vld [vmem:[%s4770_s0] sm:$0xff]  ;;  %v26_v2 = vld [vmem:[%s4770_s0 + $0x8] sm:$0xff]  ;;  %3669 = vmatprep.subr.msk.mxu0 %vm40_vm0, %v27_v0  ;;  %v122_v3 = vld [vmem:[#allocation3 + $0x20] sm:$0xff]  ;;  %vm128_vm2 = vcmask 261120   ;;  %s4356_s0 = smov 124   ;;  %vm4358_vm7 = vmmov 0  }
   0xf   :  { %3671 = vmatprep.mubr.msk.f32.mxu0 %vm33_vm1, %v25_v1  ;;  %v121_v4 = vld [vmem:[#allocation3 + $0x18] sm:$0xff]  ;;  %3670 = vmatpush3.msk.msra.mxu0 %vm40_vm0, %v27_v0  ;;  %v120_v5 = vld [vmem:[#allocation3 + $0x10] sm:$0xff]  ;;  %v119_v6 = vld [vmem:[#allocation3 + $0x8] sm:$0xff]  ;;  %vm1354_vm8 = vcmask 1040384   ;;  %s4359_s1 = smov 64   ;;  %s4360_s20 = smov 32  }
  0x10   :  { %3674 = vmatprep.subr.mxu1 %v122_v3  ;;  %3672 = vmatmul.mubr.msk.f32.vlgmr.msra.gmra.mxu0 %vm33_vm1, %v26_v2  ;;  %v492_v7 = vld [vmem:[#allocation3 + $0x50] sm:$0xff]  ;;  %v3317_v9 = vld [vmem:[#allocation3 + $0x498] ss:$0 sm:$0xff]  ;;  %v491_v13 = vld [vmem:[#allocation3 + $0x48] sm:$0xff]  ;;  %vm1458_vm9 = vcmask 253952   ;;  %vm1460_vm10 = vcmask 254977  }
  0x11   :  { %3675 = vmatpush3.msra.mxu1 %v122_v3  ;;  %v490_v14 = vld [vmem:[#allocation3 + $0x40] sm:$0xff]  ;;  %v489_v15 = vld [vmem:[#allocation3 + $0x38] sm:$0xff]  ;;  %v210_v16 = vld [vmem:[#allocation3 + $0x28] sm:$0xf]  ;;  %s4361_s21 = smov 96   ;;  %vm2186_vm11 = vcmask 195584  }
  0x12   :  { %3676 = vmatprep.subr.mxu1 %v121_v4  ;;  %3685 = vmatprep.subr.msk.mxu0 %vm40_vm0, %v210_v16  ;;  %v3321_v18 = vld [vmem:[#allocation3 + $0x499] ss:$0 sm:$0xff]  ;;  %v312_v22 = vld [vmem:[#allocation3 + $0x30] sm:$0xf]  ;;  %v3324_v24 = vld [vmem:[#allocation3 + $0x49a] ss:$0 sm:$0xff] }
  0x13   :  { %3677 = vmatpush3.msra.mxu1 %v121_v4  ;;  %3686 = vmatpush3.msk.msra.mxu0 %vm40_vm0, %v210_v16  ;;  %v588_v23 = vld [vmem:[#allocation3 + $0xd0] sm:$0xff]  ;;  %v3338_v39 = vld [vmem:[#allocation3 + $0x49e] ss:$0 sm:$0xff]  ;;  %v587_v43 = vld [vmem:[#allocation3 + $0xc8] sm:$0xff]  ;;  %vm3236_vm15 = vcmask 523264  }
  0x14   :  { %3678 = vmatprep.subr.mxu1 %v120_v5  ;;  %3690 = vmatprep.subr.msk.mxu0 %vm40_vm0, %v312_v22  ;;  %v586_v44 = vld [vmem:[#allocation3 + $0xc0] sm:$0xff]  ;;  %v585_v45 = vld [vmem:[#allocation3 + $0xb8] sm:$0xff]  ;;  %v584_v46 = vld [vmem:[#allocation3 + $0xb0] sm:$0xff] }
  0x15   :  { %3679 = vmatpush3.msra.mxu1 %v120_v5  ;;  %v583_v47 = vld [vmem:[#allocation3 + $0xa8] sm:$0xff]  ;;  %v582_v48 = vld [vmem:[#allocation3 + $0xa0] sm:$0xff]  ;;  %v581_v49 = vld [vmem:[#allocation3 + $0x98] sm:$0xff] }
  0x16   :  { %3680 = vmatprep.subr.mxu1 %v119_v6  ;;  %v580_v50 = vld [vmem:[#allocation3 + $0x90] sm:$0xff]  ;;  %v579_v51 = vld [vmem:[#allocation3 + $0x88] sm:$0xff]  ;;  %v578_v52 = vld [vmem:[#allocation3 + $0x80] sm:$0xff] }
  0x17   :  { %3681 = vmatpush3.msra.mxu1 %v119_v6  ;;  %v577_v53 = vld [vmem:[#allocation3 + $0x78] sm:$0xff]  ;;  %v576_v54 = vld [vmem:[#allocation3 + $0x70] sm:$0xff]  ;;  %v575_v55 = vld [vmem:[#allocation3 + $0x68] sm:$0xff] }
  0x18   :  { %3695 = vmatprep.subr.mxu1 %v492_v7  ;;  %v574_v56 = vld [vmem:[#allocation3 + $0x60] sm:$0xff]  ;;  %v573_v57 = vld [vmem:[#allocation3 + $0x58] sm:$0xff]  ;;  %v696_v59 = vld [vmem:[#allocation3 + $0x150] sm:$0xff] }
  0x19   :  { %v804_v60 = vld [vmem:[#allocation3 + $0x1d0] sm:$0xff]  ;;  %v695_v61 = vld [vmem:[#allocation3 + $0x148] sm:$0xff]  ;;  %v694_v63 = vld [vmem:[#allocation3 + $0x140] sm:$0xff] }
  0x1a   :  { %v803_v62 = vld [vmem:[#allocation3 + $0x1c8] sm:$0xff]  ;;  %v802_v0 = vld [vmem:[#allocation3 + $0x1c0] sm:$0xff]  ;;  %v693_v1 = vld [vmem:[#allocation3 + $0x138] sm:$0xff] }
  0x1b   :  { %v801_v2 = vld [vmem:[#allocation3 + $0x1b8] sm:$0xff]  ;;  %v692_v3 = vld [vmem:[#allocation3 + $0x130] sm:$0xff]  ;;  %v691_v5 = vld [vmem:[#allocation3 + $0x128] sm:$0xff] }
  0x1c   :  { %v800_v4 = vld [vmem:[#allocation3 + $0x1b0] sm:$0xff]  ;;  %v799_v6 = vld [vmem:[#allocation3 + $0x1a8] sm:$0xff]  ;;  %v794_v16 = vld [vmem:[#allocation3 + $0x180] sm:$0xff] }
  0xd0   :  { %v3673_v8 = vpop.f32.mrf.mxu0 }
  0xd1   :  { %v116_v12 = vadd.f32 %v3673_v8, %v3317_v9  ;;  %v798_v8 = vld [vmem:[#allocation3 + $0x1a0] sm:$0xff] }
  0xd2   :  { %v110_v10 = vpop.f32.mrf.mxu0 }
  0xd3   :  { %v111_v11 = vadd.f32 %v3317_v9, %v110_v10  ;;  %v689_v9 = vld [vmem:[#allocation3 + $0x118] sm:$0xff] }
  0xd4   :  { %v797_v10 = vld [vmem:[#allocation3 + $0x198] sm:$0xff] }
  0xd5   :  { %3682 = vmatprep.mubr.msk.f32.mxu1 %vm128_vm2, %v111_v11 }
  0xd6   :  { %3683 = vmatmul.mubr.msk.f32.vlgmr.msra.gmra.mxu1 %vm128_vm2, %v116_v12 }
  0xd7   :  { %3696 = vmatpush3.msra.mxu1 %v492_v7  ;;  %3703 = vmatprep.mubr.msk.f32.mxu1 %vm128_vm2, %v111_v11  ;;  %v690_v7 = vld [vmem:[#allocation3 + $0x120] sm:$0xff]  ;;  %v688_v11 = vld [vmem:[#allocation3 + $0x110] sm:$0xff] }
  0xd8   :  { %3697 = vmatprep.subr.mxu1 %v491_v13 }
  0xd9   :  { %3698 = vmatpush3.msra.mxu1 %v491_v13  ;;  %v687_v13 = vld [vmem:[#allocation3 + $0x108] sm:$0xff] }
  0xda   :  { %3699 = vmatprep.subr.mxu1 %v490_v14 }
  0xdb   :  { %3700 = vmatpush3.msra.mxu1 %v490_v14  ;;  %v795_v14 = vld [vmem:[#allocation3 + $0x188] sm:$0xff] }
  0xdc   :  { %3701 = vmatprep.subr.mxu1 %v489_v15 }
  0xdd   :  { %3702 = vmatpush3.msra.mxu1 %v489_v15  ;;  %v686_v15 = vld [vmem:[#allocation3 + $0x100] sm:$0xff] }
  0xde   :  { %3704 = vmatmul.mubr.msk.f32.vlgmr.msra.gmra.mxu1 %vm128_vm2, %v116_v12  ;;  %3741 = vmatprep.subr.mxu1 %v696_v59  ;;  %v796_v12 = vld [vmem:[#allocation3 + $0x190] sm:$0xff] }
  0xdf   :  { %3742 = vmatpush3.msra.mxu1 %v696_v59 }
  0xe0   :  { %3743 = vmatprep.subr.mxu1 %v695_v61 }
  0xe1   :  { %3744 = vmatpush3.msra.mxu1 %v695_v61 }
  0xe2   :  { %3745 = vmatprep.subr.mxu1 %v694_v63 }
  0xe3   :  { %3746 = vmatpush3.msra.mxu1 %v694_v63 }
  0xe4   :  { %3747 = vmatprep.subr.mxu1 %v693_v1 }
  0xe5   :  { %3748 = vmatpush3.msra.mxu1 %v693_v1 }
  0xe6   :  { %3749 = vmatprep.subr.mxu1 %v692_v3 }
  0xe7   :  { %3750 = vmatpush3.msra.mxu1 %v692_v3  ;;  %v904_v3 = vld [vmem:[#allocation3 + $0x250] sm:$0xff] }
  0xe8   :  { %3751 = vmatprep.subr.mxu1 %v691_v5 }
  0xe9   :  { %3752 = vmatpush3.msra.mxu1 %v691_v5  ;;  %v900_v5 = vld [vmem:[#allocation3 + $0x230] sm:$0xff] }
  0xea   :  { %3753 = vmatprep.subr.mxu1 %v690_v7 }
  0xeb   :  { %3754 = vmatpush3.msra.mxu1 %v690_v7  ;;  %v898_v7 = vld [vmem:[#allocation3 + $0x220] sm:$0xff] }
  0xec   :  { %3755 = vmatprep.subr.mxu1 %v689_v9 }
  0xed   :  { %3756 = vmatpush3.msra.mxu1 %v689_v9  ;;  %v896_v9 = vld [vmem:[#allocation3 + $0x210] sm:$0xff] }
  0xee   :  { %3757 = vmatprep.subr.mxu1 %v688_v11 }
  0xef   :  { %3758 = vmatpush3.msra.mxu1 %v688_v11  ;;  %v894_v11 = vld [vmem:[#allocation3 + $0x200] sm:$0xff] }
  0xf0   :  { %3759 = vmatprep.subr.mxu1 %v687_v13 }
  0xf1   :  { %3760 = vmatpush3.msra.mxu1 %v687_v13  ;;  %v892_v13 = vld [vmem:[#allocation3 + $0x1f0] sm:$0xff] }
  0xf2   :  { %3761 = vmatprep.subr.mxu1 %v686_v15 }
  0xf3   :  { %3762 = vmatpush3.msra.mxu1 %v686_v15  ;;  %v890_v15 = vld [vmem:[#allocation3 + $0x1e0] sm:$0xff] }
 0x196   :  { %v3684_v17 = vpop.f32.mrf.mxu1 }
 0x197   :  { %v4398_v21 = vadd.f32 %v3684_v17, %v3321_v18  ;;  %v685_v17 = vld [vmem:[#allocation3 + $0xf8] sm:$0xff] }
 0x198   :  { %v201_v19 = vpop.f32.mrf.mxu1  ;;  %3763 = vmatprep.subr.mxu1 %v685_v17 }
 0x199   :  { %v4396_v20 = vadd.f32 %v3321_v18, %v201_v19  ;;  %v793_v18 = vld [vmem:[#allocation3 + $0x178] sm:$0xff]  ;;  %v684_v19 = vld [vmem:[#allocation3 + $0xf0] sm:$0xff]  ;;  %3764 = vmatpush3.msra.mxu1 %v685_v17  ;;  %v3344_v17 = vld [vmem:[#allocation3 + $0x4a0] ss:$0 sm:$0xff] }
 0x19a   :  { %3765 = vmatprep.subr.mxu1 %v684_v19 }
 0x19b   :  { %3687 = vmatprep.mubr.msk.f32.mxu0 %vm33_vm1, %v4396_v20  ;;  %3766 = vmatpush3.msra.mxu1 %v684_v19 }
 0x19c   :  { %3688 = vmatmul.mubr.msk.f32.vlgmr.msra.gmra.mxu0 %vm33_vm1, %v4398_v21 }
 0x19d   :  { %3691 = vmatpush3.msk.msra.mxu0 %vm40_vm0, %v312_v22  ;;  %v792_v22 = vld [vmem:[#allocation3 + $0x170] sm:$0xff] }
 0x19e   :  { %3706 = vmatprep.subr.mxu0 %v588_v23  ;;  %v3705_v33 = vpop.f32.mrf.mxu1 }
 0x19f   :  { %v4411_v58 = vadd.f32 %v3705_v33, %v3338_v39 }
 0x1a0   :  { %v564_v37 = vpop.f32.mrf.mxu1 }
 0x1a1   :  { %v4406_v41 = vadd.f32 %v3338_v39, %v564_v37 }
 0x25c   :  { %v3689_v25 = vpop.f32.mrf.mxu0 }
 0x25d   :  { %v297_v26 = vadd.f32 %v3689_v25, %v3324_v24  ;;  %v682_v25 = vld [vmem:[#allocation3 + $0xe0] sm:$0xff] }
 0x25e   :  { %v291_v27 = vpop.f32.mrf.mxu0 }
 0x25f   :  { %v303_v28 = vmin.f32 %v297_v26, 0.0  ;;  %v292_v29 = vadd.f32 %v3324_v24, %v291_v27  ;;  %vm301_vm4 = vcmp.gt.f32.partialorder %v297_v26, 0.0  ;;  %v791_v24 = vld [vmem:[#allocation3 + $0x168] sm:$0xff]  ;;  %v681_v27 = vld [vmem:[#allocation3 + $0xd8] sm:$0xff] }
 0x261   :  { %v306_v30 = vmul.f32 1.442695, %v303_v28  ;;  %v302_v31 = vmin.f32 %v292_v29, 0.0  ;;  %vm300_vm3 = vcmp.gt.f32.partialorder %v292_v29, 0.0  ;;  %v789_v28 = vld [vmem:[#allocation3 + $0x158] sm:$0xff] }
 0x263   :  { %4181 = vpow2.f32 %v306_v30  ;;  %v304_v32 = vmul.f32 1.442695, %v302_v31  ;;  %v3330_v30 = vld [vmem:[#allocation3 + $0x49b] ss:$0 sm:$0xff] }
 0x265   :  { %4183 = vpow2.f32 %v304_v32 }
 0x270   :  { %v4182_v34 = vpop.eup %4181 }
 0x271   :  { %v3329_v36 = vadd.f32 -1.0, %v4182_v34  ;;  %v3341_v34 = vld [vmem:[#allocation3 + $0x49f] ss:$0 sm:$0xff] }
 0x272   :  { %v4184_v35 = vpop.eup %4183 }
 0x273   :  { %v3328_v38 = vadd.f32 -1.0, %v4184_v35  ;;  %v311_v42 = vsel %vm301_vm4, %v297_v26, %v3329_v36  ;;  %v790_v26 = vld [vmem:[#allocation3 + $0x160] sm:$0xff] }
 0x275   :  { %v310_v40 = vsel %vm300_vm3, %v292_v29, %v3328_v38 }
 0x276   :  { %3692 = vmatprep.mubr.msk.f32.mxu0 %vm33_vm1, %v310_v40 }
 0x277   :  { %3693 = vmatmul.mubr.msk.f32.vlgmr.msra.gmra.mxu0 %vm33_vm1, %v311_v42 }
 0x278   :  { %3707 = vmatpush3.msra.mxu0 %v588_v23  ;;  %3738 = vmatprep.mubr.f32.mxu0 %v4406_v41  ;;  %v683_v23 = vld [vmem:[#allocation3 + $0xe8] sm:$0xff] }
 0x279   :  { %3708 = vmatprep.subr.mxu0 %v587_v43  ;;  %3767 = vmatprep.subr.mxu1 %v683_v23 }
 0x27a   :  { %3709 = vmatpush3.msra.mxu0 %v587_v43  ;;  %3768 = vmatpush3.msra.mxu1 %v683_v23 }
 0x27b   :  { %3710 = vmatprep.subr.mxu0 %v586_v44  ;;  %3769 = vmatprep.subr.mxu1 %v682_v25 }
 0x27c   :  { %3711 = vmatpush3.msra.mxu0 %v586_v44  ;;  %3770 = vmatpush3.msra.mxu1 %v682_v25 }
 0x27d   :  { %3712 = vmatprep.subr.mxu0 %v585_v45  ;;  %3771 = vmatprep.subr.mxu1 %v681_v27 }
 0x27e   :  { %3713 = vmatpush3.msra.mxu0 %v585_v45  ;;  %3772 = vmatpush3.msra.mxu1 %v681_v27 }
 0x27f   :  { %3714 = vmatprep.subr.mxu0 %v584_v46  ;;  %3811 = vmatprep.subr.mxu1 %v904_v3 }
 0x280   :  { %3715 = vmatpush3.msra.mxu0 %v584_v46 }
 0x281   :  { %3716 = vmatprep.subr.mxu0 %v583_v47 }
 0x282   :  { %3717 = vmatpush3.msra.mxu0 %v583_v47 }
 0x283   :  { %3718 = vmatprep.subr.mxu0 %v582_v48 }
 0x284   :  { %3719 = vmatpush3.msra.mxu0 %v582_v48 }
 0x285   :  { %3720 = vmatprep.subr.mxu0 %v581_v49 }
 0x286   :  { %3721 = vmatpush3.msra.mxu0 %v581_v49 }
 0x287   :  { %3722 = vmatprep.subr.mxu0 %v580_v50 }
 0x288   :  { %3723 = vmatpush3.msra.mxu0 %v580_v50 }
 0x289   :  { %3724 = vmatprep.subr.mxu0 %v579_v51 }
 0x28a   :  { %3725 = vmatpush3.msra.mxu0 %v579_v51 }
 0x28b   :  { %3726 = vmatprep.subr.mxu0 %v578_v52 }
 0x28c   :  { %3727 = vmatpush3.msra.mxu0 %v578_v52 }
 0x28d   :  { %3728 = vmatprep.subr.mxu0 %v577_v53 }
 0x28e   :  { %3729 = vmatpush3.msra.mxu0 %v577_v53 }
 0x28f   :  { %3730 = vmatprep.subr.mxu0 %v576_v54 }
 0x290   :  { %3731 = vmatpush3.msra.mxu0 %v576_v54 }
 0x291   :  { %3732 = vmatprep.subr.mxu0 %v575_v55 }
 0x292   :  { %3733 = vmatpush3.msra.mxu0 %v575_v55 }
 0x293   :  { %3734 = vmatprep.subr.mxu0 %v574_v56 }
 0x294   :  { %3735 = vmatpush3.msra.mxu0 %v574_v56 }
 0x295   :  { %3736 = vmatprep.subr.mxu0 %v573_v57 }
 0x296   :  { %3737 = vmatpush3.msra.mxu0 %v573_v57 }
 0x297   :  { %3739 = vmatmul.mubr.f32.vlgmr.msra.gmra.mxu0 %v4411_v58  ;;  %3776 = vmatprep.subr.mxu0 %v804_v60 }
 0x298   :  { %3777 = vmatpush3.msra.mxu0 %v804_v60 }
 0x299   :  { %3778 = vmatprep.subr.mxu0 %v803_v62 }
 0x29a   :  { %3779 = vmatpush3.msra.mxu0 %v803_v62 }
 0x29b   :  { %3780 = vmatprep.subr.mxu0 %v802_v0 }
 0x29c   :  { %3781 = vmatpush3.msra.mxu0 %v802_v0 }
 0x29d   :  { %3782 = vmatprep.subr.mxu0 %v801_v2 }
 0x29e   :  { %3783 = vmatpush3.msra.mxu0 %v801_v2 }
 0x29f   :  { %3784 = vmatprep.subr.mxu0 %v800_v4 }
 0x2a0   :  { %3785 = vmatpush3.msra.mxu0 %v800_v4  ;;  %v902_v4 = vld [vmem:[#allocation3 + $0x240] sm:$0xff] }
 0x2a1   :  { %3786 = vmatprep.subr.mxu0 %v799_v6 }
 0x2a2   :  { %3787 = vmatpush3.msra.mxu0 %v799_v6  ;;  %v899_v6 = vld [vmem:[#allocation3 + $0x228] sm:$0xff] }
 0x2a3   :  { %3788 = vmatprep.subr.mxu0 %v798_v8 }
 0x2a4   :  { %3789 = vmatpush3.msra.mxu0 %v798_v8  ;;  %v897_v8 = vld [vmem:[#allocation3 + $0x218] sm:$0xff] }
 0x2a5   :  { %3790 = vmatprep.subr.mxu0 %v797_v10 }
 0x2a6   :  { %3791 = vmatpush3.msra.mxu0 %v797_v10  ;;  %v895_v10 = vld [vmem:[#allocation3 + $0x208] sm:$0xff] }
 0x2a7   :  { %3792 = vmatprep.subr.mxu0 %v796_v12 }
 0x2a8   :  { %3793 = vmatpush3.msra.mxu0 %v796_v12  ;;  %v893_v12 = vld [vmem:[#allocation3 + $0x1f8] sm:$0xff] }
 0x2a9   :  { %3794 = vmatprep.subr.mxu0 %v795_v14 }
 0x2aa   :  { %3795 = vmatpush3.msra.mxu0 %v795_v14  ;;  %v891_v14 = vld [vmem:[#allocation3 + $0x1e8] sm:$0xff] }
 0x2ab   :  { %3796 = vmatprep.subr.mxu0 %v794_v16 }
 0x2ac   :  { %3797 = vmatpush3.msra.mxu0 %v794_v16  ;;  %v889_v16 = vld [vmem:[#allocation3 + $0x1d8] sm:$0xff] }
 0x2ad   :  { %3798 = vmatprep.subr.mxu0 %v793_v18 }
 0x2ae   :  { %3799 = vmatpush3.msra.mxu0 %v793_v18 }
 0x2af   :  { %3800 = vmatprep.subr.mxu0 %v792_v22 }
 0x2b0   :  { %3801 = vmatpush3.msra.mxu0 %v792_v22 }
 0x2b1   :  { %3802 = vmatprep.subr.mxu0 %v791_v24 }
 0x2b2   :  { %3803 = vmatpush3.msra.mxu0 %v791_v24 }
 0x2b3   :  { %3804 = vmatprep.subr.mxu0 %v790_v26 }
 0x2b4   :  { %3805 = vmatpush3.msra.mxu0 %v790_v26 }
 0x2b5   :  { %3806 = vmatprep.subr.mxu0 %v789_v28 }
 0x2b6   :  { %3807 = vmatpush3.msra.mxu0 %v789_v28 }
 0x2b7   :  { %3846 = vmatprep.subr.mxu0 %v904_v3 }
 0x337   :  { %v3694_v29 = vpop.f32.mrf.mxu0 }
 0x338   :  { %v399_v33 = vadd.f32 %v3694_v29, %v3330_v30 }
 0x339   :  { %v393_v31 = vpop.f32.mrf.mxu0 }
 0x33a   :  { %v394_v32 = vadd.f32 %v3330_v30, %v393_v31  ;;  %v3335_v51 = vmul.f32 -1.442695, %v399_v33 }
 0x33c   :  { %416 = vrot.lane.b32.xlu0 %v394_v32, %s4356_s0  ;;  %v3334_v50 = vmul.f32 -1.442695, %v394_v32 }
 0x340   :  { %418 = vrot.lane.b32.xlu0 %v399_v33, %s4356_s0 }
 0x357   :  { %v3740_v35 = vpop.f32.mrf.mxu0 }
 0x358   :  { %v666_v36 = vadd.f32 %v3740_v35, %v3341_v34 }
 0x359   :  { %v660_v37 = vpop.f32.mrf.mxu0 }
 0x35a   :  { %v672_v38 = vmin.f32 %v666_v36, 0.0  ;;  %v661_v39 = vadd.f32 %v3341_v34, %v660_v37  ;;  %vm670_vm6 = vcmp.gt.f32.partialorder %v666_v36, 0.0 }
 0x35c   :  { %v675_v40 = vmul.f32 1.442695, %v672_v38  ;;  %v671_v42 = vmin.f32 %v661_v39, 0.0  ;;  %vm669_vm5 = vcmp.gt.f32.partialorder %v661_v39, 0.0 }
 0x35e   :  { %4185 = vpow2.f32 %v675_v40  ;;  %v673_v43 = vmul.f32 1.442695, %v671_v42  ;;  %v3347_v42 = vld [vmem:[#allocation3 + $0x4a1] ss:$0 sm:$0xff] }
 0x360   :  { %4187 = vpow2.f32 %v673_v43 }
 0x361   :  { %4189 = vpow2.f32 %v3334_v50 }
 0x362   :  { %4191 = vpow2.f32 %v3335_v51 }
 0x36b   :  { %v4186_v44 = vpop.eup %4185 }
 0x36c   :  { %v3343_v46 = vadd.f32 -1.0, %v4186_v44 }
 0x36d   :  { %v4188_v45 = vpop.eup %4187 }
 0x36e   :  { %v3342_v47 = vadd.f32 -1.0, %v4188_v45  ;;  %v680_v49 = vsel %vm670_vm6, %v666_v36, %v3343_v46  ;;  %v4190_v52 = vpop.eup %4189 }
 0x36f   :  { %v408_v53 = vadd.f32 1.0, %v4190_v52  ;;  %v4192_v54 = vpop.eup %4191 }
 0x370   :  { %v679_v48 = vsel %vm669_vm5, %v661_v39, %v3342_v47  ;;  %v409_v55 = vadd.f32 1.0, %v4192_v54 }
 0x371   :  { %3773 = vmatprep.mubr.f32.mxu1 %v679_v48  ;;  %3808 = vmatprep.mubr.f32.mxu0 %v679_v48  ;;  %4193 = vrcp.f32 %v408_v53 }
 0x372   :  { %3774 = vmatmul.mubr.f32.vlgmr.msra.gmra.mxu1 %v680_v49  ;;  %3809 = vmatmul.mubr.f32.vlgmr.msra.gmra.mxu0 %v680_v49  ;;  %4195 = vrcp.f32 %v409_v55 }
 0x373   :  { %3812 = vmatpush3.msra.mxu1 %v904_v3  ;;  %3847 = vmatpush3.msra.mxu0 %v904_v3 }
 0x37e   :  { %v4194_v56 = vpop.eup %4193 }
 0x37f   :  { %v4196_v61 = vpop.eup %4195 }
 0x3ae   :  { %v417_v57 = vpop.permute.xlu0 %416 }
 0x3af   :  { %v422_v59 = vmul.f32 %v4194_v56, %v417_v57 }
 0x3b1   :  { %v4415_v60 = vadd.f32 %v422_v59, %v4396_v20  ;;  %v903_v20 = vld [vmem:[#allocation3 + $0x248] sm:$0xff] }
 0x3b2   :  { %v419_v62 = vpop.permute.xlu0 %418  ;;  %3813 = vmatprep.subr.mxu1 %v903_v20  ;;  %3848 = vmatprep.subr.mxu0 %v903_v20 }
 0x3b3   :  { %v423_v63 = vmul.f32 %v4196_v61, %v419_v62  ;;  %v428_v0 = vsel %vm33_vm1, %v4415_v60, 0.0  ;;  %3814 = vmatpush3.msra.mxu1 %v903_v20  ;;  %3849 = vmatpush3.msra.mxu0 %v903_v20  ;;  %v3337_v62 = vld [vmem:[#allocation3 + $0x49d] ss:$0 sm:$0xff] }
 0x3b4   :  { %429 = vadd.xlane.f32.xlu1 %v428_v0  ;;  %3815 = vmatprep.subr.mxu1 %v902_v4 }
 0x3b5   :  { %v4420_v1 = vadd.f32 %v423_v63, %v4398_v21  ;;  %3850 = vmatprep.subr.mxu0 %v902_v4  ;;  %3816 = vmatpush3.msra.mxu1 %v902_v4  ;;  %v901_v21 = vld [vmem:[#allocation3 + $0x238] sm:$0xff] }
 0x3b6   :  { %3851 = vmatpush3.msra.mxu0 %v902_v4  ;;  %3817 = vmatprep.subr.mxu1 %v901_v21 }
 0x3b7   :  { %v431_v2 = vsel %vm33_vm1, %v4420_v1, 0.0  ;;  %3852 = vmatprep.subr.mxu0 %v901_v21  ;;  %3818 = vmatpush3.msra.mxu1 %v901_v21 }
 0x3b8   :  { %432 = vadd.xlane.f32.xlu1 %v431_v2  ;;  %3853 = vmatpush3.msra.mxu0 %v901_v21 }
 0x3b9   :  { %3819 = vmatprep.subr.mxu1 %v900_v5  ;;  %3854 = vmatprep.subr.mxu0 %v900_v5 }
 0x3ba   :  { %3820 = vmatpush3.msra.mxu1 %v900_v5  ;;  %3855 = vmatpush3.msra.mxu0 %v900_v5 }
 0x3bb   :  { %3821 = vmatprep.subr.mxu1 %v899_v6  ;;  %3856 = vmatprep.subr.mxu0 %v899_v6 }
 0x3bc   :  { %3822 = vmatpush3.msra.mxu1 %v899_v6  ;;  %3857 = vmatpush3.msra.mxu0 %v899_v6 }
 0x3bd   :  { %3823 = vmatprep.subr.mxu1 %v898_v7  ;;  %3858 = vmatprep.subr.mxu0 %v898_v7 }
 0x3be   :  { %3824 = vmatpush3.msra.mxu1 %v898_v7  ;;  %3859 = vmatpush3.msra.mxu0 %v898_v7 }
 0x3bf   :  { %3825 = vmatprep.subr.mxu1 %v897_v8  ;;  %3860 = vmatprep.subr.mxu0 %v897_v8 }
 0x3c0   :  { %3826 = vmatpush3.msra.mxu1 %v897_v8  ;;  %3861 = vmatpush3.msra.mxu0 %v897_v8 }
 0x3c1   :  { %3827 = vmatprep.subr.mxu1 %v896_v9  ;;  %3862 = vmatprep.subr.mxu0 %v896_v9 }
 0x3c2   :  { %3828 = vmatpush3.msra.mxu1 %v896_v9  ;;  %3863 = vmatpush3.msra.mxu0 %v896_v9 }
 0x3c3   :  { %3829 = vmatprep.subr.mxu1 %v895_v10  ;;  %3864 = vmatprep.subr.mxu0 %v895_v10 }
 0x3c4   :  { %3830 = vmatpush3.msra.mxu1 %v895_v10  ;;  %3865 = vmatpush3.msra.mxu0 %v895_v10 }
 0x3c5   :  { %3831 = vmatprep.subr.mxu1 %v894_v11  ;;  %3866 = vmatprep.subr.mxu0 %v894_v11 }
 0x3c6   :  { %3832 = vmatpush3.msra.mxu1 %v894_v11  ;;  %3867 = vmatpush3.msra.mxu0 %v894_v11 }
 0x3c7   :  { %3833 = vmatprep.subr.mxu1 %v893_v12  ;;  %3868 = vmatprep.subr.mxu0 %v893_v12 }
 0x3c8   :  { %3834 = vmatpush3.msra.mxu1 %v893_v12  ;;  %3869 = vmatpush3.msra.mxu0 %v893_v12 }
 0x3c9   :  { %3835 = vmatprep.subr.mxu1 %v892_v13  ;;  %3870 = vmatprep.subr.mxu0 %v892_v13 }
 0x3ca   :  { %3836 = vmatpush3.msra.mxu1 %v892_v13  ;;  %3871 = vmatpush3.msra.mxu0 %v892_v13 }
 0x3cb   :  { %3837 = vmatprep.subr.mxu1 %v891_v14  ;;  %3872 = vmatprep.subr.mxu0 %v891_v14 }
 0x3cc   :  { %3838 = vmatpush3.msra.mxu1 %v891_v14  ;;  %3873 = vmatpush3.msra.mxu0 %v891_v14 }
 0x3cd   :  { %3839 = vmatprep.subr.mxu1 %v890_v15  ;;  %3874 = vmatprep.subr.mxu0 %v890_v15 }
 0x3ce   :  { %3840 = vmatpush3.msra.mxu1 %v890_v15  ;;  %3875 = vmatpush3.msra.mxu0 %v890_v15 }
 0x3cf   :  { %3841 = vmatprep.subr.mxu1 %v889_v16  ;;  %3876 = vmatprep.subr.mxu0 %v889_v16 }
 0x3d0   :  { %3842 = vmatpush3.msra.mxu1 %v889_v16  ;;  %3877 = vmatpush3.msra.mxu0 %v889_v16 }
 0x432   :  { %v3775_v18 = vpop.f32.mrf.mxu1  ;;  %v3810_v40 = vpop.f32.mrf.mxu0 }
 0x433   :  { %v774_v19 = vadd.f32 %v3775_v18, %v3344_v17  ;;  %v882_v45 = vadd.f32 %v3810_v40, %v3347_v42 }
 0x434   :  { %v768_v22 = vpop.f32.mrf.mxu1  ;;  %v876_v43 = vpop.f32.mrf.mxu0 }
 0x435   :  { %v3346_v23 = vmul.f32 -1.442695, %v774_v19  ;;  %v769_v24 = vadd.f32 %v3344_v17, %v768_v22  ;;  %v877_v46 = vadd.f32 %v3347_v42, %v876_v43  ;;  %v1077_v19 = vld [vmem:[#allocation3 + $0x258] sm:$0xf]  ;;  %v1166_v42 = vld [vmem:[#allocation3 + $0x270] sm:$0xff]  ;;  %v1165_v43 = vld [vmem:[#allocation3 + $0x268] sm:$0xff] }
 0x436   :  { %3881 = vmatprep.subr.msk.mxu0 %vm40_vm0, %v1077_v19  ;;  %v1179_v22 = vld [vmem:[#allocation3 + $0x2d8] sm:$0xff] }
 0x437   :  { %4197 = vpow2.f32 %v3346_v23  ;;  %v3345_v25 = vmul.f32 -1.442695, %v769_v24  ;;  %v1178_v23 = vld [vmem:[#allocation3 + $0x2d0] sm:$0xff]  ;;  %3886 = vmatprep.subr.mxu1 %v1179_v22  ;;  %v1177_v24 = vld [vmem:[#allocation3 + $0x2c8] sm:$0xff] }
 0x439   :  { %4199 = vpow2.f32 %v3345_v25  ;;  %v1176_v25 = vld [vmem:[#allocation3 + $0x2c0] sm:$0xff] }
 0x43d   :  { %v430_v26 = vpop.xlane.xlu1 %429 }
 0x43e   :  { %v435_v27 = vmul.f32 0.25, %v430_v26  ;;  %v1175_v26 = vld [vmem:[#allocation3 + $0x2b8] sm:$0xff] }
 0x440   :  { %v437_v28 = vsub.f32 %v4415_v60, %v435_v27  ;;  %v3336_v60 = vld [vmem:[#allocation3 + $0x49c] ss:$0 sm:$0xff]  ;;  %v1174_v27 = vld [vmem:[#allocation3 + $0x2b0] sm:$0xff] }
 0x441   :  { %v433_v29 = vpop.xlane.xlu1 %432 }
 0x442   :  { %v436_v30 = vmul.f32 0.25, %v433_v29  ;;  %v439_v31 = vmul.f32 %v437_v28, %v437_v28  ;;  %v1172_v29 = vld [vmem:[#allocation3 + $0x2a0] sm:$0xff] }
 0x444   :  { %v4198_v32 = vpop.eup %4197  ;;  %v438_v33 = vsub.f32 %v4420_v1, %v436_v30  ;;  %v441_v34 = vsel %vm33_vm1, %v439_v31, 0.0  ;;  %v1171_v30 = vld [vmem:[#allocation3 + $0x298] sm:$0xff]  ;;  %v1170_v31 = vld [vmem:[#allocation3 + $0x290] sm:$0xff] }
 0x445   :  { %v784_v35 = vadd.f32 1.0, %v4198_v32  ;;  %442 = vadd.xlane.f32.xlu0 %v441_v34  ;;  %v1169_v32 = vld [vmem:[#allocation3 + $0x288] sm:$0xff]  ;;  %v1167_v34 = vld [vmem:[#allocation3 + $0x278] sm:$0xff] }
 0x446   :  { %v4200_v36 = vpop.eup %4199  ;;  %v440_v37 = vmul.f32 %v438_v33, %v438_v33 }
 0x447   :  { %4201 = vrcp.f32 %v784_v35  ;;  %v783_v38 = vadd.f32 1.0, %v4200_v36 }
 0x448   :  { %v444_v39 = vsel %vm33_vm1, %v440_v37, 0.0 }
 0x449   :  { %4203 = vrcp.f32 %v783_v38  ;;  %445 = vadd.xlane.f32.xlu1 %v444_v39 }
 0x454   :  { %v4202_v44 = vpop.eup %4201 }
 0x455   :  { %v886_v48 = vmul.f32 %v4202_v44, %v882_v45  ;;  %v1164_v44 = vld [vmem:[#allocation3 + $0x260] sm:$0xff]  ;;  %v1260_v45 = vld [vmem:[#allocation3 + $0x2f8] sm:$0xff] }
 0x456   :  { %v4204_v47 = vpop.eup %4203 }
 0x457   :  { %v885_v49 = vmul.f32 %v4204_v47, %v877_v46  ;;  %v888_v51 = vadd.f32 %v886_v48, %v4411_v58  ;;  %v1259_v46 = vld [vmem:[#allocation3 + $0x2f0] sm:$0xff]  ;;  %v1258_v47 = vld [vmem:[#allocation3 + $0x2e8] sm:$0xff] }
 0x459   :  { %v887_v50 = vadd.f32 %v885_v49, %v4406_v41 }
 0x45b   :  { %3843 = vmatprep.mubr.f32.mxu1 %v887_v50 }
 0x45c   :  { %3844 = vmatmul.mubr.f32.vlgmr.msra.gmra.mxu1 %v888_v51 }
 0x45d   :  { %3887 = vmatpush3.msra.mxu1 %v1179_v22 }
 0x45e   :  { %3888 = vmatprep.subr.mxu1 %v1178_v23 }
 0x45f   :  { %3889 = vmatpush3.msra.mxu1 %v1178_v23 }
 0x460   :  { %3890 = vmatprep.subr.mxu1 %v1177_v24 }
 0x461   :  { %3891 = vmatpush3.msra.mxu1 %v1177_v24 }
 0x462   :  { %3892 = vmatprep.subr.mxu1 %v1176_v25 }
 0x463   :  { %3893 = vmatpush3.msra.mxu1 %v1176_v25 }
 0x464   :  { %3894 = vmatprep.subr.mxu1 %v1175_v26 }
 0x465   :  { %3895 = vmatpush3.msra.mxu1 %v1175_v26 }
 0x466   :  { %3896 = vmatprep.subr.mxu1 %v1174_v27 }
 0x467   :  { %3897 = vmatpush3.msra.mxu1 %v1174_v27 }
 0x4ce   :  { %v443_v52 = vpop.xlane.xlu0 %442 }
 0x4cf   :  { %v447_v53 = vmul.f32 0.25, %v443_v52 }
 0x4d1   :  { %v449_v54 = vadd.f32 1e-05, %v447_v53 }
 0x4d2   :  { %v446_v55 = vpop.xlane.xlu1 %445 }
 0x4d3   :  { %4205 = vrsqrt.f32 %v449_v54  ;;  %v448_v56 = vmul.f32 0.25, %v446_v55 }
 0x4d5   :  { %v450_v57 = vadd.f32 1e-05, %v448_v56  ;;  %v3348_v56 = vld [vmem:[#allocation3 + $0x4a2] ss:$0 sm:$0xff] }
 0x4d7   :  { %4207 = vrsqrt.f32 %v450_v57 }
 0x4e0   :  { %v4206_v59 = vpop.eup %4205 }
 0x4e1   :  { %v453_v61 = vmul.f32 %v4206_v59, %v437_v28  ;;  %v1173_v28 = vld [vmem:[#allocation3 + $0x2a8] sm:$0xff] }
 0x4e2   :  { %3898 = vmatprep.subr.mxu1 %v1173_v28 }
 0x4e3   :  { %v459_v63 = vmul.f32 %v3336_v60, %v453_v61  ;;  %3899 = vmatpush3.msra.mxu1 %v1173_v28 }
 0x4e4   :  { %v4208_v0 = vpop.eup %4207  ;;  %3900 = vmatprep.subr.mxu1 %v1172_v29 }
 0x4e5   :  { %v465_v1 = vadd.f32 %v3337_v62, %v459_v63  ;;  %v454_v41 = vmul.f32 %v4208_v0, %v438_v33  ;;  %3901 = vmatpush3.msra.mxu1 %v1172_v29  ;;  %v1168_v33 = vld [vmem:[#allocation3 + $0x280] sm:$0xff] }
 0x4e6   :  { %3902 = vmatprep.subr.mxu1 %v1171_v30 }
 0x4e7   :  { %v467_v58 = vsel %vm33_vm1, %v465_v1, -inf  ;;  %v460_v2 = vmul.f32 %v3336_v60, %v454_v41  ;;  %3903 = vmatpush3.msra.mxu1 %v1171_v30  ;;  %v3349_v60 = vld [vmem:[#allocation3 + $0x4a3] ss:$0 sm:$0xff] }
 0x4e8   :  { %468 = vmax.xlane.f32.xlu1 %v467_v58  ;;  %3904 = vmatprep.subr.mxu1 %v1170_v31  ;;  %v1257_v58 = vld [vmem:[#allocation3 + $0x2e0] sm:$0xff] }
 0x4e9   :  { %v466_v3 = vadd.f32 %v3337_v62, %v460_v2  ;;  %3905 = vmatpush3.msra.mxu1 %v1170_v31  ;;  %v4357_v2 = vmov 0.0  }
 0x4ea   :  { %3906 = vmatprep.subr.mxu1 %v1169_v32 }
 0x4eb   :  { %v470_v20 = vsel %vm33_vm1, %v466_v3, -inf  ;;  %3907 = vmatpush3.msra.mxu1 %v1169_v32 }
 0x4ec   :  { %471 = vmax.xlane.f32.xlu1 %v470_v20  ;;  %3908 = vmatprep.subr.mxu1 %v1168_v33  ;;  %v4453_v20 = vld [vmem:[#allocation3 + $0x310] sm:$0xff] }
 0x4ed   :  { %3909 = vmatpush3.msra.mxu1 %v1168_v33 }
 0x4ee   :  { %3910 = vmatprep.subr.mxu1 %v1167_v34 }
 0x4ef   :  { %3911 = vmatpush3.msra.mxu1 %v1167_v34 }
 0x4f0   :  { %3912 = vmatprep.subr.mxu1 %v1166_v42 }
 0x4f1   :  { %3913 = vmatpush3.msra.mxu1 %v1166_v42 }
 0x4f2   :  { %3914 = vmatprep.subr.mxu1 %v1165_v43 }
 0x4f3   :  { %3915 = vmatpush3.msra.mxu1 %v1165_v43 }
 0x4f4   :  { %3916 = vmatprep.subr.mxu1 %v1164_v44 }
 0x4f5   :  { %3917 = vmatpush3.msra.mxu1 %v1164_v44 }
 0x4f6   :  { %3943 = vmatprep.subr.mxu1 %v4357_v2 }
 0x51c   :  { %v3845_v4 = vpop.f32.mrf.mxu1 }
 0x51d   :  { %v4432_v21 = vsub.f32 %v888_v51, %v3845_v4  ;;  %v4457_v4 = vld [vmem:[#allocation3 + $0x308] sm:$0xff] }
 0x51e   :  { %v971_v5 = vpop.f32.mrf.mxu1 }
 0x51f   :  { %v4434_v6 = vsub.f32 %v887_v50, %v971_v5  ;;  %v983_v8 = vmul.f32 %v4432_v21, %v4432_v21 }
 0x521   :  { %v982_v7 = vmul.f32 %v4434_v6, %v4434_v6 }
 0x523   :  { %3878 = vmatprep.mubr.f32.mxu0 %v982_v7  ;;  %v3353_v7 = vld [vmem:[#allocation3 + $0x4a4] ss:$0 sm:$0xff] }
 0x524   :  { %3879 = vmatmul.mubr.f32.vlgmr.msra.gmra.mxu0 %v983_v8 }
 0x525   :  { %3882 = vmatpush3.msk.msra.mxu0 %vm40_vm0, %v1077_v19  ;;  %vm3310_vm0 = vcmask 48128  }
 0x526   :  { %3921 = vmatprep.subr.mxu0 %v1260_v45 }
 0x571   :  { %v469_v9 = vpop.xlane.xlu1 %468 }
 0x572   :  { %v473_v10 = vsub.f32 %v465_v1, %v469_v9 }
 0x574   :  { %v475_v11 = vmul.f32 1.442695, %v473_v10 }
 0x575   :  { %v472_v12 = vpop.xlane.xlu1 %471 }
 0x576   :  { %4209 = vpow2.f32 %v475_v11  ;;  %v474_v13 = vsub.f32 %v466_v3, %v472_v12  ;;  %v4449_v3 = vld [vmem:[#allocation3 + $0x318] sm:$0xff] }
 0x578   :  { %v477_v14 = vmul.f32 1.442695, %v474_v13 }
 0x57a   :  { %4211 = vpow2.f32 %v477_v14 }
 0x583   :  { %v4210_v15 = vpop.eup %4209 }
 0x584   :  { %v479_v16 = vsel %vm33_vm1, %v4210_v15, 0.0 }
 0x585   :  { %480 = vadd.xlane.f32.xlu1 %v479_v16 }
 0x587   :  { %v4212_v17 = vpop.eup %4211 }
 0x588   :  { %v482_v18 = vsel %vm33_vm1, %v4212_v17, 0.0 }
 0x589   :  { %483 = vadd.xlane.f32.xlu1 %v482_v18 }
 0x5e4   :  { %v3880_v48 = vpop.f32.mrf.mxu0 }
 0x5e5   :  { %v1056_v51 = vadd.f32 1e-05, %v3880_v48 }
 0x5e6   :  { %v1050_v49 = vpop.f32.mrf.mxu0 }
 0x5e7   :  { %v1051_v50 = vadd.f32 1e-05, %v1050_v49 }
 0x60e   :  { %v481_v35 = vpop.xlane.xlu1 %480 }
 0x60f   :  { %4213 = vrcp.f32 %v481_v35 }
 0x612   :  { %v484_v36 = vpop.xlane.xlu1 %483 }
 0x613   :  { %4215 = vrcp.f32 %v484_v36 }
 0x614   :  { %4217 = vrsqrt.f32 %v1051_v50 }
 0x615   :  { %4219 = vrsqrt.f32 %v1056_v51 }
 0x61c   :  { %v4214_v37 = vpop.eup %4213 }
 0x61d   :  { %v486_v38 = vmul.f32 %v4214_v37, %v4210_v15 }
 0x61f   :  { %3883 = vmatprep.mubr.msk.f32.mxu0 %vm33_vm1, %v486_v38 }
 0x620   :  { %v4216_v39 = vpop.eup %4215 }
 0x621   :  { %v488_v40 = vmul.f32 %v4216_v39, %v4212_v17  ;;  %v4218_v52 = vpop.eup %4217 }
 0x622   :  { %v4220_v53 = vpop.eup %4219  ;;  %v1061_v54 = vmul.f32 %v4218_v52, %v4434_v6 }
 0x623   :  { %3884 = vmatmul.mubr.msk.f32.vlgmr.msra.gmra.mxu0 %vm33_vm1, %v488_v40  ;;  %v1062_v55 = vmul.f32 %v4220_v53, %v4432_v21  ;;  %v4461_v21 = vld [vmem:[#allocation3 + $0x300] sm:$0xff] }
 0x624   :  { %3922 = vmatpush3.msra.mxu0 %v1260_v45  ;;  %v1068_v57 = vmul.f32 %v3348_v56, %v1061_v54 }
 0x625   :  { %3923 = vmatprep.subr.mxu0 %v1259_v46  ;;  %v1069_v59 = vmul.f32 %v3348_v56, %v1062_v55 }
 0x626   :  { %3924 = vmatpush3.msra.mxu0 %v1259_v46  ;;  %v1075_v62 = vadd.f32 %v3349_v60, %v1068_v57 }
 0x627   :  { %3925 = vmatprep.subr.mxu0 %v1258_v47  ;;  %v1076_v63 = vadd.f32 %v3349_v60, %v1069_v59  ;;  %v1791_v59 = vld [vmem:[#allocation3 + $0x338] sm:$0xff] }
 0x628   :  { %3926 = vmatpush3.msra.mxu0 %v1258_v47 }
 0x629   :  { %3927 = vmatprep.subr.mxu0 %v1257_v58 }
 0x62a   :  { %3928 = vmatpush3.msra.mxu0 %v1257_v58 }
 0x62b   :  { %3932 = vmatprep.subr.mxu0 %v4357_v2 }
 0x6e3   :  { %v3885_v61 = vpop.f32.mrf.mxu0 }
 0x6e4   :  { %v1163_v41 = vmul.f32 %v3885_v61, %v1076_v63  ;;  %v1790_v61 = vld [vmem:[#allocation3 + $0x330] sm:$0xff]  ;;  %v1788_v63 = vld [vmem:[#allocation3 + $0x320] sm:$0xff] }
 0x6e5   :  { %v1153_v0 = vpop.f32.mrf.mxu0 }
 0x6e6   :  { %v1162_v1 = vmul.f32 %v1153_v0, %v1075_v62  ;;  %v1789_v62 = vld [vmem:[#allocation3 + $0x328] sm:$0xff] }
 0x6e8   :  { %3918 = vmatprep.mubr.f32.mxu1 %v1162_v1 }
 0x6e9   :  { %3919 = vmatmul.mubr.f32.vlgmr.msra.gmra.mxu1 %v1163_v41 }
 0x6ea   :  { %3944 = vmatpush3.msra.mxu1 %v4449_v3  ;;  %3951 = vmatprep.mubr.msk.f32.mxu1 %vm4358_vm7, %v4357_v2 }
 0x6eb   :  { %3945 = vmatprep.subr.mxu1 %v4357_v2 }
 0x6ec   :  { %3946 = vmatpush3.msra.mxu1 %v4453_v20 }
 0x6ed   :  { %3947 = vmatprep.subr.mxu1 %v4357_v2 }
 0x6ee   :  { %3948 = vmatpush3.msra.mxu1 %v4457_v4 }
 0x6ef   :  { %3949 = vmatprep.subr.mxu1 %v4357_v2 }
 0x6f0   :  { %3950 = vmatpush3.msra.mxu1 %v4461_v21 }
 0x6f1   :  { %3965 = vmatprep.subr.mxu1 %v4357_v2 }
 0x7a9   :  { %v3920_v5 = vpop.f32.mrf.mxu1 }
 0x7aa   :  { %1256 = vst.msk [vmem:[#allocation2 + $0x8] sm:$0xff] %vm128_vm2, %v3920_v5 }
 0x7ab   :  { %v1246_v6 = vpop.f32.mrf.mxu1 }
 0x7ac   :  { %1255 = vst.msk [vmem:[#allocation2] sm:$0xff] %vm128_vm2, %v1246_v6  ;;  %3929 = vmatprep.mubr.msk.f32.mxu0 %vm128_vm2, %v1246_v6 }
 0x7ad   :  { %3930 = vmatmul.mubr.msk.f32.vlgmr.msra.gmra.mxu0 %vm128_vm2, %v3920_v5 }
 0x7ae   :  { %3933 = vmatpush3.msra.mxu0 %v4449_v3  ;;  %3940 = vmatprep.mubr.msk.f32.mxu0 %vm4358_vm7, %v4357_v2 }
 0x7af   :  { %3934 = vmatprep.subr.mxu0 %v4357_v2 }
 0x7b0   :  { %3935 = vmatpush3.msra.mxu0 %v4453_v20 }
 0x7b1   :  { %3936 = vmatprep.subr.mxu0 %v4357_v2  ;;  %v4533_v1 = vld [vmem:[#allocation2 + $0x8] sm:$0xff] }
 0x7b2   :  { %3937 = vmatpush3.msra.mxu0 %v4457_v4 }
 0x7b3   :  { %3938 = vmatprep.subr.mxu0 %v4357_v2  ;;  %v4526_v0 = vld [vmem:[#allocation2] sm:$0xff] }
 0x7b4   :  { %3939 = vmatpush3.msra.mxu0 %v4461_v21 }
 0x7b5   :  { %3941 = vmatmul.mubr.f32.vlgmr.msra.gmra.mxu0 %v4357_v2  ;;  %3954 = vmatprep.subr.mxu0 %v4357_v2 }
 0x7b6   :  { %3955 = vmatpush3.msra.mxu0 %v4449_v3  ;;  %3962 = vmatprep.mubr.msk.f32.mxu0 %vm4358_vm7, %v4357_v2 }
 0x7b7   :  { %3956 = vmatprep.subr.mxu0 %v4357_v2 }
 0x7b8   :  { %3957 = vmatpush3.msra.mxu0 %v4453_v20 }
 0x7b9   :  { %3958 = vmatprep.subr.mxu0 %v4357_v2 }
 0x7ba   :  { %3959 = vmatpush3.msra.mxu0 %v4457_v4 }
 0x7bb   :  { %3960 = vmatprep.subr.mxu0 %v4357_v2 }
 0x7bc   :  { %3961 = vmatpush3.msra.mxu0 %v4461_v21 }
 0x7bd   :  { %3976 = vmatprep.subr.mxu0 %v4357_v2 }
 0x86d   :  { %v3931_v8 = vpop.f32.mrf.mxu0 }
 0x86e   :  { %v1344_v9 = vadd.f32 %v3931_v8, %v3353_v7 }
 0x86f   :  { %v1338_v10 = vpop.f32.mrf.mxu0 }
 0x870   :  { %v1339_v11 = vadd.f32 %v3353_v7, %v1338_v10  ;;  %v1352_v12 = vrot.slane %v1344_v9, 7  ;;  %v1571_v13 = vrot.slane %v1344_v9, 1  ;;  %v1679_v17 = vrot.slane %v1344_v9, 2 }
 0x872   :  { %v1463_v14 = vrot.slane %v1339_v11, 1  ;;  %v1569_v15 = vrot.slane %v1339_v11, 2  ;;  %v1677_v16 = vrot.slane %v1339_v11, 3  ;;  %v1355_v23 = vsel %vm1354_vm8, %v1339_v11, %v1352_v12 }
 0x874   :  { %v1465_v18 = vsel %vm1354_vm8, %v1463_v14, %v1344_v9  ;;  %v4493_v19 = vsel %vm1354_vm8, %v1569_v15, %v1571_v13  ;;  %v4495_v22 = vsel %vm1354_vm8, %v1677_v16, %v1679_v17 }
 0x875   :  { %v1425_v24 = vpop.f32.mrf.mxu0 }
 0x876   :  { %v1429_v25 = vadd.f32 %v1425_v24, %v1355_v23 }
 0x877   :  { %v3942_v26 = vpop.f32.mrf.mxu0 }
 0x878   :  { %4221 = vtanh.f32 %v1429_v25  ;;  %v3356_v28 = vmul.f32 -1.442695, %v1429_v25 }
 0x87a   :  { %4223 = vpow2.f32 %v3356_v28 }
 0x885   :  { %v4222_v27 = vpop.eup %4221 }
 0x886   :  { %1439 = vrot.lane.b32.xlu1 %v4222_v27, %s4359_s1 }
 0x887   :  { %v4224_v29 = vpop.eup %4223 }
 0x888   :  { %v1433_v30 = vadd.f32 1.0, %v4224_v29 }
 0x88a   :  { %4225 = vrcp.f32 %v1433_v30 }
 0x897   :  { %v4226_v31 = vpop.eup %4225 }
 0x898   :  { %v1437_v34 = vmul.f32 0.0, %v4226_v31 }
 0x8f8   :  { %v1440_v32 = vpop.permute.xlu1 %1439 }
 0x8f9   :  { %v1442_v33 = vmul.f32 %v4226_v31, %v1440_v32 }
 0x8fb   :  { %1444 = vrot.lane.b32.xlu0 %v1442_v33, %s4360_s20 }
 0x96d   :  { %v1445_v35 = vpop.permute.xlu0 %1444 }
 0x96e   :  { %v1447_v36 = vadd.f32 %v1445_v35, %v1437_v34 }
 0x970   :  { %4227 = vtanh.f32 %v1447_v36 }
 0x97d   :  { %v4228_v37 = vpop.eup %4227 }
 0x97e   :  { %1450 = vrot.lane.b32.xlu1 %v4228_v37, %s4359_s1 }
 0x9f0   :  { %v1451_v38 = vpop.permute.xlu1 %1450 }
 0x9f1   :  { %v1453_v39 = vmul.f32 %v4226_v31, %v1451_v38 }
 0x9f3   :  { %1455 = vrot.lane.b32.xlu1 %v1453_v39, %s4360_s20 }
 0xa65   :  { %v1456_v40 = vpop.permute.xlu1 %1455 }
 0xa66   :  { %1459 = vst.msk [vmem:[#allocation2 + $0x10] sm:$0x1] %vm1458_vm9, %v1456_v40  ;;  %3952 = vmatmul.mubr.msk.f32.vlgmr.msra.gmra.mxu1 %vm128_vm2, %v1456_v40 }
 0xa67   :  { %1461 = vst.msk [vmem:[#allocation2 + $0x13] sm:$0x2] %vm1460_vm10, %v1456_v40  ;;  %3966 = vmatpush3.msra.mxu1 %v4449_v3  ;;  %3973 = vmatprep.mubr.msk.f32.mxu1 %vm4358_vm7, %v4357_v2 }
 0xa68   :  { %3967 = vmatprep.subr.mxu1 %v4357_v2 }
 0xa69   :  { %3968 = vmatpush3.msra.mxu1 %v4453_v20 }
 0xa6a   :  { %3969 = vmatprep.subr.mxu1 %v4357_v2 }
 0xa6b   :  { %3970 = vmatpush3.msra.mxu1 %v4457_v4 }
 0xa6c   :  { %3971 = vmatprep.subr.mxu1 %v4357_v2 }
 0xa6d   :  { %3972 = vmatpush3.msra.mxu1 %v4461_v21 }
 0xa6e   :  { %3993 = vmatprep.subr.mxu1 %v4357_v2 }
 0xb26   :  { %v1534_v42 = vpop.f32.mrf.mxu1 }
 0xb27   :  { %v1538_v43 = vadd.f32 %v1534_v42, %v1465_v18 }
 0xb28   :  { %v3953_v44 = vpop.f32.mrf.mxu1 }
 0xb29   :  { %4229 = vtanh.f32 %v1538_v43  ;;  %v3358_v46 = vmul.f32 -1.442695, %v1538_v43 }
 0xb2b   :  { %4231 = vpow2.f32 %v3358_v46 }
 0xb36   :  { %v4230_v45 = vpop.eup %4229 }
 0xb37   :  { %1548 = vrot.lane.b32.xlu1 %v4230_v45, %s4359_s1 }
 0xb38   :  { %v4232_v47 = vpop.eup %4231 }
 0xb39   :  { %v1542_v48 = vadd.f32 1.0, %v4232_v47 }
 0xb3b   :  { %4233 = vrcp.f32 %v1542_v48 }
 0xb48   :  { %v4234_v49 = vpop.eup %4233 }
 0xb49   :  { %v1546_v52 = vmul.f32 %v4234_v49, %v1447_v36  ;;  %v3363_v36 = vld [vmem:[#allocation3 + $0x4a5] ss:$0 sm:$0xff] }
 0xba9   :  { %v1549_v50 = vpop.permute.xlu1 %1548 }
 0xbaa   :  { %v1551_v51 = vmul.f32 %v4234_v49, %v1549_v50 }
 0xbac   :  { %1553 = vrot.lane.b32.xlu1 %v1551_v51, %s4360_s20 }
 0xc1e   :  { %v1554_v53 = vpop.permute.xlu1 %1553 }
 0xc1f   :  { %v1556_v54 = vadd.f32 %v1554_v53, %v1546_v52 }
 0xc21   :  { %4235 = vtanh.f32 %v1556_v54 }
 0xc2e   :  { %v4236_v55 = vpop.eup %4235 }
 0xc2f   :  { %1559 = vrot.lane.b32.xlu0 %v4236_v55, %s4359_s1 }
 0xca1   :  { %v1560_v56 = vpop.permute.xlu0 %1559 }
 0xca2   :  { %v1562_v57 = vmul.f32 %v4234_v49, %v1560_v56 }
 0xca4   :  { %1564 = vrot.lane.b32.xlu1 %v1562_v57, %s4360_s20 }
 0xd16   :  { %v1565_v60 = vpop.permute.xlu1 %1564 }
 0xd17   :  { %1567 = vst.msk [vmem:[#allocation2 + $0x11] sm:$0x1] %vm1458_vm9, %v1565_v60  ;;  %3963 = vmatmul.mubr.msk.f32.vlgmr.msra.gmra.mxu0 %vm128_vm2, %v1565_v60 }
 0xd18   :  { %1568 = vst.msk [vmem:[#allocation2 + $0x14] sm:$0x2] %vm1460_vm10, %v1565_v60  ;;  %3977 = vmatpush3.msra.mxu0 %v1791_v59  ;;  %3984 = vmatprep.mubr.msk.f32.mxu0 %vm4358_vm7, %v4357_v2  ;;  %v1981_v59 = vld [vmem:[#allocation3 + $0x358] sm:$0xff]  ;;  %v1980_v60 = vld [vmem:[#allocation3 + $0x350] sm:$0xff] }
 0xd19   :  { %3978 = vmatprep.subr.mxu0 %v4357_v2 }
 0xd1a   :  { %3979 = vmatpush3.msra.mxu0 %v1790_v61  ;;  %v1979_v61 = vld [vmem:[#allocation3 + $0x348] sm:$0xff] }
 0xd1b   :  { %3980 = vmatprep.subr.mxu0 %v4357_v2 }
 0xd1c   :  { %3981 = vmatpush3.msra.mxu0 %v1789_v62  ;;  %v1978_v62 = vld [vmem:[#allocation3 + $0x340] sm:$0xff] }
 0xd1d   :  { %3982 = vmatprep.subr.mxu0 %v4357_v2 }
 0xd1e   :  { %3983 = vmatpush3.msra.mxu0 %v1788_v63 }
 0xd1f   :  { %3985 = vmatmul.mubr.msk.f32.vlgmr.msra.gmra.mxu0 %vm128_vm2, %v4526_v0  ;;  %4010 = vmatprep.subr.mxu0 %v4357_v2 }
 0xd20   :  { %3987 = vmatprep.mubr.msk.f32.mxu0 %vm4358_vm7, %v4357_v2 }
 0xd23   :  { %3988 = vmatmul.mubr.msk.f32.gmra.mxu0 %vm128_vm2, %v4533_v1 }
 0xd24   :  { %3990 = vmatprep.mubr.msk.f32.mxu0 %vm4358_vm7, %v4357_v2 }
 0xdd7   :  { %v1642_v41 = vpop.f32.mrf.mxu0 }
 0xdd8   :  { %v1646_v58 = vadd.f32 %v1642_v41, %v4493_v19 }
 0xdd9   :  { %v3964_v3 = vpop.f32.mrf.mxu0 }
 0xdda   :  { %4237 = vtanh.f32 %v1646_v58  ;;  %v3360_v7 = vmul.f32 -1.442695, %v1646_v58 }
 0xddc   :  { %4239 = vpow2.f32 %v3360_v7 }
 0xddf   :  { %v1872_v20 = vpop.f32.mrf.mxu0 }
 0xde0   :  { %v1873_v37 = vadd.f32 %v3363_v36, %v1872_v20 }
 0xde1   :  { %v3986_v4 = vpop.f32.mrf.mxu0 }
 0xde2   :  { %v3367_v38 = vmul.f32 -1.442695, %v1873_v37 }
 0xde3   :  { %v1877_v21 = vpop.f32.mrf.mxu0 }
 0xde4   :  { %v1878_v42 = vadd.f32 %v3363_v36, %v1877_v21 }
 0xde5   :  { %v3989_v5 = vpop.f32.mrf.mxu0 }
 0xde6   :  { %v3368_v63 = vmul.f32 -1.442695, %v1878_v42 }
 0xde7   :  { %v4238_v6 = vpop.eup %4237 }
 0xde8   :  { %1656 = vrot.lane.b32.xlu0 %v4238_v6, %s4359_s1 }
 0xde9   :  { %v4240_v8 = vpop.eup %4239 }
 0xdea   :  { %v1650_v9 = vadd.f32 1.0, %v4240_v8 }
 0xdec   :  { %4241 = vrcp.f32 %v1650_v9  ;;  %v3370_v9 = vld [vmem:[#allocation3 + $0x4a6] ss:$0 sm:$0xff] }
 0xdf9   :  { %v4242_v10 = vpop.eup %4241 }
 0xdfa   :  { %v1654_v13 = vmul.f32 %v4242_v10, %v1556_v54 }
 0xe5a   :  { %v1657_v11 = vpop.permute.xlu0 %1656 }
 0xe5b   :  { %v1659_v12 = vmul.f32 %v4242_v10, %v1657_v11  ;;  %v3371_v11 = vld [vmem:[#allocation3 + $0x4a7] ss:$0 sm:$0xff] }
 0xe5d   :  { %1661 = vrot.lane.b32.xlu1 %v1659_v12, %s4360_s20 }
 0xecf   :  { %v1662_v14 = vpop.permute.xlu1 %1661 }
 0xed0   :  { %v1664_v15 = vadd.f32 %v1662_v14, %v1654_v13 }
 0xed2   :  { %4243 = vtanh.f32 %v1664_v15 }
 0xedf   :  { %v4244_v16 = vpop.eup %4243 }
 0xee0   :  { %1667 = vrot.lane.b32.xlu0 %v4244_v16, %s4359_s1 }
 0xf52   :  { %v1668_v17 = vpop.permute.xlu0 %1667 }
 0xf53   :  { %v1670_v18 = vmul.f32 %v4242_v10, %v1668_v17 }
 0xf55   :  { %1672 = vrot.lane.b32.xlu1 %v1670_v18, %s4360_s20 }
 0xfc7   :  { %v1673_v19 = vpop.permute.xlu1 %1672 }
 0xfc8   :  { %1675 = vst.msk [vmem:[#allocation2 + $0x12] sm:$0x1] %vm1458_vm9, %v1673_v19  ;;  %3974 = vmatmul.mubr.msk.f32.vlgmr.msra.gmra.mxu1 %vm128_vm2, %v1673_v19 }
 0xfc9   :  { %1676 = vst.msk [vmem:[#allocation2 + $0x15] sm:$0x2] %vm1460_vm10, %v1673_v19  ;;  %4001 = vmatprep.mubr.msk.f32.mxu1 %vm4358_vm7, %v4357_v2  ;;  %3994 = vmatpush3.msra.mxu1 %v1981_v59 }
 0xfca   :  { %3995 = vmatprep.subr.mxu1 %v4357_v2 }
 0xfcb   :  { %3996 = vmatpush3.msra.mxu1 %v1980_v60 }
 0xfcc   :  { %3997 = vmatprep.subr.mxu1 %v4357_v2 }
 0xfcd   :  { %3998 = vmatpush3.msra.mxu1 %v1979_v61 }
 0xfce   :  { %3999 = vmatprep.subr.mxu1 %v4357_v2 }
 0xfcf   :  { %4000 = vmatpush3.msra.mxu1 %v1978_v62 }
 0xfd0   :  { %4025 = vmatprep.subr.mxu1 %v4357_v2 }
0x1088   :  { %v1750_v23 = vpop.f32.mrf.mxu1 }
0x1089   :  { %v1754_v24 = vadd.f32 %v1750_v23, %v4495_v22 }
0x108a   :  { %v3975_v25 = vpop.f32.mrf.mxu1 }
0x108b   :  { %4245 = vtanh.f32 %v1754_v24  ;;  %v3362_v27 = vmul.f32 -1.442695, %v1754_v24 }
0x108d   :  { %4247 = vpow2.f32 %v3362_v27 }
0x1098   :  { %v4246_v26 = vpop.eup %4245 }
0x1099   :  { %1764 = vrot.lane.b32.xlu0 %v4246_v26, %s4359_s1 }
0x109a   :  { %v4248_v28 = vpop.eup %4247 }
0x109b   :  { %v1758_v29 = vadd.f32 1.0, %v4248_v28 }
0x109d   :  { %4249 = vrcp.f32 %v1758_v29 }
0x10aa   :  { %v4250_v30 = vpop.eup %4249 }
0x10ab   :  { %v1762_v33 = vmul.f32 %v4250_v30, %v1664_v15 }
0x110b   :  { %v1765_v31 = vpop.permute.xlu0 %1764 }
0x110c   :  { %v1767_v32 = vmul.f32 %v4250_v30, %v1765_v31 }
0x110e   :  { %1769 = vrot.lane.b32.xlu1 %v1767_v32, %s4360_s20 }
0x1180   :  { %v1770_v34 = vpop.permute.xlu1 %1769 }
0x1181   :  { %v1772_v35 = vadd.f32 %v1770_v34, %v1762_v33 }
0x1183   :  { %4251 = vtanh.f32 %v1772_v35 }
0x1184   :  { %4253 = vpow2.f32 %v3367_v38 }
0x1190   :  { %v4252_v22 = vpop.eup %4251 }
0x1191   :  { %1775 = vrot.lane.b32.xlu0 %v4252_v22, %s4359_s1  ;;  %v4254_v43 = vpop.eup %4253 }
0x1192   :  { %v1895_v44 = vadd.f32 1.0, %v4254_v43 }
0x1194   :  { %4255 = vrcp.f32 %v1895_v44 }
0x1195   :  { %1907 = vrot.lane.b32.xlu0 %v1873_v37, %s4361_s21  ;;  %4257 = vpow2.f32 %v3368_v63 }
0x11a1   :  { %v4256_v46 = vpop.eup %4255 }
0x11a2   :  { %v4258_v3 = vpop.eup %4257 }
0x11a3   :  { %v1896_v20 = vadd.f32 1.0, %v4258_v3 }
0x11a5   :  { %4259 = vrcp.f32 %v1896_v20 }
0x11b2   :  { %v4260_v6 = vpop.eup %4259 }
0x1203   :  { %v1776_v39 = vpop.permute.xlu0 %1775 }
0x1204   :  { %v1778_v40 = vmul.f32 %v4250_v30, %v1776_v39 }
0x1206   :  { %1780 = vrot.lane.b32.xlu1 %v1778_v40, %s4360_s20 }
0x1207   :  { %v1908_v45 = vpop.permute.xlu0 %1907 }
0x1208   :  { %v1916_v47 = vmul.f32 %v4256_v46, %v1908_v45 }
0x120a   :  { %1909 = vrot.lane.b32.xlu1 %v1878_v42, %s4361_s21  ;;  %v1919_v48 = vadd.f32 %v1916_v47, %v4526_v0 }
0x120c   :  { %v1924_v49 = vsel %vm128_vm2, %v1919_v48, 0.0 }
0x122e   :  { %1925 = vadd.xlane.f32.xlu1 %v1924_v49 }
0x1278   :  { %v1781_v50 = vpop.permute.xlu1 %1780 }
0x1279   :  { %1783 = vst.msk [vmem:[#allocation2 + $0x13] sm:$0x1] %vm1458_vm9, %v1781_v50 }
0x127a   :  { %1784 = vst.msk [vmem:[#allocation2 + $0x16] sm:$0x2] %vm1460_vm10, %v1781_v50 }
0x127c   :  { %v1910_v52 = vpop.permute.xlu1 %1909 }
0x127d   :  { %v1917_v8 = vmul.f32 %v4260_v6, %v1910_v52  ;;  %v3372_v52 = vld [vmem:[#allocation3 + $0x4a8] ss:$0 sm:$0xff] }
0x127f   :  { %v1920_v13 = vadd.f32 %v1917_v8, %v4533_v1 }
0x1281   :  { %v1787_v51 = vld [vmem:[#allocation2 + $0x10] sm:$0xff]  ;;  %v1927_v15 = vsel %vm128_vm2, %v1920_v13, 0.0 }
0x1282   :  { %3991 = vmatmul.mubr.msk.f32.gmra.mxu0 %vm128_vm2, %v1787_v51 }
0x1283   :  { %4016 = vmatprep.mubr.msk.f32.mxu0 %vm4358_vm7, %v4357_v2 }
0x12b7   :  { %v1926_v53 = vpop.xlane.xlu1 %1925 }
0x12b8   :  { %v1934_v54 = vmul.f32 0.03125, %v1926_v53 }
0x12ba   :  { %v1937_v55 = vsub.f32 %v1919_v48, %v1934_v54 }
0x12bc   :  { %v1940_v56 = vmul.f32 %v1937_v55, %v1937_v55 }
0x12be   :  { %v1943_v57 = vsel %vm128_vm2, %v1940_v56, 0.0 }
0x12bf   :  { %1944 = vadd.xlane.f32.xlu1 %v1943_v57 }
0x1342   :  { %v1882_v0 = vpop.f32.mrf.mxu0 }
0x1343   :  { %v1883_v41 = vadd.f32 %v3363_v36, %v1882_v0 }
0x1344   :  { %v3992_v58 = vpop.f32.mrf.mxu0 }
0x1345   :  { %1911 = vrot.lane.b32.xlu0 %v1883_v41, %s4361_s21  ;;  %v3369_v16 = vmul.f32 -1.442695, %v1883_v41  ;;  %v2180_v41 = vld [vmem:[#allocation3 + $0x3a0] sm:$0xff] }
0x1348   :  { %v1945_v4 = vpop.xlane.xlu1 %1944 }
0x1349   :  { %v1952_v21 = vmul.f32 0.03125, %v1945_v4 }
0x134b   :  { %v1955_v5 = vadd.f32 1e-05, %v1952_v21  ;;  %v2181_v21 = vld [vmem:[#allocation3 + $0x3a8] sm:$0xff] }
0x134d   :  { %4261 = vrsqrt.f32 %v1955_v5 }
0x134e   :  { %4263 = vpow2.f32 %v3369_v16 }
0x135a   :  { %v4262_v7 = vpop.eup %4261 }
0x135b   :  { %v1961_v10 = vmul.f32 %v4262_v7, %v1937_v55  ;;  %v4264_v17 = vpop.eup %4263 }
0x135c   :  { %v1897_v18 = vadd.f32 1.0, %v4264_v17 }
0x135d   :  { %v1968_v12 = vmul.f32 %v3370_v9, %v1961_v10  ;;  %v2182_v10 = vld [vmem:[#allocation3 + $0x3b0] sm:$0xff] }
0x135e   :  { %4265 = vrcp.f32 %v1897_v18 }
0x135f   :  { %v4570_v14 = vadd.f32 %v3371_v11, %v1968_v12 }
0x1361   :  { %4002 = vmatmul.mubr.msk.f32.vlgmr.msra.gmra.mxu1 %vm128_vm2, %v4570_v14 }
0x1362   :  { %4004 = vmatprep.mubr.msk.f32.mxu1 %vm4358_vm7, %v4357_v2 }
0x1364   :  { %1928 = vadd.xlane.f32.xlu0 %v1927_v15 }
0x136b   :  { %v4266_v19 = vpop.eup %4265 }
0x13b7   :  { %v1912_v23 = vpop.permute.xlu0 %1911 }
0x13b8   :  { %v1918_v24 = vmul.f32 %v4266_v19, %v1912_v23 }
0x13ba   :  { %v1921_v1 = vadd.f32 %v1918_v24, %v1787_v51 }
0x13bc   :  { %v1930_v25 = vsel %vm128_vm2, %v1921_v1, 0.0 }
0x13bd   :  { %1931 = vadd.xlane.f32.xlu0 %v1930_v25 }
0x13ed   :  { %v1929_v26 = vpop.xlane.xlu0 %1928 }
0x13ee   :  { %v1935_v27 = vmul.f32 0.03125, %v1929_v26 }
0x13f0   :  { %v1938_v28 = vsub.f32 %v1920_v13, %v1935_v27 }
0x13f2   :  { %v1941_v29 = vmul.f32 %v1938_v28, %v1938_v28 }
0x13f4   :  { %v1946_v30 = vsel %vm128_vm2, %v1941_v29, 0.0 }
0x13f5   :  { %1947 = vadd.xlane.f32.xlu0 %v1946_v30 }
0x1421   :  { %v2062_v31 = vpop.f32.mrf.mxu1 }
0x1422   :  { %v4596_v56 = vadd.f32 %v3372_v52, %v2062_v31 }
0x1423   :  { %v4003_v32 = vpop.f32.mrf.mxu1 }
0x1446   :  { %v1932_v33 = vpop.xlane.xlu0 %1931 }
0x1447   :  { %v1936_v34 = vmul.f32 0.03125, %v1932_v33 }
0x1449   :  { %v1939_v35 = vsub.f32 %v1921_v1, %v1936_v34 }
0x144b   :  { %v1942_v22 = vmul.f32 %v1939_v35, %v1939_v35 }
0x144d   :  { %v1949_v36 = vsel %vm128_vm2, %v1942_v22, 0.0  ;;  %v2320_v22 = vld [vmem:[#allocation3 + $0x370] sm:$0xff] }
0x144e   :  { %1950 = vadd.xlane.f32.xlu1 %v1949_v36  ;;  %v2319_v36 = vld [vmem:[#allocation3 + $0x368] sm:$0xff] }
0x147e   :  { %v1948_v37 = vpop.xlane.xlu0 %1947 }
0x147f   :  { %v1953_v38 = vmul.f32 0.03125, %v1948_v37 }
0x1481   :  { %v1956_v39 = vadd.f32 1e-05, %v1953_v38 }
0x1483   :  { %4267 = vrsqrt.f32 %v1956_v39 }
0x1490   :  { %v4268_v40 = vpop.eup %4267 }
0x1491   :  { %v1962_v42 = vmul.f32 %v4268_v40, %v1938_v28 }
0x1493   :  { %v1969_v43 = vmul.f32 %v3370_v9, %v1962_v42 }
0x1495   :  { %v4580_v44 = vadd.f32 %v3371_v11, %v1969_v43 }
0x1497   :  { %4005 = vmatmul.mubr.msk.f32.gmra.mxu1 %vm128_vm2, %v4580_v44 }
0x1498   :  { %4007 = vmatprep.mubr.msk.f32.mxu1 %vm4358_vm7, %v4357_v2 }
0x14d7   :  { %v1951_v45 = vpop.xlane.xlu1 %1950 }
0x14d8   :  { %v1954_v46 = vmul.f32 0.03125, %v1951_v45 }
0x14da   :  { %v1957_v47 = vadd.f32 1e-05, %v1954_v46 }
0x14dc   :  { %4269 = vrsqrt.f32 %v1957_v47 }
0x14e9   :  { %v4270_v48 = vpop.eup %4269 }
0x14ea   :  { %v1963_v49 = vmul.f32 %v4270_v48, %v1939_v35  ;;  %v2321_v35 = vld [vmem:[#allocation3 + $0x378] sm:$0xff] }
0x14ec   :  { %v1970_v50 = vmul.f32 %v3370_v9, %v1963_v49 }
0x14ee   :  { %v4586_v51 = vadd.f32 %v3371_v11, %v1970_v50  ;;  %v2318_v50 = vld [vmem:[#allocation3 + $0x360] sm:$0xff] }
0x14f0   :  { %4008 = vmatmul.mubr.msk.f32.gmra.mxu1 %vm128_vm2, %v4586_v51 }
0x14f1   :  { %4031 = vmatprep.mubr.msk.f32.mxu1 %vm4358_vm7, %v4357_v2 }
0x1557   :  { %v2067_v53 = vpop.f32.mrf.mxu1 }
0x1558   :  { %v4592_v54 = vadd.f32 %v3372_v52, %v2067_v53  ;;  %v2418_v53 = vld [vmem:[#allocation3 + $0x390] sm:$0xff] }
0x1559   :  { %v4006_v55 = vpop.f32.mrf.mxu1 }
0x155a   :  { %2081 = vrot.lane.b32.xlu1 %v4592_v54, %s4361_s21 }
0x155e   :  { %2079 = vrot.lane.b32.xlu1 %v4596_v56, %s4361_s21 }
0x15b0   :  { %v2072_v57 = vpop.f32.mrf.mxu1 }
0x15b1   :  { %v2073_v59 = vadd.f32 %v3372_v52, %v2072_v57  ;;  %v2419_v52 = vld [vmem:[#allocation3 + $0x398] sm:$0xff] }
0x15b2   :  { %v4009_v60 = vpop.f32.mrf.mxu1 }
0x15b3   :  { %2083 = vrot.lane.b32.xlu0 %v2073_v59, %s4361_s21 }
0x15cc   :  { %v2082_v62 = vpop.permute.xlu1 %2081 }
0x15d0   :  { %v2080_v63 = vpop.permute.xlu1 %2079 }
0x1625   :  { %v2084_v61 = vpop.permute.xlu0 %2083 }
0x1626   :  { %4011 = vmatpush3.xpose.msk.msra.mxu0 %vm128_vm2, %v2084_v61  ;;  %v2417_v61 = vld [vmem:[#allocation3 + $0x388] sm:$0xff] }
0x1627   :  { %4012 = vmatprep.subr.mxu0 %v4357_v2 }
0x162a   :  { %4013 = vmatpush3.xpose.msk.msra.mxu0 %vm128_vm2, %v2082_v62  ;;  %v2416_v62 = vld [vmem:[#allocation3 + $0x380] sm:$0xff] }
0x162b   :  { %4014 = vmatprep.subr.mxu0 %v4357_v2 }
0x162e   :  { %4015 = vmatpush3.xpose.msk.msra.mxu0 %vm128_vm2, %v2080_v63  ;;  %v3385_v63 = vld [vmem:[#allocation3 + $0x4a9] ss:$0 sm:$0xff] }
0x162f   :  { %4040 = vmatprep.subr.mxu0 %v4357_v2 }
0x1631   :  { %4017 = vmatmul.mubr.msk.f32.vlgmr.msra.gmra.mxu0 %vm128_vm2, %v4596_v56 }
0x1632   :  { %4019 = vmatprep.mubr.msk.f32.mxu0 %vm4358_vm7, %v4357_v2  ;;  %4041 = vmatpush3.msra.mxu0 %v2321_v35 }
0x1633   :  { %4042 = vmatprep.subr.mxu0 %v4357_v2 }
0x1634   :  { %4043 = vmatpush3.msra.mxu0 %v2320_v22 }
0x1635   :  { %4020 = vmatmul.mubr.msk.f32.gmra.mxu0 %vm128_vm2, %v4592_v54  ;;  %4044 = vmatprep.subr.mxu0 %v4357_v2 }
0x1636   :  { %4022 = vmatprep.mubr.msk.f32.mxu0 %vm4358_vm7, %v4357_v2  ;;  %4045 = vmatpush3.msra.mxu0 %v2319_v36 }
0x1637   :  { %4046 = vmatprep.subr.mxu0 %v4357_v2 }
0x1638   :  { %4047 = vmatpush3.msra.mxu0 %v2318_v50 }
0x1639   :  { %4023 = vmatmul.mubr.msk.f32.gmra.mxu0 %vm128_vm2, %v2073_v59  ;;  %4074 = vmatprep.subr.mxu0 %v4357_v2 }
0x163a   :  { %4048 = vmatprep.mubr.msk.f32.mxu0 %vm4358_vm7, %v4357_v2 }
0x16f1   :  { %v2163_v0 = vpop.f32.mrf.mxu0 }
0x16f2   :  { %v2177_v58 = vmul.f32 0.17677669, %v2163_v0 }
0x16f3   :  { %v4018_v3 = vpop.f32.mrf.mxu0 }
0x16f4   :  { %v2183_v20 = vadd.f32 %v2180_v41, %v2177_v58 }
0x16f5   :  { %v2168_v4 = vpop.f32.mrf.mxu0 }
0x16f6   :  { %v2178_v5 = vmul.f32 0.17677669, %v2168_v4  ;;  %v2187_v6 = vsel %vm2186_vm11, %v2183_v20, -inf }
0x16f7   :  { %2188 = vmax.xlane.f32.xlu0 %v2187_v6  ;;  %v4021_v7 = vpop.f32.mrf.mxu0 }
0x16f8   :  { %v2184_v8 = vadd.f32 %v2181_v21, %v2178_v5  ;;  %v3389_v7 = vld [vmem:[#allocation3 + $0x4aa] ss:$0 sm:$0xff] }
0x16f9   :  { %v2173_v9 = vpop.f32.mrf.mxu0 }
0x16fa   :  { %v2179_v11 = vmul.f32 0.17677669, %v2173_v9  ;;  %v2190_v12 = vsel %vm2186_vm11, %v2184_v8, -inf }
0x16fb   :  { %2191 = vmax.xlane.f32.xlu1 %v2190_v12  ;;  %v4024_v13 = vpop.f32.mrf.mxu0 }
0x16fc   :  { %v2185_v15 = vadd.f32 %v2182_v10, %v2179_v11 }
0x16fe   :  { %v2193_v16 = vsel %vm2186_vm11, %v2185_v15, -inf }
0x16ff   :  { %2194 = vmax.xlane.f32.xlu0 %v2193_v16 }
0x170c   :  { %2224 = vrot.lane.b32.xlu1 %v2073_v59, %s4359_s1 }
0x1780   :  { %v2189_v17 = vpop.xlane.xlu0 %2188 }
0x1781   :  { %v2196_v18 = vsub.f32 %v2183_v20, %v2189_v17 }
0x1783   :  { %v2199_v19 = vmul.f32 1.442695, %v2196_v18 }
0x1784   :  { %v2192_v23 = vpop.xlane.xlu1 %2191 }
0x1785   :  { %4271 = vpow2.f32 %v2199_v19  ;;  %v2197_v24 = vsub.f32 %v2184_v8, %v2192_v23 }
0x1787   :  { %v2201_v1 = vmul.f32 1.442695, %v2197_v24 }
0x1788   :  { %v2225_v25 = vpop.permute.xlu1 %2224  ;;  %v2195_v26 = vpop.xlane.xlu0 %2194 }
0x1789   :  { %4273 = vpow2.f32 %v2201_v1  ;;  %v2198_v27 = vsub.f32 %v2185_v15, %v2195_v26  ;;  %4026 = vmatpush3.msra.mxu1 %v2225_v25 }
0x178a   :  { %4027 = vmatprep.subr.mxu1 %v4357_v2 }
0x178b   :  { %v2203_v28 = vmul.f32 1.442695, %v2198_v27 }
0x178d   :  { %4275 = vpow2.f32 %v2203_v28 }
0x1792   :  { %v4272_v29 = vpop.eup %4271 }
0x1793   :  { %v2205_v30 = vsel %vm2186_vm11, %v4272_v29, 0.0 }
0x1794   :  { %2206 = vadd.xlane.f32.xlu0 %v2205_v30 }
0x1796   :  { %v4274_v31 = vpop.eup %4273 }
0x1797   :  { %v2208_v32 = vsel %vm2186_vm11, %v4274_v31, 0.0 }
0x1798   :  { %2209 = vadd.xlane.f32.xlu1 %v2208_v32 }
0x179a   :  { %v4276_v33 = vpop.eup %4275 }
0x179b   :  { %v2211_v34 = vsel %vm2186_vm11, %v4276_v33, 0.0 }
0x179c   :  { %2212 = vadd.xlane.f32.xlu0 %v2211_v34 }
0x17a9   :  { %2220 = vrot.lane.b32.xlu1 %v4596_v56, %s4359_s1 }
0x17b2   :  { %2222 = vrot.lane.b32.xlu0 %v4592_v54, %s4359_s1 }
0x181d   :  { %v2207_v37 = vpop.xlane.xlu0 %2206 }
0x181e   :  { %4277 = vrcp.f32 %v2207_v37 }
0x1821   :  { %v2210_v38 = vpop.xlane.xlu1 %2209 }
0x1822   :  { %4279 = vrcp.f32 %v2210_v38 }
0x1825   :  { %v2213_v39 = vpop.xlane.xlu0 %2212  ;;  %v2221_v43 = vpop.permute.xlu1 %2220 }
0x1826   :  { %4281 = vrcp.f32 %v2213_v39 }
0x1829   :  { %v2223_v40 = vpop.permute.xlu0 %2222 }
0x182a   :  { %4028 = vmatpush3.msra.mxu1 %v2223_v40 }
0x182b   :  { %v4278_v42 = vpop.eup %4277  ;;  %4029 = vmatprep.subr.mxu1 %v4357_v2 }
0x182c   :  { %v2215_v45 = vmul.f32 %v4278_v42, %v4272_v29  ;;  %4030 = vmatpush3.msra.mxu1 %v2221_v43 }
0x182d   :  { %4057 = vmatprep.subr.mxu1 %v4357_v2 }
0x182e   :  { %4032 = vmatmul.mubr.msk.f32.vlgmr.msra.gmra.mxu1 %vm2186_vm11, %v2215_v45 }
0x182f   :  { %v4280_v46 = vpop.eup %4279  ;;  %4034 = vmatprep.mubr.msk.f32.mxu1 %vm4358_vm7, %v4357_v2  ;;  %4058 = vmatpush3.msra.mxu1 %v2419_v52 }
0x1830   :  { %v2217_v47 = vmul.f32 %v4280_v46, %v4274_v31  ;;  %4059 = vmatprep.subr.mxu1 %v4357_v2 }
0x1831   :  { %4060 = vmatpush3.msra.mxu1 %v2418_v53 }
0x1832   :  { %4035 = vmatmul.mubr.msk.f32.gmra.mxu1 %vm2186_vm11, %v2217_v47  ;;  %4061 = vmatprep.subr.mxu1 %v4357_v2 }
0x1833   :  { %v4282_v48 = vpop.eup %4281  ;;  %4037 = vmatprep.mubr.msk.f32.mxu1 %vm4358_vm7, %v4357_v2  ;;  %4062 = vmatpush3.msra.mxu1 %v2417_v61  ;;  %v2607_v61 = vld [vmem:[#allocation3 + $0x3c8] sm:$0xff] }
0x1834   :  { %v2219_v49 = vmul.f32 %v4282_v48, %v4276_v33  ;;  %4063 = vmatprep.subr.mxu1 %v4357_v2 }
0x1835   :  { %4064 = vmatpush3.msra.mxu1 %v2416_v62  ;;  %v2606_v62 = vld [vmem:[#allocation3 + $0x3c0] sm:$0xff] }
0x1836   :  { %4038 = vmatmul.mubr.msk.f32.gmra.mxu1 %vm2186_vm11, %v2219_v49  ;;  %4091 = vmatprep.subr.mxu1 %v4357_v2 }
0x1837   :  { %4065 = vmatprep.mubr.msk.f32.mxu1 %vm4358_vm7, %v4357_v2 }
0x18ee   :  { %v2304_v54 = vpop.f32.mrf.mxu1 }
0x18ef   :  { %4049 = vmatmul.mubr.msk.f32.vlgmr.msra.gmra.mxu0 %vm128_vm2, %v2304_v54 }
0x18f0   :  { %v4033_v55 = vpop.f32.mrf.mxu1  ;;  %4051 = vmatprep.mubr.msk.f32.mxu0 %vm4358_vm7, %v4357_v2 }
0x18f2   :  { %v2309_v56 = vpop.f32.mrf.mxu1 }
0x18f3   :  { %4052 = vmatmul.mubr.msk.f32.gmra.mxu0 %vm128_vm2, %v2309_v56 }
0x18f4   :  { %v4036_v57 = vpop.f32.mrf.mxu1  ;;  %4054 = vmatprep.mubr.msk.f32.mxu0 %vm4358_vm7, %v4357_v2 }
0x18f6   :  { %v2314_v59 = vpop.f32.mrf.mxu1 }
0x18f7   :  { %4055 = vmatmul.mubr.msk.f32.gmra.mxu0 %vm128_vm2, %v2314_v59 }
0x18f8   :  { %v4039_v60 = vpop.f32.mrf.mxu1  ;;  %4082 = vmatprep.mubr.msk.f32.mxu0 %vm4358_vm7, %v4357_v2 }
0x18f9   :  { %v2608_v60 = vld [vmem:[#allocation3 + $0x3d0] sm:$0xff] }
0x18fa   :  { %4075 = vmatpush3.msra.mxu0 %v2608_v60 }
0x18fb   :  { %4076 = vmatprep.subr.mxu0 %v4357_v2 }
0x18fc   :  { %4077 = vmatpush3.msra.mxu0 %v2607_v61 }
0x18fd   :  { %4078 = vmatprep.subr.mxu0 %v4357_v2 }
0x18fe   :  { %4079 = vmatpush3.msra.mxu0 %v2606_v62 }
0x18ff   :  { %4080 = vmatprep.subr.mxu0 %v4357_v2 }
0x19af   :  { %v2402_v0 = vpop.f32.mrf.mxu0 }
0x19b0   :  { %v2403_v41 = vadd.f32 %v3385_v63, %v2402_v0  ;;  %v2706_v0 = vld [vmem:[#allocation3 + $0x3f0] sm:$0xff] }
0x19b1   :  { %v4050_v58 = vpop.f32.mrf.mxu0 }
0x19b2   :  { %4066 = vmatmul.mubr.msk.f32.vlgmr.msra.gmra.mxu1 %vm128_vm2, %v2403_v41  ;;  %v2705_v41 = vld [vmem:[#allocation3 + $0x3e8] sm:$0xff] }
0x19b3   :  { %v2407_v3 = vpop.f32.mrf.mxu0  ;;  %4068 = vmatprep.mubr.msk.f32.mxu1 %vm4358_vm7, %v4357_v2  ;;  %4092 = vmatpush3.msra.mxu1 %v2706_v0 }
0x19b4   :  { %v2408_v20 = vadd.f32 %v3385_v63, %v2407_v3  ;;  %4093 = vmatprep.subr.mxu1 %v4357_v2 }
0x19b5   :  { %v4053_v4 = vpop.f32.mrf.mxu0  ;;  %4094 = vmatpush3.msra.mxu1 %v2705_v41 }
0x19b6   :  { %4069 = vmatmul.mubr.msk.f32.gmra.mxu1 %vm128_vm2, %v2408_v20  ;;  %4095 = vmatprep.subr.mxu1 %v4357_v2 }
0x19b7   :  { %v2412_v21 = vpop.f32.mrf.mxu0  ;;  %4071 = vmatprep.mubr.msk.f32.mxu1 %vm4358_vm7, %v4357_v2 }
0x19b8   :  { %v2413_v5 = vadd.f32 %v3385_v63, %v2412_v21  ;;  %v2605_v63 = vld [vmem:[#allocation3 + $0x3b8] sm:$0xff] }
0x19b9   :  { %v4056_v6 = vpop.f32.mrf.mxu0  ;;  %4081 = vmatpush3.msra.mxu0 %v2605_v63 }
0x19ba   :  { %4072 = vmatmul.mubr.msk.f32.gmra.mxu1 %vm128_vm2, %v2413_v5  ;;  %4108 = vmatprep.subr.mxu0 %v4357_v2 }
0x19bb   :  { %4099 = vmatprep.mubr.msk.f32.mxu1 %vm4358_vm7, %v4357_v2 }
0x1a72   :  { %v2500_v8 = vpop.f32.mrf.mxu1 }
0x1a73   :  { %v2501_v9 = vadd.f32 %v3389_v7, %v2500_v8 }
0x1a74   :  { %v4067_v10 = vpop.f32.mrf.mxu1 }
0x1a75   :  { %2535 = vrot.lane.b32.xlu1 %v2501_v9, %s4361_s21  ;;  %v3393_v18 = vmul.f32 -1.442695, %v2501_v9  ;;  %v3396_v10 = vld [vmem:[#allocation3 + $0x4ab] ss:$0 sm:$0xff] }
0x1a76   :  { %v2505_v11 = vpop.f32.mrf.mxu1 }
0x1a77   :  { %v2506_v12 = vadd.f32 %v3389_v7, %v2505_v11  ;;  %4283 = vpow2.f32 %v3393_v18 }
0x1a78   :  { %v4070_v13 = vpop.f32.mrf.mxu1 }
0x1a79   :  { %2537 = vrot.lane.b32.xlu0 %v2506_v12, %s4361_s21  ;;  %v3394_v19 = vmul.f32 -1.442695, %v2506_v12  ;;  %v3397_v12 = vld [vmem:[#allocation3 + $0x4ac] ss:$0 sm:$0xff] }
0x1a7a   :  { %v2510_v15 = vpop.f32.mrf.mxu1 }
0x1a7b   :  { %v2511_v16 = vadd.f32 %v3389_v7, %v2510_v15  ;;  %4285 = vpow2.f32 %v3394_v19 }
0x1a7c   :  { %v4073_v17 = vpop.f32.mrf.mxu1 }
0x1a7d   :  { %2539 = vrot.lane.b32.xlu1 %v2511_v16, %s4361_s21  ;;  %v3395_v23 = vmul.f32 -1.442695, %v2511_v16 }
0x1a7f   :  { %4287 = vpow2.f32 %v3395_v23 }
0x1a84   :  { %v4284_v24 = vpop.eup %4283 }
0x1a85   :  { %v2523_v1 = vadd.f32 1.0, %v4284_v24 }
0x1a87   :  { %4289 = vrcp.f32 %v2523_v1 }
0x1a88   :  { %v4286_v25 = vpop.eup %4285 }
0x1a89   :  { %v2524_v26 = vadd.f32 1.0, %v4286_v25 }
0x1a8b   :  { %4291 = vrcp.f32 %v2524_v26  ;;  %v2704_v26 = vld [vmem:[#allocation3 + $0x3e0] sm:$0xff] }
0x1a8c   :  { %v4288_v27 = vpop.eup %4287  ;;  %4096 = vmatpush3.msra.mxu1 %v2704_v26 }
0x1a8d   :  { %v2525_v28 = vadd.f32 1.0, %v4288_v27  ;;  %4097 = vmatprep.subr.mxu1 %v4357_v2  ;;  %v2703_v27 = vld [vmem:[#allocation3 + $0x3d8] sm:$0xff] }
0x1a8e   :  { %4098 = vmatpush3.msra.mxu1 %v2703_v27 }
0x1a8f   :  { %4293 = vrcp.f32 %v2525_v28  ;;  %4125 = vmatprep.subr.mxu1 %v4357_v2  ;;  %v3398_v28 = vld [vmem:[#allocation3 + $0x4ad] ss:$0 sm:$0xff] }
0x1a94   :  { %v4290_v29 = vpop.eup %4289 }
0x1a98   :  { %v4292_v33 = vpop.eup %4291 }
0x1a9c   :  { %v4294_v37 = vpop.eup %4293 }
0x1ae7   :  { %v2536_v30 = vpop.permute.xlu1 %2535 }
0x1ae8   :  { %v2544_v31 = vmul.f32 %v4290_v29, %v2536_v30 }
0x1aea   :  { %v2547_v32 = vadd.f32 %v2544_v31, %v4570_v14 }
0x1aeb   :  { %v2538_v34 = vpop.permute.xlu0 %2537 }
0x1aec   :  { %v2545_v35 = vmul.f32 %v4292_v33, %v2538_v34  ;;  %v2552_v22 = vsel %vm128_vm2, %v2547_v32, 0.0 }
0x1aed   :  { %2553 = vadd.xlane.f32.xlu0 %v2552_v22 }
0x1aee   :  { %v2548_v36 = vadd.f32 %v2545_v35, %v4580_v44 }
0x1aef   :  { %v2540_v38 = vpop.permute.xlu1 %2539 }
0x1af0   :  { %v2546_v39 = vmul.f32 %v4294_v37, %v2540_v38  ;;  %v2555_v40 = vsel %vm128_vm2, %v2548_v36, 0.0  ;;  %v2822_v37 = vld [vmem:[#allocation3 + $0x410] sm:$0xff]  ;;  %v2821_v38 = vld [vmem:[#allocation3 + $0x408] sm:$0xff] }
0x1af1   :  { %2556 = vadd.xlane.f32.xlu1 %v2555_v40  ;;  %v2819_v40 = vld [vmem:[#allocation3 + $0x3f8] sm:$0xff] }
0x1af2   :  { %v2549_v42 = vadd.f32 %v2546_v39, %v4586_v51  ;;  %v2820_v39 = vld [vmem:[#allocation3 + $0x400] sm:$0xff] }
0x1af4   :  { %v2558_v43 = vsel %vm128_vm2, %v2549_v42, 0.0 }
0x1af5   :  { %2559 = vadd.xlane.f32.xlu0 %v2558_v43 }
0x1b76   :  { %v2554_v14 = vpop.xlane.xlu0 %2553 }
0x1b77   :  { %v2561_v45 = vmul.f32 0.03125, %v2554_v14 }
0x1b79   :  { %v2564_v46 = vsub.f32 %v2547_v32, %v2561_v45 }
0x1b7a   :  { %v2557_v47 = vpop.xlane.xlu1 %2556 }
0x1b7b   :  { %v2562_v48 = vmul.f32 0.03125, %v2557_v47  ;;  %v2567_v49 = vmul.f32 %v2564_v46, %v2564_v46 }
0x1b7d   :  { %v2565_v50 = vsub.f32 %v2548_v36, %v2562_v48  ;;  %v2570_v44 = vsel %vm128_vm2, %v2567_v49, 0.0 }
0x1b7e   :  { %2571 = vadd.xlane.f32.xlu0 %v2570_v44  ;;  %v2560_v52 = vpop.xlane.xlu0 %2559 }
0x1b7f   :  { %v2563_v53 = vmul.f32 0.03125, %v2560_v52  ;;  %v2568_v54 = vmul.f32 %v2565_v50, %v2565_v50 }
0x1b81   :  { %v2566_v55 = vsub.f32 %v2549_v42, %v2563_v53  ;;  %v2573_v56 = vsel %vm128_vm2, %v2568_v54, 0.0  ;;  %v3402_v42 = vld [vmem:[#allocation3 + $0x4ae] ss:$0 sm:$0xff] }
0x1b82   :  { %2574 = vadd.xlane.f32.xlu1 %v2573_v56 }
0x1b83   :  { %v2569_v57 = vmul.f32 %v2566_v55, %v2566_v55 }
0x1b85   :  { %v2576_v59 = vsel %vm128_vm2, %v2569_v57, 0.0 }
0x1b86   :  { %2577 = vadd.xlane.f32.xlu0 %v2576_v59 }
0x1c07   :  { %v2572_v58 = vpop.xlane.xlu0 %2571 }
0x1c08   :  { %v2579_v3 = vmul.f32 0.03125, %v2572_v58 }
0x1c0a   :  { %v2582_v20 = vadd.f32 1e-05, %v2579_v3 }
0x1c0b   :  { %v2575_v4 = vpop.xlane.xlu1 %2574 }
0x1c0c   :  { %4295 = vrsqrt.f32 %v2582_v20  ;;  %v2580_v21 = vmul.f32 0.03125, %v2575_v4  ;;  %v3409_v20 = vld [vmem:[#allocation3 + $0x4af] ss:$0 sm:$0xff] }
0x1c0e   :  { %v2583_v5 = vadd.f32 1e-05, %v2580_v21 }
0x1c0f   :  { %v2578_v6 = vpop.xlane.xlu0 %2577 }
0x1c10   :  { %4297 = vrsqrt.f32 %v2583_v5  ;;  %v2581_v7 = vmul.f32 0.03125, %v2578_v6 }
0x1c12   :  { %v2584_v8 = vadd.f32 1e-05, %v2581_v7 }
0x1c14   :  { %4299 = vrsqrt.f32 %v2584_v8 }
0x1c19   :  { %v4296_v9 = vpop.eup %4295 }
0x1c1a   :  { %v2588_v11 = vmul.f32 %v4296_v9, %v2564_v46 }
0x1c1c   :  { %v2595_v13 = vmul.f32 %v3396_v10, %v2588_v11 }
0x1c1d   :  { %v4298_v15 = vpop.eup %4297 }
0x1c1e   :  { %v2602_v16 = vadd.f32 %v3397_v12, %v2595_v13  ;;  %v2589_v17 = vmul.f32 %v4298_v15, %v2565_v50 }
0x1c20   :  { %4083 = vmatmul.mubr.msk.f32.vlgmr.msra.gmra.mxu0 %vm128_vm2, %v2602_v16  ;;  %v2596_v18 = vmul.f32 %v3396_v10, %v2589_v17 }
0x1c21   :  { %v4300_v19 = vpop.eup %4299  ;;  %4085 = vmatprep.mubr.msk.f32.mxu0 %vm4358_vm7, %v4357_v2  ;;  %4109 = vmatpush3.msra.mxu0 %v2822_v37 }
0x1c22   :  { %v2603_v23 = vadd.f32 %v3397_v12, %v2596_v18  ;;  %v2590_v24 = vmul.f32 %v4300_v19, %v2566_v55  ;;  %4110 = vmatprep.subr.mxu0 %v4357_v2 }
0x1c23   :  { %4111 = vmatpush3.msra.mxu0 %v2821_v38 }
0x1c24   :  { %4086 = vmatmul.mubr.msk.f32.gmra.mxu0 %vm128_vm2, %v2603_v23  ;;  %v2597_v1 = vmul.f32 %v3396_v10, %v2590_v24  ;;  %4112 = vmatprep.subr.mxu0 %v4357_v2 }
0x1c25   :  { %4088 = vmatprep.mubr.msk.f32.mxu0 %vm4358_vm7, %v4357_v2  ;;  %4113 = vmatpush3.msra.mxu0 %v2820_v39 }
0x1c26   :  { %v2604_v25 = vadd.f32 %v3397_v12, %v2597_v1  ;;  %4114 = vmatprep.subr.mxu0 %v4357_v2 }
0x1c27   :  { %4115 = vmatpush3.msra.mxu0 %v2819_v40 }
0x1c28   :  { %4089 = vmatmul.mubr.msk.f32.gmra.mxu0 %vm128_vm2, %v2604_v25  ;;  %4142 = vmatprep.subr.mxu0 %v4357_v2 }
0x1c29   :  { %4116 = vmatprep.mubr.msk.f32.mxu0 %vm4358_vm7, %v4357_v2 }
0x1ce0   :  { %v2689_v29 = vpop.f32.mrf.mxu0 }
0x1ce1   :  { %v4696_v30 = vadd.f32 %v3398_v28, %v2689_v29 }
0x1ce2   :  { %v4084_v31 = vpop.f32.mrf.mxu0 }
0x1ce3   :  { %4100 = vmatmul.mubr.msk.f32.vlgmr.msra.gmra.mxu1 %vm128_vm2, %v4696_v30 }
0x1ce4   :  { %v2694_v32 = vpop.f32.mrf.mxu0  ;;  %4102 = vmatprep.mubr.msk.f32.mxu1 %vm4358_vm7, %v4357_v2 }
0x1ce5   :  { %v4702_v33 = vadd.f32 %v3398_v28, %v2694_v32 }
0x1ce6   :  { %v4087_v34 = vpop.f32.mrf.mxu0 }
0x1ce7   :  { %4103 = vmatmul.mubr.msk.f32.gmra.mxu1 %vm128_vm2, %v4702_v33 }
0x1ce8   :  { %v2699_v35 = vpop.f32.mrf.mxu0  ;;  %4105 = vmatprep.mubr.msk.f32.mxu1 %vm4358_vm7, %v4357_v2 }
0x1ce9   :  { %v4708_v22 = vadd.f32 %v3398_v28, %v2699_v35 }
0x1cea   :  { %v4090_v36 = vpop.f32.mrf.mxu0 }
0x1ceb   :  { %4106 = vmatmul.mubr.msk.f32.gmra.mxu1 %vm128_vm2, %v4708_v22 }
0x1cec   :  { %4133 = vmatprep.mubr.msk.f32.mxu1 %vm4358_vm7, %v4357_v2 }
0x1da3   :  { %v2787_v43 = vpop.f32.mrf.mxu1 }
0x1da4   :  { %v2788_v14 = vadd.f32 %v3402_v42, %v2787_v43 }
0x1da5   :  { %v4101_v45 = vpop.f32.mrf.mxu1 }
0x1da6   :  { %v2804_v46 = vmin.f32 %v2788_v14, 0.0  ;;  %vm2801_vm12 = vcmp.gt.f32.partialorder %v2788_v14, 0.0 }
0x1da7   :  { %v2792_v47 = vpop.f32.mrf.mxu1 }
0x1da8   :  { %v2807_v48 = vmul.f32 1.442695, %v2804_v46  ;;  %v2793_v49 = vadd.f32 %v3402_v42, %v2792_v47 }
0x1da9   :  { %v4104_v50 = vpop.f32.mrf.mxu1 }
0x1daa   :  { %4301 = vpow2.f32 %v2807_v48  ;;  %v2805_v44 = vmin.f32 %v2793_v49, 0.0  ;;  %vm2802_vm13 = vcmp.gt.f32.partialorder %v2793_v49, 0.0 }
0x1dab   :  { %v2797_v52 = vpop.f32.mrf.mxu1 }
0x1dac   :  { %v2809_v53 = vmul.f32 1.442695, %v2805_v44  ;;  %v2798_v54 = vadd.f32 %v3402_v42, %v2797_v52 }
0x1dad   :  { %v4107_v55 = vpop.f32.mrf.mxu1 }
0x1dae   :  { %4303 = vpow2.f32 %v2809_v53  ;;  %v2806_v56 = vmin.f32 %v2798_v54, 0.0  ;;  %vm2803_vm14 = vcmp.gt.f32.partialorder %v2798_v54, 0.0  ;;  %v3010_v55 = vld [vmem:[#allocation3 + $0x428] sm:$0xff] }
0x1db0   :  { %v2811_v57 = vmul.f32 1.442695, %v2806_v56  ;;  %v3009_v56 = vld [vmem:[#allocation3 + $0x420] sm:$0xff] }
0x1db2   :  { %4305 = vpow2.f32 %v2811_v57  ;;  %v3008_v57 = vld [vmem:[#allocation3 + $0x418] sm:$0xff] }
0x1db7   :  { %v4302_v59 = vpop.eup %4301 }
0x1db8   :  { %v3406_v60 = vadd.f32 -1.0, %v4302_v59 }
0x1dba   :  { %v2816_v61 = vsel %vm2801_vm12, %v2788_v14, %v3406_v60 }
0x1dbb   :  { %v4304_v62 = vpop.eup %4303  ;;  %4117 = vmatmul.mubr.msk.f32.vlgmr.msra.gmra.mxu0 %vm128_vm2, %v2816_v61 }
0x1dbc   :  { %4119 = vmatprep.mubr.msk.f32.mxu0 %vm4358_vm7, %v4357_v2  ;;  %v3407_v63 = vadd.f32 -1.0, %v4304_v62 }
0x1dbe   :  { %v2817_v0 = vsel %vm2802_vm13, %v2793_v49, %v3407_v63 }
0x1dbf   :  { %v4306_v41 = vpop.eup %4305  ;;  %4120 = vmatmul.mubr.msk.f32.gmra.mxu0 %vm128_vm2, %v2817_v0 }
0x1dc0   :  { %4122 = vmatprep.mubr.msk.f32.mxu0 %vm4358_vm7, %v4357_v2  ;;  %v3408_v58 = vadd.f32 -1.0, %v4306_v41 }
0x1dc2   :  { %v2818_v3 = vsel %vm2803_vm14, %v2798_v54, %v3408_v58  ;;  %v3011_v54 = vld [vmem:[#allocation3 + $0x430] sm:$0xff] }
0x1dc3   :  { %4123 = vmatmul.mubr.msk.f32.gmra.mxu0 %vm128_vm2, %v2818_v3  ;;  %4126 = vmatpush3.msra.mxu1 %v3011_v54 }
0x1dc4   :  { %4150 = vmatprep.mubr.msk.f32.mxu0 %vm4358_vm7, %v4357_v2  ;;  %4127 = vmatprep.subr.mxu1 %v4357_v2 }
0x1dc5   :  { %4128 = vmatpush3.msra.mxu1 %v3010_v55  ;;  %v3424_v55 = vld [vmem:[#allocation3 + $0x4b4] ss:$0 sm:$0xff] }
0x1dc6   :  { %4129 = vmatprep.subr.mxu1 %v4357_v2 }
0x1dc7   :  { %4130 = vmatpush3.msra.mxu1 %v3009_v56 }
0x1dc8   :  { %4131 = vmatprep.subr.mxu1 %v4357_v2 }
0x1dc9   :  { %4132 = vmatpush3.msra.mxu1 %v3008_v57 }
0x1dca   :  { %4153 = vmatprep.subr.mxu1 %v4357_v2 }
0x1e7b   :  { %v2903_v4 = vpop.f32.mrf.mxu0 }
0x1e7c   :  { %v2904_v21 = vadd.f32 %v3409_v20, %v2903_v4  ;;  %v3416_v4 = vld [vmem:[#allocation3 + $0x4b0] ss:$0 sm:$0xff] }
0x1e7d   :  { %v4118_v5 = vpop.f32.mrf.mxu0 }
0x1e7e   :  { %2938 = vrot.lane.b32.xlu1 %v2904_v21, %s4361_s21  ;;  %v3413_v12 = vmul.f32 -1.442695, %v2904_v21  ;;  %v3417_v5 = vld [vmem:[#allocation3 + $0x4b1] ss:$0 sm:$0xff] }
0x1e7f   :  { %v2908_v6 = vpop.f32.mrf.mxu0 }
0x1e80   :  { %v2909_v7 = vadd.f32 %v3409_v20, %v2908_v6  ;;  %4307 = vpow2.f32 %v3413_v12 }
0x1e81   :  { %v4121_v8 = vpop.f32.mrf.mxu0 }
0x1e82   :  { %2940 = vrot.lane.b32.xlu0 %v2909_v7, %s4361_s21  ;;  %v3414_v13 = vmul.f32 -1.442695, %v2909_v7 }
0x1e83   :  { %v2913_v9 = vpop.f32.mrf.mxu0 }
0x1e84   :  { %v2914_v10 = vadd.f32 %v3409_v20, %v2913_v9  ;;  %4309 = vpow2.f32 %v3414_v13 }
0x1e85   :  { %v4124_v11 = vpop.f32.mrf.mxu0 }
0x1e86   :  { %2942 = vrot.lane.b32.xlu1 %v2914_v10, %s4361_s21  ;;  %v3415_v15 = vmul.f32 -1.442695, %v2914_v10 }
0x1e88   :  { %4311 = vpow2.f32 %v3415_v15 }
0x1e8d   :  { %v4308_v16 = vpop.eup %4307 }
0x1e8e   :  { %v2926_v17 = vadd.f32 1.0, %v4308_v16 }
0x1e90   :  { %4313 = vrcp.f32 %v2926_v17 }
0x1e91   :  { %v4310_v18 = vpop.eup %4309 }
0x1e92   :  { %v2927_v19 = vadd.f32 1.0, %v4310_v18 }
0x1e94   :  { %4315 = vrcp.f32 %v2927_v19 }
0x1e95   :  { %v4312_v23 = vpop.eup %4311 }
0x1e96   :  { %v2928_v24 = vadd.f32 1.0, %v4312_v23 }
0x1e98   :  { %4317 = vrcp.f32 %v2928_v24  ;;  %v3418_v24 = vld [vmem:[#allocation3 + $0x4b2] ss:$0 sm:$0xff] }
0x1e9d   :  { %v4314_v1 = vpop.eup %4313 }
0x1ea1   :  { %v4316_v28 = vpop.eup %4315 }
0x1ea5   :  { %v4318_v35 = vpop.eup %4317 }
0x1ef0   :  { %v2939_v25 = vpop.permute.xlu1 %2938 }
0x1ef1   :  { %v2947_v26 = vmul.f32 %v4314_v1, %v2939_v25 }
0x1ef3   :  { %v2950_v27 = vadd.f32 %v2947_v26, %v4696_v30 }
0x1ef4   :  { %v2941_v29 = vpop.permute.xlu0 %2940 }
0x1ef5   :  { %v2948_v31 = vmul.f32 %v4316_v28, %v2941_v29  ;;  %v2955_v32 = vsel %vm128_vm2, %v2950_v27, 0.0 }
0x1ef6   :  { %2956 = vadd.xlane.f32.xlu1 %v2955_v32 }
0x1ef7   :  { %v2951_v34 = vadd.f32 %v2948_v31, %v4702_v33 }
0x1ef8   :  { %v2943_v36 = vpop.permute.xlu1 %2942 }
0x1ef9   :  { %v2949_v37 = vmul.f32 %v4318_v35, %v2943_v36  ;;  %v2958_v38 = vsel %vm128_vm2, %v2951_v34, 0.0 }
0x1efa   :  { %2959 = vadd.xlane.f32.xlu0 %v2958_v38 }
0x1efb   :  { %v2952_v39 = vadd.f32 %v2949_v37, %v4708_v22 }
0x1efd   :  { %v2961_v40 = vsel %vm128_vm2, %v2952_v39, 0.0 }
0x1efe   :  { %2962 = vadd.xlane.f32.xlu0 %v2961_v40 }
0x1f7f   :  { %v2957_v30 = vpop.xlane.xlu1 %2956 }
0x1f80   :  { %v2964_v42 = vmul.f32 0.03125, %v2957_v30 }
0x1f82   :  { %v2967_v43 = vsub.f32 %v2950_v27, %v2964_v42  ;;  %v3144_v42 = vld [vmem:[#allocation3 + $0x450] sm:$0xff] }
0x1f83   :  { %v2960_v14 = vpop.xlane.xlu0 %2959  ;;  %4143 = vmatpush3.msra.mxu0 %v3144_v42 }
0x1f84   :  { %v2965_v45 = vmul.f32 0.03125, %v2960_v14  ;;  %v2970_v46 = vmul.f32 %v2967_v43, %v2967_v43  ;;  %4144 = vmatprep.subr.mxu0 %v4357_v2  ;;  %v3142_v14 = vld [vmem:[#allocation3 + $0x440] sm:$0xff] }
0x1f86   :  { %v2968_v47 = vsub.f32 %v2951_v34, %v2965_v45  ;;  %v2973_v33 = vsel %vm128_vm2, %v2970_v46, 0.0  ;;  %v3230_v45 = vld [vmem:[#allocation3 + $0x490] sm:$0xff]  ;;  %v3229_v46 = vld [vmem:[#allocation3 + $0x488] sm:$0xff] }
0x1f87   :  { %2974 = vadd.xlane.f32.xlu1 %v2973_v33  ;;  %v2963_v48 = vpop.xlane.xlu0 %2962  ;;  %v3227_v33 = vld [vmem:[#allocation3 + $0x478] sm:$0xff] }
0x1f88   :  { %v2966_v49 = vmul.f32 0.03125, %v2963_v48  ;;  %v2971_v50 = vmul.f32 %v2968_v47, %v2968_v47  ;;  %v3226_v48 = vld [vmem:[#allocation3 + $0x470] sm:$0xff] }
0x1f8a   :  { %v2969_v44 = vsub.f32 %v2952_v39, %v2966_v49  ;;  %v2976_v52 = vsel %vm128_vm2, %v2971_v50, 0.0  ;;  %v3225_v49 = vld [vmem:[#allocation3 + $0x468] sm:$0xff] }
0x1f8b   :  { %2977 = vadd.xlane.f32.xlu0 %v2976_v52 }
0x1f8c   :  { %v2972_v22 = vmul.f32 %v2969_v44, %v2969_v44 }
0x1f8e   :  { %v2979_v53 = vsel %vm128_vm2, %v2972_v22, 0.0 }
0x1f8f   :  { %2980 = vadd.xlane.f32.xlu1 %v2979_v53  ;;  %v3423_v53 = vld [vmem:[#allocation3 + $0x4b3] ss:$0 sm:$0xff] }
0x2010   :  { %v2975_v59 = vpop.xlane.xlu1 %2974 }
0x2011   :  { %v2982_v60 = vmul.f32 0.03125, %v2975_v59  ;;  %v3224_v59 = vld [vmem:[#allocation3 + $0x460] sm:$0xff] }
0x2013   :  { %v2985_v61 = vadd.f32 1e-05, %v2982_v60  ;;  %v3223_v60 = vld [vmem:[#allocation3 + $0x458] sm:$0xff] }
0x2014   :  { %v2978_v62 = vpop.xlane.xlu0 %2977 }
0x2015   :  { %4319 = vrsqrt.f32 %v2985_v61  ;;  %v2983_v63 = vmul.f32 0.03125, %v2978_v62  ;;  %v3425_v61 = vld [vmem:[#allocation3 + $0x4b5] ss:$0 sm:$0xff] }
0x2017   :  { %v2986_v0 = vadd.f32 1e-05, %v2983_v63 }
0x2018   :  { %v2981_v41 = vpop.xlane.xlu1 %2980 }
0x2019   :  { %4321 = vrsqrt.f32 %v2986_v0  ;;  %v2984_v58 = vmul.f32 0.03125, %v2981_v41  ;;  %v3427_v41 = vld [vmem:[#allocation3 + $0x4b6] ss:$0 sm:$0xff] }
0x201b   :  { %v2987_v3 = vadd.f32 1e-05, %v2984_v58 }
0x201d   :  { %4323 = vrsqrt.f32 %v2987_v3 }
0x2022   :  { %v4320_v20 = vpop.eup %4319 }
0x2023   :  { %v2991_v21 = vmul.f32 %v4320_v20, %v2967_v43  ;;  %v3143_v43 = vld [vmem:[#allocation3 + $0x448] sm:$0xff] }
0x2024   :  { %4145 = vmatpush3.msra.mxu0 %v3143_v43 }
0x2025   :  { %v2998_v6 = vmul.f32 %v3416_v4, %v2991_v21  ;;  %4146 = vmatprep.subr.mxu0 %v4357_v2 }
0x2026   :  { %v4322_v7 = vpop.eup %4321  ;;  %4147 = vmatpush3.msra.mxu0 %v3142_v14 }
0x2027   :  { %v3005_v8 = vadd.f32 %v3417_v5, %v2998_v6  ;;  %v2992_v9 = vmul.f32 %v4322_v7, %v2968_v47  ;;  %4148 = vmatprep.subr.mxu0 %v4357_v2  ;;  %v3228_v47 = vld [vmem:[#allocation3 + $0x480] sm:$0xff] }
0x2029   :  { %4134 = vmatmul.mubr.msk.f32.vlgmr.msra.gmra.mxu1 %vm128_vm2, %v3005_v8  ;;  %v2999_v10 = vmul.f32 %v3416_v4, %v2992_v9 }
0x202a   :  { %v4324_v11 = vpop.eup %4323  ;;  %4136 = vmatprep.mubr.msk.f32.mxu1 %vm4358_vm7, %v4357_v2  ;;  %4154 = vmatpush3.msra.mxu1 %v3230_v45 }
0x202b   :  { %v3006_v12 = vadd.f32 %v3417_v5, %v2999_v10  ;;  %v2993_v13 = vmul.f32 %v4324_v11, %v2969_v44  ;;  %4155 = vmatprep.subr.mxu1 %v4357_v2 }
0x202c   :  { %4156 = vmatpush3.msra.mxu1 %v3229_v46 }
0x202d   :  { %4137 = vmatmul.mubr.msk.f32.gmra.mxu1 %vm128_vm2, %v3006_v12  ;;  %v3000_v15 = vmul.f32 %v3416_v4, %v2993_v13  ;;  %4157 = vmatprep.subr.mxu1 %v4357_v2 }
0x202e   :  { %4139 = vmatprep.mubr.msk.f32.mxu1 %vm4358_vm7, %v4357_v2  ;;  %4158 = vmatpush3.msra.mxu1 %v3228_v47 }
0x202f   :  { %v3007_v16 = vadd.f32 %v3417_v5, %v3000_v15  ;;  %4159 = vmatprep.subr.mxu1 %v4357_v2 }
0x2030   :  { %4160 = vmatpush3.msra.mxu1 %v3227_v33 }
0x2031   :  { %4140 = vmatmul.mubr.msk.f32.gmra.mxu1 %vm128_vm2, %v3007_v16  ;;  %4161 = vmatprep.subr.mxu1 %v4357_v2 }
0x2032   :  { %4169 = vmatprep.mubr.msk.f32.mxu1 %vm4358_vm7, %v4357_v2  ;;  %4162 = vmatpush3.msra.mxu1 %v3226_v48 }
0x2033   :  { %4163 = vmatprep.subr.mxu1 %v4357_v2 }
0x2034   :  { %4164 = vmatpush3.msra.mxu1 %v3225_v49 }
0x2035   :  { %4165 = vmatprep.subr.mxu1 %v4357_v2 }
0x2036   :  { %4166 = vmatpush3.msra.mxu1 %v3224_v59 }
0x2037   :  { %4167 = vmatprep.subr.mxu1 %v4357_v2 }
0x2038   :  { %4168 = vmatpush3.msra.mxu1 %v3223_v60 }
0x20e9   :  { %v3092_v17 = vpop.f32.mrf.mxu1 }
0x20eb   :  { %v4135_v18 = vpop.f32.mrf.mxu1 }
0x20ed   :  { %v3096_v19 = vpop.f32.mrf.mxu1 }
0x20ef   :  { %v4138_v23 = vpop.f32.mrf.mxu1 }
0x20f1   :  { %v3100_v1 = vpop.f32.mrf.mxu1 }
0x20f2   :  { %v3101_v25 = vadd.f32 %v3418_v24, %v3100_v1 }
0x20f3   :  { %v4141_v26 = vpop.f32.mrf.mxu1 }
0x20f4   :  { %3111 = vrot.lane.b32.xlu0 %v3101_v25, %s4361_s21  ;;  %v3422_v27 = vmul.f32 -1.442695, %v3101_v25 }
0x20f6   :  { %4325 = vpow2.f32 %v3422_v27 }
0x2103   :  { %v4326_v28 = vpop.eup %4325 }
0x2104   :  { %v3107_v29 = vadd.f32 1.0, %v4326_v28 }
0x2106   :  { %4327 = vrcp.f32 %v3107_v29 }
0x2113   :  { %v4328_v31 = vpop.eup %4327 }
0x2166   :  { %v3112_v32 = vpop.permute.xlu0 %3111 }
0x2167   :  { %v3114_v34 = vmul.f32 %v4328_v31, %v3112_v32 }
0x2169   :  { %v3115_v35 = vadd.f32 %v3114_v34, %v4586_v51  ;;  %v3141_v51 = vld [vmem:[#allocation3 + $0x438] sm:$0xff] }
0x216a   :  { %4149 = vmatpush3.msra.mxu0 %v3141_v51 }
0x216b   :  { %v3118_v36 = vsel %vm128_vm2, %v3115_v35, 0.0 }
0x216c   :  { %3119 = vadd.xlane.f32.xlu1 %v3118_v36 }
0x21f5   :  { %v3120_v37 = vpop.xlane.xlu1 %3119 }
0x21f6   :  { %v3121_v38 = vmul.f32 0.03125, %v3120_v37 }
0x21f8   :  { %v3122_v39 = vsub.f32 %v3115_v35, %v3121_v38 }
0x21fa   :  { %v3123_v40 = vmul.f32 %v3122_v39, %v3122_v39 }
0x21fc   :  { %v3124_v30 = vsel %vm128_vm2, %v3123_v40, 0.0 }
0x21fd   :  { %3125 = vadd.xlane.f32.xlu1 %v3124_v30 }
0x2286   :  { %v3126_v50 = vpop.xlane.xlu1 %3125 }
0x2287   :  { %v3127_v44 = vmul.f32 0.03125, %v3126_v50 }
0x2289   :  { %v3128_v52 = vadd.f32 1e-05, %v3127_v44 }
0x228b   :  { %4329 = vrsqrt.f32 %v3128_v52 }
0x2298   :  { %v4330_v22 = vpop.eup %4329 }
0x2299   :  { %v3130_v54 = vmul.f32 %v4330_v22, %v3122_v39 }
0x229b   :  { %v3135_v56 = vmul.f32 %v3423_v53, %v3130_v54 }
0x229d   :  { %v3140_v57 = vadd.f32 %v3424_v55, %v3135_v56 }
0x229f   :  { %4151 = vmatmul.mubr.msk.f32.vlgmr.msra.gmra.mxu0 %vm128_vm2, %v3140_v57 }
0x235f   :  { %v3219_v62 = vpop.f32.mrf.mxu0 }
0x2360   :  { %v3220_v63 = vadd.f32 %v3425_v61, %v3219_v62 }
0x2361   :  { %v4152_v0 = vpop.f32.mrf.mxu0 }
0x2362   :  { %4170 = vmatmul.mubr.msk.f32.vlgmr.msra.gmra.mxu1 %vm3236_vm15, %v3220_v63 }
0x2422   :  { %v3306_v58 = vpop.f32.mrf.mxu1 }
0x2423   :  { %v3307_v3 = vadd.f32 %v3427_v41, %v3306_v58 }
0x2424   :  { %v4171_v20 = vpop.f32.mrf.mxu1 }
0x2425   :  { %3311 = vst.msk [vmem:[%s4772_s2] sm:$0xff] %vm3310_vm0, %v3307_v3 }
0x2426   :  { %3316 = vsyncpa [#allocation4], 1 }

</bundles_post_ra>
